<compile_context>
chip_gen: v5e
topology: v5e:2x2
jax: 0.10.0
libtpu: 0.0.40
codegen_flags: <defaults>
</compile_context>

<pallas_src>
import math

import jax
import jax.numpy as jnp
from jax.experimental import pallas as pl
from jax.experimental.pallas import tpu as pltpu


# ----------------------------------------------------------------------------
# Kernel
# ----------------------------------------------------------------------------
def make_mha_kernel(n_head, d_model, block_q, seq_kv, block_k, compute_dtype):
    d_tensor = d_model // n_head
    approx_recip = compute_dtype != jnp.float32   # keep exact math in f32 mode
    n_kv_tiles = seq_kv // block_k

    def kernel(q_ref, k_ref, v_ref, w_ref, b_ref, o_ref, kh_ref, vh_ref):
        qi = pl.program_id(1)

        # ---- once per batch: K/V projection + head split (hoisted) ---------
        @pl.when(qi == 0)
        def _project_kv():
            xk = k_ref[0].astype(compute_dtype)                    # (Lk, D)
            xv = v_ref[0].astype(compute_dtype)
            kp = jnp.dot(xk, w_ref[1],
                         preferred_element_type=jnp.float32) + b_ref[1:2]
            vp = jnp.dot(xv, w_ref[2],
                         preferred_element_type=jnp.float32) + b_ref[2:3]
            # (Lk, D) -> (H, Lk, dt); this relayout now runs once per batch,
            # not once per q tile.
            kh_ref[...] = jnp.transpose(
                kp.reshape(seq_kv, n_head, d_tensor), (1, 0, 2)
            ).astype(compute_dtype)
            vh_ref[...] = jnp.transpose(
                vp.reshape(seq_kv, n_head, d_tensor), (1, 0, 2)
            ).astype(compute_dtype)

        # ---- per q tile: Q projection (scale already folded into w_q/b_q) --
        xq = q_ref[0].astype(compute_dtype)                        # (TQ, D)
        qp = jnp.dot(xq, w_ref[0],
                     preferred_element_type=jnp.float32) + b_ref[0:1]
        qh = jnp.transpose(
            qp.reshape(block_q, n_head, d_tensor), (1, 0, 2)
        ).astype(compute_dtype)                                    # (H, TQ, dt)

        # ---- flash attention (online softmax) over kv tiles from scratch ---
        def attend(kc, vc, carry):
            m_prev, l_prev, acc_prev = carry
            s = jnp.einsum("hqd,hkd->hqk", qh, kc,
                           preferred_element_type=jnp.float32)     # (H,TQ,bk)
            m_new = jnp.maximum(m_prev, jnp.max(s, axis=-1, keepdims=True))
            alpha = jnp.exp(m_prev - m_new)
            # TODO(synk): on v6e/v7x exp() could run in bf16 on the EUP; kept f32.
            p = jnp.exp(s - m_new)
            l_new = alpha * l_prev + jnp.sum(p, axis=-1, keepdims=True)
            acc_new = alpha * acc_prev + jnp.einsum(
                "hqk,hkd->hqd", p.astype(compute_dtype), vc,
                preferred_element_type=jnp.float32)
            return m_new, l_new, acc_new

        m0 = jnp.full((n_head, block_q, 1), -jnp.inf, jnp.float32)
        l0 = jnp.zeros((n_head, block_q, 1), jnp.float32)
        a0 = jnp.zeros((n_head, block_q, d_tensor), jnp.float32)

        if n_kv_tiles == 1:
            m_i, l_i, acc = attend(kh_ref[...], vh_ref[...], (m0, l0, a0))
        else:
            def kv_step(ki, carry):
                off = pl.multiple_of(ki * block_k, block_k)
                kc = kh_ref[:, pl.ds(off, block_k), :]
                vc = vh_ref[:, pl.ds(off, block_k), :]
                return attend(kc, vc, carry)
            m_i, l_i, acc = jax.lax.fori_loop(0, n_kv_tiles, kv_step,
                                              (m0, l0, a0))

        ctx = acc * pl.reciprocal(l_i, approx=approx_recip)        # (H, TQ, dt)

        # concat heads -> (TQ, D), then output projection (lane-dense output).
        concat = jnp.transpose(ctx, (1, 0, 2)).reshape(block_q, d_model)
        out = jnp.dot(concat.astype(compute_dtype), w_ref[3],
                      preferred_element_type=jnp.float32) + b_ref[3:4]
        o_ref[0] = out.astype(o_ref.dtype)

        # TODO(synk): mask=None path only; masked_fill(mask==0, -10000) of
        # ScaleDotProductAttention is not implemented.
        # TODO(synk): no head packing for the 256-wide v6e/v7x MXU when
        # d_tensor <= 128 (needs block-diagonal QK^T packing).

    return kernel


# ----------------------------------------------------------------------------
# Wrapper / parameter preparation
# ----------------------------------------------------------------------------
def _pick_tile(n, cap=512):
    """Largest divisor of n that is <= cap (multiples of 8 preferred)."""
    if n <= cap:
        return n
    for t in range(cap, 7, -1):
        if n % t == 0 and t % 8 == 0:
            return t
    for t in range(cap, 1, -1):
        if n % t == 0:
            return t
    # TODO(synk): pad prime-length sequences instead of a full-length tile.
    return n


def _vmem_limit_bytes(frac=0.84, fallback=128 * 1024 * 1024):
    """~84% of physical VMEM (~54 MiB on v7x, ~107 MiB on v5e/v6e)."""
    cap = fallback
    try:
        info = pltpu.get_tpu_info()
        cap = int(getattr(info, "vmem_capacity_bytes", None) or fallback)
    except Exception:
        pass
    return max(32 * 1024 * 1024, int(cap * frac))


def _grid_invariant_spec(block_shape, index_map):
    """Single-buffer grid-invariant operands (weights/bias) when supported."""
    try:
        return pl.BlockSpec(block_shape, index_map, pipeline_mode=pl.Buffered(1))
    except Exception:
        return pl.BlockSpec(block_shape, index_map)


def prepare_mha_params(params, n_head, compute_dtype=jnp.bfloat16):
    """One-time prep (call once, reuse every forward): transpose to
    (d_in, d_out), fold 1/sqrt(d_tensor) into the q projection, stack, and
    cast the weights to the MXU compute dtype (bf16 -> half the weight DMA
    and VMEM, no per-step cast)."""
    d_model = params["w_q"].shape[0]
    scale = 1.0 / math.sqrt(d_model // n_head)
    w_stack = jnp.stack([params["w_q"].T * scale, params["w_k"].T,
                         params["w_v"].T, params["w_o"].T]).astype(compute_dtype)
    b_stack = jnp.stack([params["b_q"] * scale, params["b_k"],
                         params["b_v"], params["b_o"]]).astype(jnp.float32)
    return w_stack, b_stack


def multi_head_attention(q, k, v, w_stack, b_stack, n_head, *,
                         block_q=None, block_k=None):
    """q, k, v: [batch, length, d_model]; w_stack/b_stack from prepare_mha_params."""
    B, L, D = q.shape
    Lk = k.shape[1]
    assert v.shape[1] == Lk and k.shape[2] == D and v.shape[2] == D
    assert D % n_head == 0
    d_tensor = D // n_head
    compute_dtype = w_stack.dtype

    block_q = block_q if block_q is not None else _pick_tile(L)
    block_k = block_k if block_k is not None else _pick_tile(Lk)
    assert L % block_q == 0 and Lk % block_k == 0

    kernel = make_mha_kernel(n_head, D, block_q, Lk, block_k, compute_dtype)

    grid = (B, L // block_q)
    q_spec = pl.BlockSpec((1, block_q, D), lambda b, i: (b, i, 0))
    kv_spec = pl.BlockSpec((1, Lk, D), lambda b, i: (b, 0, 0))
    out_spec = pl.BlockSpec((1, block_q, D), lambda b, i: (b, i, 0))

    def run(single_buffer_weights):
        if single_buffer_weights:
            w_spec = _grid_invariant_spec((4, D, D), lambda b, i: (0, 0, 0))
            bias_spec = _grid_invariant_spec((4, D), lambda b, i: (0, 0))
        else:
            w_spec = pl.BlockSpec((4, D, D), lambda b, i: (0, 0, 0))
            bias_spec = pl.BlockSpec((4, D), lambda b, i: (0, 0))
        return pl.pallas_call(
            kernel,
            out_shape=jax.ShapeDtypeStruct((B, L, D), q.dtype),
            grid_spec=pltpu.PrefetchScalarGridSpec(
                num_scalar_prefetch=0,
                grid=grid,
                in_specs=[q_spec, kv_spec, kv_spec, w_spec, bias_spec],
                out_specs=out_spec,
                scratch_shapes=[
                    pltpu.VMEM((n_head, Lk, d_tensor), compute_dtype),  # kh
                    pltpu.VMEM((n_head, Lk, d_tensor), compute_dtype),  # vh
                ],
            ),
            # TODO(synk): for B == 1 the batch-parallel axis is idle on one
            # megacore; would need per-core K/V projection to parallelize qi.
            compiler_params=pltpu.CompilerParams(
                dimension_semantics=("parallel", "arbitrary"),
                vmem_limit_bytes=_vmem_limit_bytes(),
            ),
        )(q, k, v, w_stack, b_stack)

    try:
        return run(True)
    except Exception:
        # pl.Buffered / pipeline_mode unsupported on this JAX: default buffering.
        return run(False)


# ----------------------------------------------------------------------------
# Plain-JAX reference (mirrors the PyTorch forward exactly, f32)
# ----------------------------------------------------------------------------
def mha_reference(q, k, v, params, n_head):
    B, L, D = q.shape
    d_tensor = D // n_head

    def lin(x, w, b):
        return x @ w.T + b

    def split(t):
        return t.reshape(B, -1, n_head, d_tensor).transpose(0, 2, 1, 3)

    qp = lin(q, params["w_q"], params["b_q"])
    kp = lin(k, params["w_k"], params["b_k"])
    vp = lin(v, params["w_v"], params["b_v"])
    qh, kh, vh = split(qp), split(kp), split(vp)
    score = jnp.einsum("bhld,bhmd->bhlm", qh, kh) / math.sqrt(d_tensor)
    attn = jax.nn.softmax(score, axis=-1)
    out = jnp.einsum("bhlm,bhmd->bhld", attn, vh)
    out = out.transpose(0, 2, 1, 3).reshape(B, L, D)
    return lin(out, params["w_o"], params["b_o"])


def init_params(key, d_model):
    """Deterministic synthetic init; PyTorch (out_features, in_features) layout."""
    ks = jax.random.split(key, 16)
    bound = 1.0 / math.sqrt(d_model)

    def w(kk):
        return jax.random.uniform(kk, (d_model, d_model), jnp.float32, -bound, bound)

    def b(kk):
        return jax.random.uniform(kk, (d_model,), jnp.float32, -bound, bound)

    return {
        "w_q": w(ks[0]), "b_q": b(ks[1]),
        "w_k": w(ks[2]), "b_k": b(ks[3]),
        "w_v": w(ks[4]), "b_v": b(ks[5]),
        "w_o": w(ks[6]), "b_o": b(ks[7]),
        # qk1/qk2/qk3 exist in __init__ but are unused in forward; kept for parity.
        "w_qk1": w(ks[8]), "b_qk1": b(ks[9]),
        "w_qk2": w(ks[10]), "b_qk2": b(ks[11]),
        "w_qk3": w(ks[12]), "b_qk3": b(ks[13]),
    }


if __name__ == "__main__":
    B, L, D, H = 2, 16, 32, 4   # batch, seq length, d_model, n_head

    key = jax.random.PRNGKey(0)
    kq, kk, kv_, kp = jax.random.split(key, 4)
    q = jax.random.normal(kq, (B, L, D), jnp.float32)
    k = jax.random.normal(kk, (B, L, D), jnp.float32)
    v = jax.random.normal(kv_, (B, L, D), jnp.float32)
    params = init_params(kp, D)

    ref = mha_reference(q, k, v, params, H)

    # Exact-precision path: f32 weights/MXU, exact reciprocal, single q/kv tile.
    w32, b32 = prepare_mha_params(params, H, compute_dtype=jnp.float32)
    out_f32 = jax.block_until_ready(multi_head_attention(q, k, v, w32, b32, H))
    assert out_f32.shape == (B, L, D)
    assert jnp.allclose(out_f32, ref, atol=1e-4, rtol=1e-4), "f32 mismatch vs reference"

    # Forced tiling: exercises the per-batch K/V hoist (pl.when + scratch reuse
    # across q tiles) and the online-softmax loop over kv tiles.
    out_tiled = jax.block_until_ready(
        multi_head_attention(q, k, v, w32, b32, H, block_q=8, block_k=8))
    assert jnp.allclose(out_tiled, ref, atol=1e-4, rtol=1e-4), "tiled mismatch vs reference"

    # Performance path: bf16 weights / MXU operands, f32 accumulation & softmax.
    wbf, bbf = prepare_mha_params(params, H, compute_dtype=jnp.bfloat16)
    out_bf16 = jax.block_until_ready(multi_head_attention(q, k, v, wbf, bbf, H))
    assert out_bf16.shape == (B, L, D)
    assert jnp.allclose(out_bf16, ref, atol=5e-2, rtol=5e-2), "bf16 mismatch vs reference"

    print("KERNEL_OK")
</pallas_src>

<mosaic_0001>
module attributes {stable_mosaic.version = 11 : i64} {
  func.func @kernel(%arg0: i32, %arg1: i32, %arg2: memref<1x16x32xf32, #tpu.memory_space<vmem>>, %arg3: memref<1x16x32xf32, #tpu.memory_space<vmem>>, %arg4: memref<1x16x32xf32, #tpu.memory_space<vmem>>, %arg5: memref<4x32x32xf32, #tpu.memory_space<vmem>>, %arg6: memref<4x32xf32, #tpu.memory_space<vmem>>, %arg7: memref<1x16x32xf32, #tpu.memory_space<vmem>>, %arg8: memref<4x16x8xf32, #tpu.memory_space<vmem>>, %arg9: memref<4x16x8xf32, #tpu.memory_space<vmem>>) attributes {dimension_semantics = [#tpu.dimension_semantics<parallel>, #tpu.dimension_semantics<arbitrary>], iteration_bounds = array<i64: 2, 1>, scalar_prefetch = 0 : i64, scratch_operands = 2 : i64, tpu.core_type = #tpu.core_type<tc>, window_params = [{transform_indices = @transform_0, window_bounds = array<i64: 1, 16, 32>}, {transform_indices = @transform_1, window_bounds = array<i64: 1, 16, 32>}, {transform_indices = @transform_2, window_bounds = array<i64: 1, 16, 32>}, {pipeline_mode = #tpu.pipeline_mode<synchronous>, transform_indices = @transform_3, window_bounds = array<i64: 4, 32, 32>}, {pipeline_mode = #tpu.pipeline_mode<synchronous>, transform_indices = @transform_4, window_bounds = array<i64: 4, 32>}, {transform_indices = @transform_5, window_bounds = array<i64: 1, 16, 32>}]} {
    %c0_i32 = arith.constant 0 : i32
    %0 = arith.cmpi eq, %arg1, %c0_i32 : i32
    %1 = arith.extui %0 : i1 to i32
    %c0_i32_0 = arith.constant 0 : i32
    %2 = arith.cmpi ne, %1, %c0_i32_0 : i32
    scf.if %2 {
      %c0_29 = arith.constant 0 : index
      %c0_30 = arith.constant 0 : index
      %c0_31 = arith.constant 0 : index
      %49 = vector.load %arg3[%c0_29, %c0_30, %c0_31] : memref<1x16x32xf32, #tpu.memory_space<vmem>>, vector<1x16x32xf32>
      %50 = vector.shape_cast %49 : vector<1x16x32xf32> to vector<16x32xf32>
      %c0_32 = arith.constant 0 : index
      %c0_33 = arith.constant 0 : index
      %c0_34 = arith.constant 0 : index
      %51 = vector.load %arg4[%c0_32, %c0_33, %c0_34] : memref<1x16x32xf32, #tpu.memory_space<vmem>>, vector<1x16x32xf32>
      %52 = vector.shape_cast %51 : vector<1x16x32xf32> to vector<16x32xf32>
      %c1 = arith.constant 1 : index
      %c0_35 = arith.constant 0 : index
      %c0_36 = arith.constant 0 : index
      %53 = vector.load %arg5[%c1, %c0_35, %c0_36] : memref<4x32x32xf32, #tpu.memory_space<vmem>>, vector<1x32x32xf32>
      %54 = vector.shape_cast %53 : vector<1x32x32xf32> to vector<32x32xf32>
      %cst_37 = arith.constant dense<0.000000e+00> : vector<16x32xf32>
      %55 = tpu.matmul %50, %54, %cst_37 {dimension_numbers = #tpu.dot_dimension_numbers<[1], [0], [0], [1], [0, 0, 1, 1], [], []>} : vector<16x32xf32>, vector<32x32xf32>, vector<16x32xf32> -> vector<16x32xf32>
      %c1_38 = arith.constant 1 : index
      %c0_39 = arith.constant 0 : index
      %56 = vector.load %arg6[%c1_38, %c0_39] : memref<4x32xf32, #tpu.memory_space<vmem>>, vector<1x32xf32>
      %57 = vector.broadcast %56 : vector<1x32xf32> to vector<16x32xf32>
      %58 = arith.addf %55, %57 : vector<16x32xf32>
      %c2 = arith.constant 2 : index
      %c0_40 = arith.constant 0 : index
      %c0_41 = arith.constant 0 : index
      %59 = vector.load %arg5[%c2, %c0_40, %c0_41] : memref<4x32x32xf32, #tpu.memory_space<vmem>>, vector<1x32x32xf32>
      %60 = vector.shape_cast %59 : vector<1x32x32xf32> to vector<32x32xf32>
      %cst_42 = arith.constant dense<0.000000e+00> : vector<16x32xf32>
      %61 = tpu.matmul %52, %60, %cst_42 {dimension_numbers = #tpu.dot_dimension_numbers<[1], [0], [0], [1], [0, 0, 1, 1], [], []>} : vector<16x32xf32>, vector<32x32xf32>, vector<16x32xf32> -> vector<16x32xf32>
      %c2_43 = arith.constant 2 : index
      %c0_44 = arith.constant 0 : index
      %62 = vector.load %arg6[%c2_43, %c0_44] : memref<4x32xf32, #tpu.memory_space<vmem>>, vector<1x32xf32>
      %63 = vector.broadcast %62 : vector<1x32xf32> to vector<16x32xf32>
      %64 = arith.addf %61, %63 : vector<16x32xf32>
      %65 = vector.shape_cast %58 : vector<16x32xf32> to vector<16x4x8xf32>
      %66 = tpu.transpose %65, [1, 0, 2] : vector<16x4x8xf32> -> vector<4x16x8xf32>
      %c0_45 = arith.constant 0 : index
      %c0_46 = arith.constant 0 : index
      %c0_47 = arith.constant 0 : index
      %67 = vector.load %arg8[%c0_45, %c0_46, %c0_47] : memref<4x16x8xf32, #tpu.memory_space<vmem>>, vector<4x16x8xf32>
      tpu.vector_store %arg8[%c0_45, %c0_46, %c0_47], %66 {strides = array<i32>} : memref<4x16x8xf32, #tpu.memory_space<vmem>>, vector<4x16x8xf32>,
      %68 = vector.shape_cast %64 : vector<16x32xf32> to vector<16x4x8xf32>
      %69 = tpu.transpose %68, [1, 0, 2] : vector<16x4x8xf32> -> vector<4x16x8xf32>
      %c0_48 = arith.constant 0 : index
      %c0_49 = arith.constant 0 : index
      %c0_50 = arith.constant 0 : index
      %70 = vector.load %arg9[%c0_48, %c0_49, %c0_50] : memref<4x16x8xf32, #tpu.memory_space<vmem>>, vector<4x16x8xf32>
      tpu.vector_store %arg9[%c0_48, %c0_49, %c0_50], %69 {strides = array<i32>} : memref<4x16x8xf32, #tpu.memory_space<vmem>>, vector<4x16x8xf32>,
    } else {
    }
    %c0 = arith.constant 0 : index
    %c0_1 = arith.constant 0 : index
    %c0_2 = arith.constant 0 : index
    %3 = vector.load %arg2[%c0, %c0_1, %c0_2] : memref<1x16x32xf32, #tpu.memory_space<vmem>>, vector<1x16x32xf32>
    %4 = vector.shape_cast %3 : vector<1x16x32xf32> to vector<16x32xf32>
    %c0_3 = arith.constant 0 : index
    %c0_4 = arith.constant 0 : index
    %c0_5 = arith.constant 0 : index
    %5 = vector.load %arg5[%c0_3, %c0_4, %c0_5] : memref<4x32x32xf32, #tpu.memory_space<vmem>>, vector<1x32x32xf32>
    %6 = vector.shape_cast %5 : vector<1x32x32xf32> to vector<32x32xf32>
    %cst = arith.constant dense<0.000000e+00> : vector<16x32xf32>
    %7 = tpu.matmul %4, %6, %cst {dimension_numbers = #tpu.dot_dimension_numbers<[1], [0], [0], [1], [0, 0, 1, 1], [], []>} : vector<16x32xf32>, vector<32x32xf32>, vector<16x32xf32> -> vector<16x32xf32>
    %c0_6 = arith.constant 0 : index
    %c0_7 = arith.constant 0 : index
    %8 = vector.load %arg6[%c0_6, %c0_7] : memref<4x32xf32, #tpu.memory_space<vmem>>, vector<1x32xf32>
    %9 = vector.broadcast %8 : vector<1x32xf32> to vector<16x32xf32>
    %10 = arith.addf %7, %9 : vector<16x32xf32>
    %11 = vector.shape_cast %10 : vector<16x32xf32> to vector<16x4x8xf32>
    %12 = tpu.transpose %11, [1, 0, 2] : vector<16x4x8xf32> -> vector<4x16x8xf32>
    %cst_8 = arith.constant 0xFF800000 : f32
    %13 = vector.broadcast %cst_8 : f32 to vector<4x16x1xf32>
    %cst_9 = arith.constant 0.000000e+00 : f32
    %14 = vector.broadcast %cst_9 : f32 to vector<4x16x1xf32>
    %cst_10 = arith.constant 0.000000e+00 : f32
    %15 = vector.broadcast %cst_10 : f32 to vector<4x16x8xf32>
    %c0_11 = arith.constant 0 : index
    %c0_12 = arith.constant 0 : index
    %c0_13 = arith.constant 0 : index
    %16 = vector.load %arg8[%c0_11, %c0_12, %c0_13] : memref<4x16x8xf32, #tpu.memory_space<vmem>>, vector<4x16x8xf32>
    %c0_14 = arith.constant 0 : index
    %c0_15 = arith.constant 0 : index
    %c0_16 = arith.constant 0 : index
    %17 = vector.load %arg9[%c0_14, %c0_15, %c0_16] : memref<4x16x8xf32, #tpu.memory_space<vmem>>, vector<4x16x8xf32>
    "tpu.trace_start"() <{level = 10 : i32, message = "hqd,hkd->hqk"}> : () -> ()
    %cst_17 = arith.constant dense<0.000000e+00> : vector<4x16x16xf32>
    %18 = tpu.matmul %12, %16, %cst_17 {dimension_numbers = #tpu.dot_dimension_numbers<[2], [2], [1], [1], [0, 0, 0, 1, 1, 1], [0], [0]>} : vector<4x16x8xf32>, vector<4x16x8xf32>, vector<4x16x16xf32> -> vector<4x16x16xf32>
    "tpu.trace_stop"() : () -> ()
    %cst_18 = arith.constant dense<0xFF800000> : vector<4x16xf32>
    %19 = vector.multi_reduction <maximumf>, %18, %cst_18 [2] : vector<4x16x16xf32> to vector<4x16xf32>
    %20 = vector.shape_cast %19 : vector<4x16xf32> to vector<4x16x1xf32>
    %21 = arith.maximumf %13, %20 : vector<4x16x1xf32>
    %22 = arith.subf %13, %21 : vector<4x16x1xf32>
    %23 = math.exp %22 : vector<4x16x1xf32>
    %24 = vector.broadcast %21 : vector<4x16x1xf32> to vector<4x16x16xf32>
    %25 = arith.subf %18, %24 : vector<4x16x16xf32>
    %26 = math.exp %25 : vector<4x16x16xf32>
    %27 = arith.mulf %23, %14 : vector<4x16x1xf32>
    %cst_19 = arith.constant dense<0.000000e+00> : vector<4x16xf32>
    %28 = vector.multi_reduction <add>, %26, %cst_19 [2] : vector<4x16x16xf32> to vector<4x16xf32>
    %29 = vector.shape_cast %28 : vector<4x16xf32> to vector<4x16x1xf32>
    %30 = arith.addf %27, %29 : vector<4x16x1xf32>
    %31 = vector.broadcast %23 : vector<4x16x1xf32> to vector<4x16x8xf32>
    %32 = arith.mulf %31, %15 : vector<4x16x8xf32>
    "tpu.trace_start"() <{level = 10 : i32, message = "hqk,hkd->hqd"}> : () -> ()
    %cst_20 = arith.constant dense<0.000000e+00> : vector<4x16x8xf32>
    %33 = tpu.matmul %26, %17, %cst_20 {dimension_numbers = #tpu.dot_dimension_numbers<[2], [1], [1], [2], [0, 0, 0, 1, 1, 2], [0], [0]>} : vector<4x16x16xf32>, vector<4x16x8xf32>, vector<4x16x8xf32> -> vector<4x16x8xf32>
    "tpu.trace_stop"() : () -> ()
    %34 = arith.addf %32, %33 : vector<4x16x8xf32>
    %35 = tpu.reciprocal %30 : vector<4x16x1xf32> -> vector<4x16x1xf32>
    %36 = vector.broadcast %35 : vector<4x16x1xf32> to vector<4x16x8xf32>
    %37 = arith.mulf %34, %36 : vector<4x16x8xf32>
    %38 = tpu.transpose %37, [1, 0, 2] : vector<4x16x8xf32> -> vector<16x4x8xf32>
    %39 = vector.shape_cast %38 : vector<16x4x8xf32> to vector<16x32xf32>
    %c3 = arith.constant 3 : index
    %c0_21 = arith.constant 0 : index
    %c0_22 = arith.constant 0 : index
    %40 = vector.load %arg5[%c3, %c0_21, %c0_22] : memref<4x32x32xf32, #tpu.memory_space<vmem>>, vector<1x32x32xf32>
    %41 = vector.shape_cast %40 : vector<1x32x32xf32> to vector<32x32xf32>
    %cst_23 = arith.constant dense<0.000000e+00> : vector<16x32xf32>
    %42 = tpu.matmul %39, %41, %cst_23 {dimension_numbers = #tpu.dot_dimension_numbers<[1], [0], [0], [1], [0, 0, 1, 1], [], []>} : vector<16x32xf32>, vector<32x32xf32>, vector<16x32xf32> -> vector<16x32xf32>
    %c3_24 = arith.constant 3 : index
    %c0_25 = arith.constant 0 : index
    %43 = vector.load %arg6[%c3_24, %c0_25] : memref<4x32xf32, #tpu.memory_space<vmem>>, vector<1x32xf32>
    %44 = vector.broadcast %43 : vector<1x32xf32> to vector<16x32xf32>
    %45 = arith.addf %42, %44 : vector<16x32xf32>
    %c0_26 = arith.constant 0 : index
    %c0_27 = arith.constant 0 : index
    %c0_28 = arith.constant 0 : index
    %46 = vector.load %arg7[%c0_26, %c0_27, %c0_28] : memref<1x16x32xf32, #tpu.memory_space<vmem>>, vector<1x16x32xf32>
    %47 = vector.shape_cast %46 : vector<1x16x32xf32> to vector<16x32xf32>
    %48 = vector.shape_cast %45 : vector<16x32xf32> to vector<1x16x32xf32>
    tpu.vector_store %arg7[%c0_26, %c0_27, %c0_28], %48 {strides = array<i32>} : memref<1x16x32xf32, #tpu.memory_space<vmem>>, vector<1x16x32xf32>,
    return
  }
  func.func @transform_0(%arg0: i32, %arg1: i32) -> (i32, i32, i32) {
    %c0_i32 = arith.constant 0 : i32
    %c0_i32_0 = arith.constant 0 : i32
    return %arg0, %arg1, %c0_i32 : i32, i32, i32
  }
  func.func @transform_1(%arg0: i32, %arg1: i32) -> (i32, i32, i32) {
    %c0_i32 = arith.constant 0 : i32
    %c0_i32_0 = arith.constant 0 : i32
    %c0_i32_1 = arith.constant 0 : i32
    return %arg0, %c0_i32, %c0_i32_0 : i32, i32, i32
  }
  func.func @transform_2(%arg0: i32, %arg1: i32) -> (i32, i32, i32) {
    %c0_i32 = arith.constant 0 : i32
    %c0_i32_0 = arith.constant 0 : i32
    %c0_i32_1 = arith.constant 0 : i32
    return %arg0, %c0_i32, %c0_i32_0 : i32, i32, i32
  }
  func.func @transform_3(%arg0: i32, %arg1: i32) -> (i32, i32, i32) {
    %c0_i32 = arith.constant 0 : i32
    %c0_i32_0 = arith.constant 0 : i32
    %c0_i32_1 = arith.constant 0 : i32
    %c0_i32_2 = arith.constant 0 : i32
    return %c0_i32, %c0_i32_0, %c0_i32_1 : i32, i32, i32
  }
  func.func @transform_4(%arg0: i32, %arg1: i32) -> (i32, i32) {
    %c0_i32 = arith.constant 0 : i32
    %c0_i32_0 = arith.constant 0 : i32
    %c0_i32_1 = arith.constant 0 : i32
    return %c0_i32, %c0_i32_0 : i32, i32
  }
  func.func @transform_5(%arg0: i32, %arg1: i32) -> (i32, i32, i32) {
    %c0_i32 = arith.constant 0 : i32
    %c0_i32_0 = arith.constant 0 : i32
    return %arg0, %arg1, %c0_i32 : i32, i32, i32
  }
}

module attributes {stable_mosaic.version = 11 : i64} {
  func.func @kernel(%arg0: i32, %arg1: i32, %arg2: memref<1x16x32xf32, #tpu.memory_space<vmem>>, %arg3: memref<1x16x32xf32, #tpu.memory_space<vmem>>, %arg4: memref<1x16x32xf32, #tpu.memory_space<vmem>>, %arg5: memref<4x32x32xf32, #tpu.memory_space<vmem>>, %arg6: memref<4x32xf32, #tpu.memory_space<vmem>>, %arg7: memref<1x16x32xf32, #tpu.memory_space<vmem>>, %arg8: memref<4x16x8xf32, #tpu.memory_space<vmem>>, %arg9: memref<4x16x8xf32, #tpu.memory_space<vmem>>) attributes {dimension_semantics = [#tpu.dimension_semantics<parallel>, #tpu.dimension_semantics<arbitrary>], iteration_bounds = array<i64: 2, 1>, scalar_prefetch = 0 : i64, scratch_operands = 2 : i64, tpu.core_type = #tpu.core_type<tc>, window_params = [{transform_indices = @transform_0, window_bounds = array<i64: 1, 16, 32>}, {transform_indices = @transform_1, window_bounds = array<i64: 1, 16, 32>}, {transform_indices = @transform_2, window_bounds = array<i64: 1, 16, 32>}, {pipeline_mode = #tpu.pipeline_mode<synchronous>, transform_indices = @transform_3, window_bounds = array<i64: 4, 32, 32>}, {pipeline_mode = #tpu.pipeline_mode<synchronous>, transform_indices = @transform_4, window_bounds = array<i64: 4, 32>}, {transform_indices = @transform_5, window_bounds = array<i64: 1, 16, 32>}]} {
    %c0_i32 = arith.constant 0 : i32
    %0 = arith.cmpi eq, %arg1, %c0_i32 : i32
    %1 = arith.extui %0 : i1 to i32
    %c0_i32_0 = arith.constant 0 : i32
    %2 = arith.cmpi ne, %1, %c0_i32_0 : i32
    scf.if %2 {
      %c0_29 = arith.constant 0 : index
      %c0_30 = arith.constant 0 : index
      %c0_31 = arith.constant 0 : index
      %49 = vector.load %arg3[%c0_29, %c0_30, %c0_31] : memref<1x16x32xf32, #tpu.memory_space<vmem>>, vector<1x16x32xf32>
      %50 = vector.shape_cast %49 : vector<1x16x32xf32> to vector<16x32xf32>
      %c0_32 = arith.constant 0 : index
      %c0_33 = arith.constant 0 : index
      %c0_34 = arith.constant 0 : index
      %51 = vector.load %arg4[%c0_32, %c0_33, %c0_34] : memref<1x16x32xf32, #tpu.memory_space<vmem>>, vector<1x16x32xf32>
      %52 = vector.shape_cast %51 : vector<1x16x32xf32> to vector<16x32xf32>
      %c1 = arith.constant 1 : index
      %c0_35 = arith.constant 0 : index
      %c0_36 = arith.constant 0 : index
      %53 = vector.load %arg5[%c1, %c0_35, %c0_36] : memref<4x32x32xf32, #tpu.memory_space<vmem>>, vector<1x32x32xf32>
      %54 = vector.shape_cast %53 : vector<1x32x32xf32> to vector<32x32xf32>
      %cst_37 = arith.constant dense<0.000000e+00> : vector<16x32xf32>
      %55 = tpu.matmul %50, %54, %cst_37 {dimension_numbers = #tpu.dot_dimension_numbers<[1], [0], [0], [1], [0, 0, 1, 1], [], []>} : vector<16x32xf32>, vector<32x32xf32>, vector<16x32xf32> -> vector<16x32xf32>
      %c1_38 = arith.constant 1 : index
      %c0_39 = arith.constant 0 : index
      %56 = vector.load %arg6[%c1_38, %c0_39] : memref<4x32xf32, #tpu.memory_space<vmem>>, vector<1x32xf32>
      %57 = vector.broadcast %56 : vector<1x32xf32> to vector<16x32xf32>
      %58 = arith.addf %55, %57 : vector<16x32xf32>
      %c2 = arith.constant 2 : index
      %c0_40 = arith.constant 0 : index
      %c0_41 = arith.constant 0 : index
      %59 = vector.load %arg5[%c2, %c0_40, %c0_41] : memref<4x32x32xf32, #tpu.memory_space<vmem>>, vector<1x32x32xf32>
      %60 = vector.shape_cast %59 : vector<1x32x32xf32> to vector<32x32xf32>
      %cst_42 = arith.constant dense<0.000000e+00> : vector<16x32xf32>
      %61 = tpu.matmul %52, %60, %cst_42 {dimension_numbers = #tpu.dot_dimension_numbers<[1], [0], [0], [1], [0, 0, 1, 1], [], []>} : vector<16x32xf32>, vector<32x32xf32>, vector<16x32xf32> -> vector<16x32xf32>
      %c2_43 = arith.constant 2 : index
      %c0_44 = arith.constant 0 : index
      %62 = vector.load %arg6[%c2_43, %c0_44] : memref<4x32xf32, #tpu.memory_space<vmem>>, vector<1x32xf32>
      %63 = vector.broadcast %62 : vector<1x32xf32> to vector<16x32xf32>
      %64 = arith.addf %61, %63 : vector<16x32xf32>
      %65 = vector.shape_cast %58 : vector<16x32xf32> to vector<16x4x8xf32>
      %66 = tpu.transpose %65, [1, 0, 2] : vector<16x4x8xf32> -> vector<4x16x8xf32>
      %c0_45 = arith.constant 0 : index
      %c0_46 = arith.constant 0 : index
      %c0_47 = arith.constant 0 : index
      %67 = vector.load %arg8[%c0_45, %c0_46, %c0_47] : memref<4x16x8xf32, #tpu.memory_space<vmem>>, vector<4x16x8xf32>
      tpu.vector_store %arg8[%c0_45, %c0_46, %c0_47], %66 {strides = array<i32>} : memref<4x16x8xf32, #tpu.memory_space<vmem>>, vector<4x16x8xf32>,
      %68 = vector.shape_cast %64 : vector<16x32xf32> to vector<16x4x8xf32>
      %69 = tpu.transpose %68, [1, 0, 2] : vector<16x4x8xf32> -> vector<4x16x8xf32>
      %c0_48 = arith.constant 0 : index
      %c0_49 = arith.constant 0 : index
      %c0_50 = arith.constant 0 : index
      %70 = vector.load %arg9[%c0_48, %c0_49, %c0_50] : memref<4x16x8xf32, #tpu.memory_space<vmem>>, vector<4x16x8xf32>
      tpu.vector_store %arg9[%c0_48, %c0_49, %c0_50], %69 {strides = array<i32>} : memref<4x16x8xf32, #tpu.memory_space<vmem>>, vector<4x16x8xf32>,
    } else {
    }
    %c0 = arith.constant 0 : index
    %c0_1 = arith.constant 0 : index
    %c0_2 = arith.constant 0 : index
    %3 = vector.load %arg2[%c0, %c0_1, %c0_2] : memref<1x16x32xf32, #tpu.memory_space<vmem>>, vector<1x16x32xf32>
    %4 = vector.shape_cast %3 : vector<1x16x32xf32> to vector<16x32xf32>
    %c0_3 = arith.constant 0 : index
    %c0_4 = arith.constant 0 : index
    %c0_5 = arith.constant 0 : index
    %5 = vector.load %arg5[%c0_3, %c0_4, %c0_5] : memref<4x32x32xf32, #tpu.memory_space<vmem>>, vector<1x32x32xf32>
    %6 = vector.shape_cast %5 : vector<1x32x32xf32> to vector<32x32xf32>
    %cst = arith.constant dense<0.000000e+00> : vector<16x32xf32>
    %7 = tpu.matmul %4, %6, %cst {dimension_numbers = #tpu.dot_dimension_numbers<[1], [0], [0], [1], [0, 0, 1, 1], [], []>} : vector<16x32xf32>, vector<32x32xf32>, vector<16x32xf32> -> vector<16x32xf32>
    %c0_6 = arith.constant 0 : index
    %c0_7 = arith.constant 0 : index
    %8 = vector.load %arg6[%c0_6, %c0_7] : memref<4x32xf32, #tpu.memory_space<vmem>>, vector<1x32xf32>
    %9 = vector.broadcast %8 : vector<1x32xf32> to vector<16x32xf32>
    %10 = arith.addf %7, %9 : vector<16x32xf32>
    %11 = vector.shape_cast %10 : vector<16x32xf32> to vector<16x4x8xf32>
    %12 = tpu.transpose %11, [1, 0, 2] : vector<16x4x8xf32> -> vector<4x16x8xf32>
    %cst_8 = arith.constant 0xFF800000 : f32
    %13 = vector.broadcast %cst_8 : f32 to vector<4x16x1xf32>
    %cst_9 = arith.constant 0.000000e+00 : f32
    %14 = vector.broadcast %cst_9 : f32 to vector<4x16x1xf32>
    %cst_10 = arith.constant 0.000000e+00 : f32
    %15 = vector.broadcast %cst_10 : f32 to vector<4x16x8xf32>
    %c0_11 = arith.constant 0 : index
    %c0_12 = arith.constant 0 : index
    %c0_13 = arith.constant 0 : index
    %16 = vector.load %arg8[%c0_11, %c0_12, %c0_13] : memref<4x16x8xf32, #tpu.memory_space<vmem>>, vector<4x16x8xf32>
    %c0_14 = arith.constant 0 : index
    %c0_15 = arith.constant 0 : index
    %c0_16 = arith.constant 0 : index
    %17 = vector.load %arg9[%c0_14, %c0_15, %c0_16] : memref<4x16x8xf32, #tpu.memory_space<vmem>>, vector<4x16x8xf32>
    "tpu.trace_start"() <{level = 10 : i32, message = "hqd,hkd->hqk"}> : () -> ()
    %cst_17 = arith.constant dense<0.000000e+00> : vector<4x16x16xf32>
    %18 = tpu.matmul %12, %16, %cst_17 {dimension_numbers = #tpu.dot_dimension_numbers<[2], [2], [1], [1], [0, 0, 0, 1, 1, 1], [0], [0]>} : vector<4x16x8xf32>, vector<4x16x8xf32>, vector<4x16x16xf32> -> vector<4x16x16xf32>
    "tpu.trace_stop"() : () -> ()
    %cst_18 = arith.constant dense<0xFF800000> : vector<4x16xf32>
    %19 = vector.multi_reduction <maximumf>, %18, %cst_18 [2] : vector<4x16x16xf32> to vector<4x16xf32>
    %20 = vector.shape_cast %19 : vector<4x16xf32> to vector<4x16x1xf32>
    %21 = arith.maximumf %13, %20 : vector<4x16x1xf32>
    %22 = arith.subf %13, %21 : vector<4x16x1xf32>
    %23 = math.exp %22 : vector<4x16x1xf32>
    %24 = vector.broadcast %21 : vector<4x16x1xf32> to vector<4x16x16xf32>
    %25 = arith.subf %18, %24 : vector<4x16x16xf32>
    %26 = math.exp %25 : vector<4x16x16xf32>
    %27 = arith.mulf %23, %14 : vector<4x16x1xf32>
    %cst_19 = arith.constant dense<0.000000e+00> : vector<4x16xf32>
    %28 = vector.multi_reduction <add>, %26, %cst_19 [2] : vector<4x16x16xf32> to vector<4x16xf32>
    %29 = vector.shape_cast %28 : vector<4x16xf32> to vector<4x16x1xf32>
    %30 = arith.addf %27, %29 : vector<4x16x1xf32>
    %31 = vector.broadcast %23 : vector<4x16x1xf32> to vector<4x16x8xf32>
    %32 = arith.mulf %31, %15 : vector<4x16x8xf32>
    "tpu.trace_start"() <{level = 10 : i32, message = "hqk,hkd->hqd"}> : () -> ()
    %cst_20 = arith.constant dense<0.000000e+00> : vector<4x16x8xf32>
    %33 = tpu.matmul %26, %17, %cst_20 {dimension_numbers = #tpu.dot_dimension_numbers<[2], [1], [1], [2], [0, 0, 0, 1, 1, 2], [0], [0]>} : vector<4x16x16xf32>, vector<4x16x8xf32>, vector<4x16x8xf32> -> vector<4x16x8xf32>
    "tpu.trace_stop"() : () -> ()
    %34 = arith.addf %32, %33 : vector<4x16x8xf32>
    %35 = tpu.reciprocal %30 : vector<4x16x1xf32> -> vector<4x16x1xf32>
    %36 = vector.broadcast %35 : vector<4x16x1xf32> to vector<4x16x8xf32>
    %37 = arith.mulf %34, %36 : vector<4x16x8xf32>
    %38 = tpu.transpose %37, [1, 0, 2] : vector<4x16x8xf32> -> vector<16x4x8xf32>
    %39 = vector.shape_cast %38 : vector<16x4x8xf32> to vector<16x32xf32>
    %c3 = arith.constant 3 : index
    %c0_21 = arith.constant 0 : index
    %c0_22 = arith.constant 0 : index
    %40 = vector.load %arg5[%c3, %c0_21, %c0_22] : memref<4x32x32xf32, #tpu.memory_space<vmem>>, vector<1x32x32xf32>
    %41 = vector.shape_cast %40 : vector<1x32x32xf32> to vector<32x32xf32>
    %cst_23 = arith.constant dense<0.000000e+00> : vector<16x32xf32>
    %42 = tpu.matmul %39, %41, %cst_23 {dimension_numbers = #tpu.dot_dimension_numbers<[1], [0], [0], [1], [0, 0, 1, 1], [], []>} : vector<16x32xf32>, vector<32x32xf32>, vector<16x32xf32> -> vector<16x32xf32>
    %c3_24 = arith.constant 3 : index
    %c0_25 = arith.constant 0 : index
    %43 = vector.load %arg6[%c3_24, %c0_25] : memref<4x32xf32, #tpu.memory_space<vmem>>, vector<1x32xf32>
    %44 = vector.broadcast %43 : vector<1x32xf32> to vector<16x32xf32>
    %45 = arith.addf %42, %44 : vector<16x32xf32>
    %c0_26 = arith.constant 0 : index
    %c0_27 = arith.constant 0 : index
    %c0_28 = arith.constant 0 : index
    %46 = vector.load %arg7[%c0_26, %c0_27, %c0_28] : memref<1x16x32xf32, #tpu.memory_space<vmem>>, vector<1x16x32xf32>
    %47 = vector.shape_cast %46 : vector<1x16x32xf32> to vector<16x32xf32>
    %48 = vector.shape_cast %45 : vector<16x32xf32> to vector<1x16x32xf32>
    tpu.vector_store %arg7[%c0_26, %c0_27, %c0_28], %48 {strides = array<i32>} : memref<1x16x32xf32, #tpu.memory_space<vmem>>, vector<1x16x32xf32>,
    return
  }
  func.func @transform_0(%arg0: i32, %arg1: i32) -> (i32, i32, i32) {
    %c0_i32 = arith.constant 0 : i32
    %c0_i32_0 = arith.constant 0 : i32
    return %arg0, %arg1, %c0_i32 : i32, i32, i32
  }
  func.func @transform_1(%arg0: i32, %arg1: i32) -> (i32, i32, i32) {
    %c0_i32 = arith.constant 0 : i32
    %c0_i32_0 = arith.constant 0 : i32
    %c0_i32_1 = arith.constant 0 : i32
    return %arg0, %c0_i32, %c0_i32_0 : i32, i32, i32
  }
  func.func @transform_2(%arg0: i32, %arg1: i32) -> (i32, i32, i32) {
    %c0_i32 = arith.constant 0 : i32
    %c0_i32_0 = arith.constant 0 : i32
    %c0_i32_1 = arith.constant 0 : i32
    return %arg0, %c0_i32, %c0_i32_0 : i32, i32, i32
  }
  func.func @transform_3(%arg0: i32, %arg1: i32) -> (i32, i32, i32) {
    %c0_i32 = arith.constant 0 : i32
    %c0_i32_0 = arith.constant 0 : i32
    %c0_i32_1 = arith.constant 0 : i32
    %c0_i32_2 = arith.constant 0 : i32
    return %c0_i32, %c0_i32_0, %c0_i32_1 : i32, i32, i32
  }
  func.func @transform_4(%arg0: i32, %arg1: i32) -> (i32, i32) {
    %c0_i32 = arith.constant 0 : i32
    %c0_i32_0 = arith.constant 0 : i32
    %c0_i32_1 = arith.constant 0 : i32
    return %c0_i32, %c0_i32_0 : i32, i32
  }
  func.func @transform_5(%arg0: i32, %arg1: i32) -> (i32, i32, i32) {
    %c0_i32 = arith.constant 0 : i32
    %c0_i32_0 = arith.constant 0 : i32
    return %arg0, %arg1, %c0_i32 : i32, i32, i32
  }
}

</mosaic_0001>

<bundles_post_ra>
// kernel: tpu_custom_call.1
= control target key start
LH: loop header
LB: loop body
LE: loop exit
PB: predicated region body
PF: predicated region fallthrough
CT: control target
= control target key end

     0   :  { %s3542_s0 = inlined_call_operand.hbm [shape: f32[2,16,32], index: 0, kind: input, shape index: {}]   ;;  %s3543_s1 = inlined_call_operand.hbm [shape: f32[2,16,32], index: 1, kind: input, shape index: {}]   ;;  %s3544_s2 = inlined_call_operand.hbm [shape: f32[2,16,32], index: 2, kind: input, shape index: {}]   ;;  %s3545_s3 = inlined_call_operand.hbm [shape: f32[4,32,32], index: 3, kind: input, shape index: {}]   ;;  %s3546_s4 = inlined_call_operand.hbm [shape: f32[4,32], index: 4, kind: input, shape index: {}]   ;;  %s3547_s5 = inlined_call_operand.hbm [shape: f32[2,16,32], index: 5, kind: output, shape index: {}]  }
   0x1   :  { %3559 = sst [smem:[#allocation25_spill]] %s3543_s1 }
   0x2   :  { %3560 = sst [smem:[#allocation26_spill]] %s3545_s3 }
   0x3   :  { %10 = vsyncpa [#allocation5], 0 }
   0x4   :  { %12 = vsyncpa [#allocation5 + $0x1], 0 }
   0x5   :  { %13 = vsyncpa [#allocation8], 0 }
   0x6   :  { %15 = vsyncpa [#allocation8 + $0x1], 0 }
   0x7   :  { %16 = vsyncpa [#allocation11], 0 }
   0x8   :  { %17 = vsyncpa [#allocation6], 0 }
   0x9   :  { %19 = vsyncpa [#allocation6 + $0x1], 0  ;;  %s2709_s18 = smov 0   ;;  %s2711_s19 = smov 0  }
   0xa   :  { %s2713_s20 = smov 0   ;;  %s2715_s21 = smov 0  }
   0xb   :  { %s2717_s22 = smov 0   ;;  %s2719_s23 = smov 0  }
   0xc LB: > { %3561 = sst [smem:[#allocation18_spill]] %s2644_s18  ;;  %s2740_s24 = sadd.s32 4294967295, %s2664_s23   ;;  %s2664_s23 = sphi %s2719_s23, %s25_s23   ;;  %s2660_s22 = sphi %s2717_s22, %s3596_s22   ;;  %s2656_s21 = sphi %s2715_s21, %s3595_s21   ;;  %s2652_s20 = sphi %s2713_s20, %s3594_s20   ;;  %s2648_s19 = sphi %s2711_s19, %s3598_s19   ;;  %s2644_s18 = sphi %s2709_s18, %s3597_s18  }
   0xd   : > { %3562 = sst [smem:[#allocation19_spill]] %s2652_s20  ;;  %s2206_s25 = sadd.s32 4294967294, %s2664_s23  }
   0xe   : > { %3563 = sst [smem:[#allocation20_spill]] %s2660_s22  ;;  %p59_p0 = scmp.ne.s32.totalorder %s2648_s19, %s2644_s18 }
   0xf   : > { %3564 = sst [smem:[#allocation21_spill]] %s2664_s23  ;;  %p60_p1 = scmp.eq.s32.totalorder %s2740_s24, 0 }
  0x10   : > { %p179_p2 = scmp.eq.s32.totalorder %s2740_s24, 1  ;;  %p185_p3 = scmp.eq.s32.totalorder %s2206_s25, 1 }
  0x11   : > { %p2749_p4 = por %p60_p1, %p59_p0  ;;  %p2207_p5 = scmp.ge.s32.totalorder %s2664_s23, 1 }
  0x12   : > { %p2754_p6 = por %p185_p3, %p59_p0  ;;  %p192_p7 = scmp.lt.s32.totalorder %s2664_s23, 3 }
  0x13   : > { %s3568_s3 = sld [smem:[#allocation26_spill]]  ;;  %s2666_s7 = smov [#allocation10]  }
  0x14   : > { %s3566_s27 = scalar_select %p2754_p6, 1, 0 }
  0x15   : > { %p2762_p8 = pnand %p2207_p5, %p192_p7  ;;  %s205_s8 = sshll.u32 %s2666_s7, 4  ;;  %s206_s8 = int_to_ptr.vmem [resolvable:$true] %s205_s8 }
  0x16   : > { %3567 = sst [smem:[#allocation22_spill]] %s3566_s27  ;;  %p2210_p11 = scmp.ge.s32.totalorder %s2664_s23, 2 }
  0x17   : > { %p2284_p9 = pneg %p2762_p8  ;;  %s3548_s10 = smov 128  }
  0x18   : > { %s3550_s11 = smov 8   ;;  %s37_s12 = sadd.s32 1, %s2660_s22 }
  0x19   : > { %s203_s30 = sshll.u32 %s3568_s3, 4  ;;  %p2770_p10 = pnand %p2284_p9, %p60_p1  ;;  %s204_s30 = int_to_ptr.hbm [resolvable:$true] %s203_s30 }
  0x1a   : > { %p39_p12 = scmp.ge.s32.totalorder %s37_s12, 2  ;;  %s46_s13 = sadd.s32 1, %s2652_s20 }
  0x1b   : > { %2287 = dma.hbm_to_vmem [thread:$0]  (!%p2770_p10), %s204_s30, 2048, %s206_s8, [#allocation11], %s3548_s10, %s3548_s10, %s3550_s11  }
  0x1c   : > { %p53_p13 = scmp.ne.s32.totalorder %s2652_s20, %s2648_s19  ;;  %p54_p0 = scmp.eq.s32.totalorder %s2664_s23, 0 }
  0x1d   : > { %s3600_s12 = smov (%p39_p12, %s37_s12), 0  ;;  %p2307_p7 = scmp.lt.s32.totalorder %s2664_s23, 2 }
  0x1e   : > { %3571 = sst [smem:[#allocation23_spill]] %s3600_s12  ;;  %p55_p3 = por %p54_p0, %p53_p13 }
  0x1f   : > { %p2789_p5 = por %p179_p2, %p53_p13  ;;  %s41_s15 = ssub.s32 %s2660_s22, %s3600_s12 }
  0x20   : > { %p44_p9 = scmp.eq.s32.totalorder %s41_s15, 0  ;;  %s231_s16 = sand.u32 1, %s2652_s20  }
  0x21   : > { %s2797_s17 = sshll.u32 %s231_s16, 4  ;;  %s2800_s25 = sshll.u32 %s2660_s22, 4 }
  0x22   : > { %s2803_s28 = scalar_select %p44_p9, %s2652_s20, %s46_s13  }
  0x23   : > { %p2805_p12 = pnand %p2307_p7, %p55_p3  ;;  %s255_s30 = sand.u32 1, %s2664_s23  }
  0x24   : > { %3573 = sst [smem:[#allocation24_spill]] %s2803_s28  ;;  %s259_s11 = scalar_lea.vmem [#allocation7], %s2797_s17 }
  0x25   : > { %s3575_s1 = sld [smem:[#allocation25_spill]]  ;;  %s267_s3 = sshll.u32 %s259_s11, 4  ;;  %s268_s3 = int_to_ptr.vmem [resolvable:$true] %s267_s3 }
  0x26   : > { %s256_s13 = scalar_lea.sflag [#allocation8], %s255_s30  ;;  %s3576_s12 = smov 8  }
  0x27   : > { %s3577_s22 = smov 128   ;;  %s218_s23 = sshll.u32 %s3546_s4, 4  ;;  %s219_s23 = int_to_ptr.hbm [resolvable:$true] %s218_s23 }
  0x28   : > { %s2669_s7 = smov [#allocation12]   ;;  %s235_s27 = scalar_lea.vmem [#allocation4], %s2797_s17 }
  0x29   : > { %s220_s8 = sshll.u32 %s2669_s7, 4  ;;  %s245_s18 = sshll.u32 %s235_s27, 4  ;;  %s221_s8 = int_to_ptr.vmem [resolvable:$true] %s220_s8  ;;  %s246_s18 = int_to_ptr.vmem [resolvable:$true] %s245_s18 }
  0x2a   : > { %2290 = dma.hbm_to_vmem [thread:$0]  (!%p2770_p10), %s219_s23, 64, %s221_s8, [#allocation11]  }
  0x2b   : > { %s264_s15 = scalar_lea.hbm %s3575_s1, %s2800_s25  ;;  %s286_s9 = scalar_lea.hbm %s3544_s2, %s2800_s25 }
  0x2c   : > { %s265_s10 = sshll.u32 %s264_s15, 4  ;;  %s242_s15 = scalar_lea.hbm %s3542_s0, %s2800_s25  ;;  %s266_s10 = int_to_ptr.hbm [resolvable:$true] %s265_s10 }
  0x2d   : > { %2297 = dma.hbm_to_vmem [thread:$0]  (!%p2805_p12), %s266_s10, 256, %s268_s3, %s256_s13, %s3577_s22, %s3577_s22, %s3576_s12  }
  0x2e   : > { %s243_s1 = sshll.u32 %s242_s15, 4  ;;  %s232_s3 = scalar_lea.sflag [#allocation5], %s231_s16  ;;  %s244_s1 = int_to_ptr.hbm [resolvable:$true] %s243_s1 }
  0x2f   : > { %2294 = dma.hbm_to_vmem [thread:$0]  (!%p2805_p12), %s244_s1, 256, %s246_s18, %s232_s3, %s3577_s22, %s3577_s22, %s3576_s12  }
  0x30   : > { %s287_s23 = sshll.u32 %s286_s9, 4  ;;  %s281_s28 = scalar_lea.vmem [#allocation9], %s2797_s17  ;;  %s288_s23 = int_to_ptr.hbm [resolvable:$true] %s287_s23 }
  0x31   : > { %s289_s7 = sshll.u32 %s281_s28, 4  ;;  %301 = sbr.rel (%p2762_p8) target bundleno = 1091 (0x443), region = 40  ;;  %s290_s7 = int_to_ptr.vmem [resolvable:$true] %s289_s7 }
  0x32   : > { %2300 = dma.hbm_to_vmem [thread:$0]  (!%p2805_p12), %s288_s23, 256, %s290_s7, %s256_s13, %s3577_s22, %s3577_s22, %s3576_s12  }
  0x33   : > { %s2848_s1 = sand.u32 (!%p2762_p8), 1, %s2648_s19  }
  0x34   : > { %s2851_s18 = sshll.u32 (!%p2762_p8), %s2848_s1, 4  ;;  %s304_s27 = scalar_lea.sflag (!%p2762_p8), [#allocation5], %s2848_s1 }
  0x35   : > { %s307_s16 = scalar_lea.vmem (!%p2762_p8), [#allocation4], %s2851_s18 }
  0x36   : > { %2627 = dma.done.wait (%p2749_p4), %s304_s27, 256  }
  0x37   : > { %2629 = vsyncadd (%p2749_p4), %s304_s27, 4294967040  ;;  %s313_s22 = sand.u32 1, %s2740_s24   ;;  %s317_s12 = scalar_lea.vmem [#allocation7], %s2851_s18 }
  0x38   : > { %s314_s6 = scalar_lea.sflag [#allocation8], %s313_s22 }
  0x39   : > { %2631 = dma.done.wait (%p2749_p4), %s314_s6, 512  }
  0x3a   : > { %2633 = vsyncadd (%p2749_p4), %s314_s6, 4294966784  ;;  %s327_s17 = scalar_lea.vmem [#allocation9], %s2851_s18 }
  0x3b   : > { %2635 = dma.done.wait (%p60_p1), [#allocation11], 2112  }
  0x3c   : > { %2637 = vsyncadd (%p60_p1), [#allocation11], 4294965184  ;;  %v389_v0 = vld [vmem:[#allocation10 + $0x38] sm:$0xff]  ;;  %v388_v1 = vld [vmem:[#allocation10 + $0x30] sm:$0xff]  ;;  %vm392_vm0 = vcmask 261120   ;;  %s2670_s24 = smov 112  }
  0x3d   : > { %411 = vmatpush.msra.mxu0 %v389_v0  ;;  %v387_v2 = vld [vmem:[#allocation10 + $0x28] sm:$0xff]  ;;  %v961_v3 = vld [vmem:[#allocation10 + $0x18] sm:$0xff]  ;;  %v960_v4 = vld [vmem:[#allocation10 + $0x10] sm:$0xff]  ;;  %s2671_s26 = smov 104   ;;  %s2672_s25 = smov 120   ;;  %vm479_vm1 = vcmask 1047556  }
  0x3e   : > { %983 = vmatpush.msra.mxu2 %v961_v3  ;;  %v386_v5 = vld [vmem:[#allocation10 + $0x20] sm:$0xff]  ;;  %v959_v6 = vld [vmem:[#allocation10 + $0x8] sm:$0xff]  ;;  %v426_v7 = vld [vmem:[#allocation10 + $0x58] sm:$0xff]  ;;  %v2673_v35 = vmov 1983009808   ;;  %vm699_vm2 = vcmask 64512  }
  0x3f   : > { %412 = vmatpush.msra.mxu0 %v388_v1  ;;  %v381_v8 = vld [vmem:[%s317_s12] sm:$0xff]  ;;  %447 = vmatpush.msra.mxu1 %v426_v7  ;;  %v424_v12 = vld [vmem:[#allocation10 + $0x48] sm:$0xff]  ;;  %v484_v36 = vunpack.c.l.s4 %v2673_v35  ;;  %v2674_v50 = vmov 1934713408   ;;  %vm1392_vm3 = vcmask 130048   ;;  %s2675_s29 = smov 24  }
  0x40   : > { %984 = vmatpush.msra.mxu2 %v960_v4  ;;  %v958_v9 = vld [vmem:[#allocation10] sm:$0xff]  ;;  %v425_v10 = vld [vmem:[#allocation10 + $0x50] sm:$0xff]  ;;  %v382_v15 = vld [vmem:[%s317_s12 + $0x8] sm:$0xff]  ;;  %v508_v51 = vunpack.c.l.s4 %v2674_v50  ;;  %s2676_s13 = smov 16   ;;  %s2677_s8 = smov 8  }
  0x41   : > { %413 = vmatpush.msra.mxu0 %v387_v2  ;;  %v956_v11 = vld [vmem:[%s307_s16] sm:$0xff]  ;;  %448 = vmatpush.msra.mxu1 %v425_v10  ;;  %v957_v16 = vld [vmem:[%s307_s16 + $0x8] sm:$0xff]  ;;  %v2921_v40 = vunpack.c.0.s8 %v484_v36  ;;  %s374_s11 = scalar_lea.vmem [#allocation13], %s2851_s18  ;;  %s2267_s30 = sshll.u32 %s2656_s21, 4 }
  0x42   : > { %985 = vmatpush.msra.mxu2 %v959_v6  ;;  %v423_v13 = vld [vmem:[#allocation10 + $0x40] sm:$0xff]  ;;  %v384_v17 = vld [vmem:[%s327_s17 + $0x8] sm:$0xff]  ;;  %v2932_v58 = vunpack.c.0.s8 %v508_v51  ;;  %s2052_s20 = scalar_lea.hbm %s3547_s5, %s2267_s30  ;;  %s2053_s10 = sshll.u32 %s374_s11, 4  ;;  %s2054_s10 = int_to_ptr.vmem [resolvable:$true] %s2053_s10 }
  0x43   : > { %414 = vmatpush.msra.mxu0 %v386_v5  ;;  %449 = vmatpush.msra.mxu1 %v424_v12  ;;  %v383_v14 = vld [vmem:[%s327_s17] sm:$0xff]  ;;  %s2055_s9 = sshll.u32 %s2052_s20, 4  ;;  %s2039_s23 = scalar_lea.sflag [#allocation6], %s2848_s1  ;;  %s2056_s9 = int_to_ptr.hbm [resolvable:$true] %s2055_s9 }
  0x44   : > { %2227 = vmatmul.msk.f32.vlgmr.msra.gmra.mxu0 %vm392_vm0, %v381_v8  ;;  %986 = vmatpush.msra.mxu2 %v958_v9  ;;  %v2372_v18 = vld [vmem:[#allocation12 + $0x1] ss:$0 sm:$0xff]  ;;  %v2373_v24 = vld [vmem:[#allocation12] ss:$0 sm:$0xff]  ;;  %v2374_v28 = vld [vmem:[#allocation12 + $0x2] ss:$0 sm:$0xff] }
  0x45   : > { %2231 = vmatmul.msk.f32.vlgmr.msra.gmra.mxu2 %vm392_vm0, %v956_v11  ;;  %450 = vmatpush.msra.mxu1 %v423_v13  ;;  %s2588_s28 = sshra.s32 %s2056_s9, 4  ;;  %s2594_s27 = scalar_lea.hbm %s3547_s5, 32  ;;  %s2589_s28 = int_to_ptr.hbm [resolvable:$true] %s2588_s28 }
  0x46   : > { %2229 = vmatmul.msk.f32.vlgmr.msra.gmra.mxu1 %vm392_vm0, %v383_v14  ;;  %s2590_s7 = scalar_lea.hbm %s2589_s28, 16  ;;  %p2595_p8 = scmp.lt.s32.totalorder %s2589_s28, %s3547_s5 }
  0x47   : > { %p2591_p1 = scmp.ne.s32.totalorder %s2589_s28, %s2590_s7  ;;  %p2596_p10 = scmp.lt.s32.totalorder %s2594_s27, %s2590_s7 }
  0x49   : > { %p2592_p2 = pnand %p2591_p1, %p2789_p5  ;;  %p2597_p13 = por %p2596_p10, %p2595_p8 }
  0x4b   : > { %p2593_p4 = pneg %p2592_p2 }
  0x4c   : > { %2228 = vmatmul.msk.f32.gmra.mxu0 %vm392_vm0, %v382_v15 }
  0x4d   : > { %2232 = vmatmul.msk.f32.gmra.mxu2 %vm392_vm0, %v957_v16  ;;  %p2598_p0 = pnand %p2597_p13, %p2593_p4 }
  0x4e   : > { %2230 = vmatmul.msk.f32.gmra.mxu1 %vm392_vm0, %v384_v17 }
  0xc1   : > { %v416_v19 = vpop.f32.mrf.mxu0 }
  0xc2   : > { %v417_v20 = vadd.f32 %v2372_v18, %v416_v19 }
  0xc3   : > { %v452_v29 = vpop.f32.mrf.mxu1 }
  0xc4   : > { %466 = vrot.lane.b32.xlu2 %v417_v20, %s2670_s24  ;;  %v2907_v30 = vadd.f32 %v2374_v28, %v452_v29  ;;  %v481_v38 = vrot.slane %v417_v20, 4 }
  0xc8   : > { %v988_v23 = vpop.f32.mrf.mxu2 }
  0xc9   : > { %v419_v21 = vpop.f32.mrf.mxu0  ;;  %v2893_v25 = vadd.f32 %v2373_v24, %v988_v23 }
  0xca   : > { %v2889_v22 = vadd.f32 %v2372_v18, %v419_v21 }
  0xcb   : > { %v455_v31 = vpop.f32.mrf.mxu1  ;;  %v1017_v61 = vrot.slane %v2893_v25, 4 }
  0xcc   : > { %474 = vrot.lane.b32.xlu1 %v2889_v22, %s2671_s26  ;;  %462 = vrot.lane.b32.xlu0 %v2889_v22, %s2672_s25  ;;  %v2910_v32 = vadd.f32 %v2374_v28, %v455_v31  ;;  %v537_v56 = vrot.slane %v2889_v22, 4 }
  0xcd   : > { %472 = vrot.lane.b32.xlu2 %v417_v20, %s2671_s26 }
  0xd0   : > { %v991_v26 = vpop.f32.mrf.mxu2 }
  0xd1   : > { %v2898_v27 = vadd.f32 %v2373_v24, %v991_v26 }
  0xd3   : > { %v1073_v62 = vrot.slane %v2898_v27, 4 }
  0xd4   : > { %468 = vrot.lane.b32.xlu0 %v2889_v22, %s2670_s24  ;;  %460 = vrot.lane.b32.xlu1 %v417_v20, %s2672_s25 }
  0xd5   : > { %1008 = vrot.lane.b32.xlu2 %v2893_v25, %s2671_s26 }
  0xdc   : > { %996 = vrot.lane.b32.xlu0 %v2893_v25, %s2672_s25  ;;  %1002 = vrot.lane.b32.xlu1 %v2893_v25, %s2670_s24 }
  0xdd   : > { %1010 = vrot.lane.b32.xlu2 %v2898_v27, %s2671_s26 }
  0xe4   : > { %998 = vrot.lane.b32.xlu0 %v2898_v27, %s2672_s25  ;;  %1004 = vrot.lane.b32.xlu1 %v2898_v27, %s2670_s24 }
  0xe5   : > { %710 = vrot.lane.b32.xlu2 %v2907_v30, %s2672_s25 }
  0xec   : > { %712 = vrot.lane.b32.xlu0 %v2910_v32, %s2672_s25  ;;  %718 = vrot.lane.b32.xlu1 %v2910_v32, %s2670_s24 }
  0xed   : > { %722 = vrot.lane.b32.xlu2 %v2907_v30, %s2671_s26 }
  0xf4   : > { %716 = vrot.lane.b32.xlu0 %v2907_v30, %s2670_s24  ;;  %724 = vrot.lane.b32.xlu1 %v2910_v32, %s2671_s26 }
 0x11e   : > { %v467_v33 = vpop.permute.xlu2 %466 }
 0x11f   : > { %v478_v37 = vrot.slane %v467_v33, 4  ;;  %v482_v43 = vsel %vm479_vm1, %v467_v33, %v481_v38 }
 0x120   : > { %v490_v48 = vperm.slane %v482_v43, %v2921_v40 }
 0x121   : > { %v480_v46 = vsel %vm479_vm1, %v478_v37, %v417_v20 }
 0x122   : > { %v486_v52 = vperm.slane %v480_v46, %v2921_v40  ;;  %v517_v57 = vrot.slane %v490_v48, 4 }
 0x124   : > { %v505_v3 = vrot.slane %v486_v52, 4 }
 0x127   : > { %v473_v34 = vpop.permute.xlu2 %472 }
 0x128   : > { %v491_v54 = vrot.slane %v473_v34, 4 }
 0x12f   : > { %v2919_v39 = vpop.permute.xlu2 %1008 }
 0x130   : > { %v1027_v9 = vrot.slane %v2919_v39, 4 }
 0x137   : > { %v2939_v6 = vpop.permute.xlu2 %1010 }
 0x138   : > { %v1083_v17 = vrot.slane %v2939_v6, 4 }
 0x13e   : > { %v475_v41 = vpop.permute.xlu1 %474  ;;  %v463_v42 = vpop.permute.xlu0 %462 }
 0x13f   : > { %v547_v44 = vrot.slane %v475_v41, 4  ;;  %v549_v45 = vrot.slane %v463_v42, 4 }
 0x141   : > { %v550_v47 = vsel %vm479_vm1, %v475_v41, %v549_v45  ;;  %v548_v49 = vsel %vm479_vm1, %v547_v44, %v463_v42 }
 0x142   : > { %v558_v53 = vperm.slane %v550_v47, %v2921_v40  ;;  %v554_v55 = vperm.slane %v548_v49, %v2921_v40 }
 0x144   : > { %v571_v4 = vrot.slane %v558_v53, 4  ;;  %v559_v8 = vrot.slane %v554_v55, 4 }
 0x146   : > { %v469_v59 = vpop.permute.xlu0 %468  ;;  %v461_v60 = vpop.permute.xlu1 %460 }
 0x147   : > { %v535_v63 = vrot.slane %v469_v59, 4  ;;  %v538_v0 = vsel %vm479_vm1, %v469_v59, %v537_v56  ;;  %v492_v1 = vsel %vm479_vm1, %v491_v54, %v461_v60  ;;  %v493_v2 = vrot.slane %v461_v60, 4 }
 0x148   : > { %v546_v5 = vperm.slane %v538_v0, %v2921_v40  ;;  %v498_v7 = vperm.slane %v492_v1, %v2921_v40 }
 0x149   : > { %v536_v10 = vsel %vm479_vm1, %v535_v63, %v2889_v22  ;;  %v494_v11 = vsel %vm479_vm1, %v473_v34, %v493_v2 }
 0x14a   : > { %v542_v12 = vperm.slane %v536_v10, %v2921_v40  ;;  %v572_v13 = vsel %vm479_vm1, %v571_v4, %v546_v5  ;;  %v573_v14 = vrot.slane %v546_v5, 4  ;;  %v502_v15 = vperm.slane %v494_v11, %v2921_v40 }
 0x14b   : > { %v578_v16 = vperm.slane %v572_v13, %v2932_v58  ;;  %v503_v18 = vrot.slane %v498_v7, 4  ;;  %v506_v19 = vsel %vm479_vm1, %v498_v7, %v505_v3 }
 0x14c   : > { %v560_v20 = vsel %vm479_vm1, %v559_v8, %v542_v12  ;;  %v561_v21 = vrot.slane %v542_v12, 4  ;;  %v574_v22 = vsel %vm479_vm1, %v558_v53, %v573_v14  ;;  %v514_v23 = vperm.slane %v506_v19, %v2932_v58 }
 0x14d   : > { %v566_v24 = vperm.slane %v560_v20, %v2932_v58  ;;  %v582_v26 = vperm.slane %v574_v22, %v2932_v58  ;;  %v587_v28 = vrot.slane %v578_v16, 4  ;;  %v504_v29 = vsel %vm479_vm1, %v503_v18, %v486_v52 }
 0x14e   : > { %v562_v31 = vsel %vm479_vm1, %v554_v55, %v561_v21  ;;  %v510_v33 = vperm.slane %v504_v29, %v2932_v58  ;;  %v515_v34 = vrot.slane %v502_v15, 4  ;;  %v518_v35 = vsel %vm479_vm1, %v502_v15, %v517_v57  ;;  %v997_v20 = vpop.permute.xlu0 %996 }
 0x14f   : > { %v570_v36 = vperm.slane %v562_v31, %v2932_v58  ;;  %v583_v37 = vrot.slane %v566_v24, 4  ;;  %v588_v38 = vsel %vm479_vm1, 0.0, %v587_v28  ;;  %v589_v41 = vrot.slane %v582_v26, 4 }
 0x150   : > { %v516_v42 = vsel %vm479_vm1, %v515_v34, %v490_v48  ;;  %v526_v43 = vperm.slane %v518_v35, %v2932_v58  ;;  %v527_v44 = vrot.slane %v510_v33, 4  ;;  %v529_v45 = vrot.slane %v514_v23, 4 }
 0x151   : > { %v584_v46 = vsel %vm479_vm1, 0.0, %v583_v37  ;;  %v585_v47 = vrot.slane %v570_v36, 4  ;;  %v590_v49 = vsel %vm479_vm1, 0.0, %v589_v41  ;;  %v656_v50 = vsel %vm479_vm1, %v589_v41, %v578_v16 }
 0x152   : > { %v660_v51 = vperm.slane %v656_v50, %v2921_v40  ;;  %v661_v52 = vrot.slane %v590_v49, 4  ;;  %v522_v53 = vperm.slane %v516_v42, %v2932_v58  ;;  %v528_v54 = vsel %vm479_vm1, 0.0, %v527_v44 }
 0x153   : > { %v586_v48 = vsel %vm479_vm1, 0.0, %v585_v47  ;;  %v645_v55 = vsel %vm479_vm1, %v585_v47, %v566_v24  ;;  %v530_v56 = vsel %vm479_vm1, 0.0, %v529_v45  ;;  %v533_v57 = vrot.slane %v526_v43, 4  ;;  %v1003_v43 = vpop.permute.xlu1 %1002 }
 0x154   : > { %v649_v59 = vperm.slane %v645_v55, %v2921_v40  ;;  %v650_v60 = vrot.slane %v586_v48, 4  ;;  %v662_v63 = vsel %vm479_vm1, %v661_v52, %v588_v38  ;;  %v681_v0 = vrot.slane %v660_v51, 4 }
 0x155   : > { %v666_v1 = vperm.slane %v662_v63, %v2921_v40  ;;  %v531_v2 = vrot.slane %v522_v53, 4  ;;  %v534_v3 = vsel %vm479_vm1, 0.0, %v533_v57  ;;  %v591_v4 = vsel %vm479_vm1, %v529_v45, %v510_v33 }
 0x156   : > { %v651_v5 = vsel %vm479_vm1, %v650_v60, %v584_v46  ;;  %v669_v7 = vrot.slane %v649_v59, 4  ;;  %v595_v8 = vperm.slane %v591_v4, %v2921_v40  ;;  %v596_v10 = vrot.slane %v530_v56, 4 }
 0x157   : > { %v655_v11 = vperm.slane %v651_v5, %v2921_v40  ;;  %v679_v12 = vrot.slane %v666_v1, 4  ;;  %v682_v13 = vsel %vm479_vm1, %v666_v1, %v681_v0  ;;  %v532_v14 = vsel %vm479_vm1, 0.0, %v531_v2 }
 0x158   : > { %v690_v15 = vperm.slane %v682_v13, %v2932_v58  ;;  %v597_v16 = vsel %vm479_vm1, %v596_v10, %v528_v54  ;;  %v602_v18 = vsel %vm479_vm1, %v533_v57, %v522_v53  ;;  %v607_v19 = vrot.slane %v534_v3, 4 }
 0x159   : > { %v667_v21 = vrot.slane %v655_v11, 4  ;;  %v670_v22 = vsel %vm479_vm1, %v655_v11, %v669_v7  ;;  %v680_v23 = vsel %vm479_vm1, %v679_v12, %v660_v51  ;;  %v601_v24 = vperm.slane %v597_v16, %v2921_v40  ;;  %v999_v7 = vpop.permute.xlu0 %998 }
 0x15a   : > { %v678_v26 = vperm.slane %v670_v22, %v2932_v58  ;;  %v686_v28 = vperm.slane %v680_v23, %v2932_v58  ;;  %v695_v29 = vrot.slane %v690_v15, 4  ;;  %v606_v31 = vperm.slane %v602_v18, %v2921_v40 }
 0x15b   : > { %v668_v33 = vsel %vm479_vm1, %v667_v21, %v649_v59  ;;  %v608_v34 = vsel %vm479_vm1, %v607_v19, %v532_v14  ;;  %v613_v35 = vrot.slane %v601_v24, 4  ;;  %v615_v36 = vrot.slane %v595_v8, 4 }
 0x15c   : > { %v674_v37 = vperm.slane %v668_v33, %v2932_v58  ;;  %v691_v38 = vrot.slane %v686_v28, 4  ;;  %v696_v41 = vsel %vm479_vm1, %v695_v29, %v678_v26  ;;  %v697_v42 = vrot.slane %v678_v26, 4 }
 0x15d   : > { %705 = vst.msk [vmem:[#allocation2 + $0x28] sm:$0xff] %vm699_vm2, %v696_v41  ;;  %v612_v44 = vperm.slane %v608_v34, %v2921_v40  ;;  %v614_v45 = vsel %vm479_vm1, %v613_v35, %v595_v8  ;;  %v616_v46 = vsel %vm479_vm1, %v601_v24, %v615_v36  ;;  %v627_v47 = vrot.slane %v606_v31, 4  ;;  %v1005_v24 = vpop.permute.xlu1 %1004 }
 0x15e   : > { %v692_v49 = vsel %vm479_vm1, %v691_v38, %v674_v37  ;;  %v693_v50 = vrot.slane %v674_v37, 4  ;;  %v698_v51 = vsel %vm479_vm1, %v690_v15, %v697_v42  ;;  %v620_v52 = vperm.slane %v614_v45, %v2932_v58 }
 0x15f   : > { %701 = vst.msk [vmem:[#allocation2 + $0x8] sm:$0xff] %vm699_vm2, %v692_v49  ;;  %v624_v53 = vperm.slane %v616_v46, %v2932_v58  ;;  %v625_v54 = vrot.slane %v612_v44, 4  ;;  %v628_v48 = vsel %vm479_vm1, %v612_v44, %v627_v47  ;;  %v1028_v55 = vsel %vm479_vm1, %v1027_v9, %v997_v20 }
 0x160   : > { %v694_v56 = vsel %vm479_vm1, %v686_v28, %v693_v50  ;;  %707 = vst.msk [vmem:[#allocation2 + $0x38] sm:$0xff] %vm699_vm2, %v698_v51  ;;  %v636_v57 = vperm.slane %v628_v48, %v2932_v58  ;;  %v639_v59 = vrot.slane %v620_v52, 4  ;;  %v1029_v60 = vrot.slane %v997_v20, 4 }
 0x161   : > { %703 = vst.msk [vmem:[#allocation2 + $0x18] sm:$0xff] %vm699_vm2, %v694_v56  ;;  %v626_v63 = vsel %vm479_vm1, %v625_v54, %v606_v31  ;;  %v643_v0 = vrot.slane %v624_v53, 4  ;;  %v1034_v1 = vperm.slane %v1028_v55, %v2921_v40  ;;  %v1014_v2 = vrot.slane %v1003_v43, 4 }
 0x162   : > { %v632_v3 = vperm.slane %v626_v63, %v2932_v58  ;;  %v641_v4 = vrot.slane %v636_v57, 4  ;;  %v1030_v9 = vsel %vm479_vm1, %v2919_v39, %v1029_v60  ;;  %v1018_v5 = vsel %vm479_vm1, %v1003_v43, %v1017_v61 }
 0x163   : > { %v644_v8 = vsel %vm479_vm1, %v636_v57, %v643_v0  ;;  %v1038_v10 = vperm.slane %v1030_v9, %v2921_v40  ;;  %v1039_v11 = vrot.slane %v1034_v1, 4  ;;  %v1016_v12 = vsel %vm479_vm1, %v1014_v2, %v2893_v25 }
 0x164   : > { %v637_v13 = vrot.slane %v632_v3, 4  ;;  %v640_v14 = vsel %vm479_vm1, %v632_v3, %v639_v59  ;;  %v642_v15 = vsel %vm479_vm1, %v641_v4, %v624_v53  ;;  %706 = vst.msk [vmem:[#allocation2 + $0x30] sm:$0xff] %vm699_vm2, %v644_v8  ;;  %v1022_v39 = vperm.slane %v1016_v12, %v2921_v40  ;;  %v1240_v16 = vld [vmem:[#allocation2 + $0x28] sm:$0xff] }
 0x165   : > { %702 = vst.msk [vmem:[#allocation2 + $0x10] sm:$0xff] %vm699_vm2, %v640_v14  ;;  %v1051_v61 = vrot.slane %v1038_v10, 4  ;;  %v1026_v18 = vperm.slane %v1018_v5, %v2921_v40  ;;  %v1084_v19 = vsel %vm479_vm1, %v1083_v17, %v999_v7  ;;  %v1085_v25 = vrot.slane %v999_v7, 4  ;;  %2241 = vmatpush.xpose.msk.msrb.mxu1 %vm699_vm2, %v1240_v16 }
 0x166   : > { %v638_v20 = vsel %vm479_vm1, %v637_v13, %v620_v52  ;;  %704 = vst.msk [vmem:[#allocation2 + $0x20] sm:$0xff] %vm699_vm2, %v642_v15  ;;  %v1040_v21 = vsel %vm479_vm1, %v1039_v11, %v1022_v39  ;;  %v1041_v22 = vrot.slane %v1022_v39, 4  ;;  %v1090_v23 = vperm.slane %v1084_v19, %v2921_v40  ;;  %v1236_v26 = vld [vmem:[#allocation2 + $0x8] sm:$0xff] }
 0x167   : > { %700 = vst.msk [vmem:[#allocation2] sm:$0xff] %vm699_vm2, %v638_v20  ;;  %v1046_v28 = vperm.slane %v1040_v21, %v2932_v58  ;;  %v1052_v17 = vsel %vm479_vm1, %v1051_v61, %v1026_v18  ;;  %v1053_v29 = vrot.slane %v1026_v18, 4  ;;  %v1086_v31 = vsel %vm479_vm1, %v2939_v6, %v1085_v25  ;;  %2233 = vmatpush.xpose.msk.msra.mxu3 %vm699_vm2, %v1236_v26  ;;  %v1242_v33 = vld [vmem:[#allocation2 + $0x38] sm:$0xff] }
 0x168   : > { %v1042_v34 = vsel %vm479_vm1, %v1034_v1, %v1041_v22  ;;  %v1058_v35 = vperm.slane %v1052_v17, %v2932_v58  ;;  %v1094_v36 = vperm.slane %v1086_v31, %v2921_v40  ;;  %v1095_v37 = vrot.slane %v1090_v23, 4  ;;  %2245 = vmatpush.xpose.msk.msrb.mxu2 %vm699_vm2, %v1242_v33  ;;  %v1238_v38 = vld [vmem:[#allocation2 + $0x18] sm:$0xff] }
 0x169   : > { %v1050_v41 = vperm.slane %v1042_v34, %v2932_v58  ;;  %v1054_v42 = vsel %vm479_vm1, %v1038_v10, %v1053_v29  ;;  %v1063_v43 = vrot.slane %v1046_v28, 4  ;;  %v1071_v44 = vrot.slane %v1005_v24, 4  ;;  %2237 = vmatpush.xpose.msk.msrb.mxu0 %vm699_vm2, %v1238_v38 }
 0x16a   : > { %v1062_v6 = vperm.slane %v1054_v42, %v2932_v58  ;;  %v1067_v45 = vrot.slane %v1058_v35, 4  ;;  %v1107_v46 = vrot.slane %v1094_v36, 4  ;;  %v1074_v47 = vsel %vm479_vm1, %v1005_v24, %v1073_v62 }
 0x16b   : > { %v1065_v49 = vrot.slane %v1050_v41, 4  ;;  %v1072_v50 = vsel %vm479_vm1, %v1071_v44, %v2898_v27  ;;  %v1082_v51 = vperm.slane %v1074_v47, %v2921_v40  ;;  %v1241_v52 = vld [vmem:[#allocation2 + $0x30] sm:$0xff]  ;;  %v1064_v55 = vsel %vm479_vm1, 0.0, %v1063_v43 }
 0x16c   : > { %v1068_v53 = vsel %vm479_vm1, 0.0, %v1067_v45  ;;  %v1069_v54 = vrot.slane %v1062_v6, 4  ;;  %v1078_v48 = vperm.slane %v1072_v50, %v2921_v40  ;;  %2246 = vmatpush.xpose.msk.msrb.mxu2 %vm699_vm2, %v1241_v52  ;;  %v1237_v56 = vld [vmem:[#allocation2 + $0x10] sm:$0xff] }
 0x16d   : > { %v1066_v57 = vsel %vm479_vm1, 0.0, %v1065_v49  ;;  %v1108_v62 = vsel %vm479_vm1, %v1107_v46, %v1082_v51  ;;  %v1109_v59 = vrot.slane %v1082_v51, 4  ;;  %v1239_v60 = vld [vmem:[#allocation2 + $0x20] sm:$0xff]  ;;  %v1127_v27 = vsel %vm479_vm1, %v1065_v49, %v1046_v28  ;;  %2238 = vmatpush.xpose.msk.msrb.mxu0 %vm699_vm2, %v1237_v56 }
 0x16e   : > { %v1070_v63 = vsel %vm479_vm1, 0.0, %v1069_v54  ;;  %v1132_v0 = vrot.slane %v1066_v57, 4  ;;  %v1138_v1 = vsel %vm479_vm1, %v1069_v54, %v1058_v35  ;;  %v1096_v2 = vsel %vm479_vm1, %v1095_v37, %v1078_v48  ;;  %2242 = vmatpush.xpose.msk.msrb.mxu1 %vm699_vm2, %v1239_v60  ;;  %v1235_v3 = vld [vmem:[#allocation2] sm:$0xff] }
 0x16f   : > { %v1142_v4 = vperm.slane %v1138_v1, %v2921_v40  ;;  %v1143_v9 = vrot.slane %v1070_v63, 4  ;;  %v1097_v5 = vrot.slane %v1078_v48, 4  ;;  %v1102_v7 = vperm.slane %v1096_v2, %v2932_v58  ;;  %2234 = vmatpush.xpose.msk.msra.mxu3 %vm699_vm2, %v1235_v3  ;;  %v711_v2 = vpop.permute.xlu2 %710 }
 0x170   : > { %v1110_v8 = vsel %vm479_vm1, %v1094_v36, %v1109_v59  ;;  %v1114_v10 = vperm.slane %v1108_v62, %v2932_v58  ;;  %v1131_v11 = vperm.slane %v1127_v27, %v2921_v40  ;;  %v1133_v12 = vsel %vm479_vm1, %v1132_v0, %v1064_v55 }
 0x171   : > { %v1144_v13 = vsel %vm479_vm1, %v1143_v9, %v1068_v53  ;;  %v1098_v14 = vsel %vm479_vm1, %v1090_v23, %v1097_v5  ;;  %v1118_v15 = vperm.slane %v1110_v8, %v2932_v58  ;;  %v1119_v39 = vrot.slane %v1102_v7, 4 }
 0x172   : > { %v1106_v16 = vperm.slane %v1098_v14, %v2932_v58  ;;  %v1123_v61 = vrot.slane %v1114_v10, 4  ;;  %v1137_v18 = vperm.slane %v1133_v12, %v2921_v40  ;;  %v1148_v19 = vperm.slane %v1144_v13, %v2921_v40 }
 0x173   : > { %v1125_v25 = vrot.slane %v1118_v15, 4  ;;  %v1151_v20 = vrot.slane %v1131_v11, 4  ;;  %v1163_v21 = vrot.slane %v1142_v4, 4  ;;  %v1120_v22 = vsel %vm479_vm1, 0.0, %v1119_v39 }
 0x174   : > { %v1121_v24 = vrot.slane %v1106_v16, 4  ;;  %v1124_v26 = vsel %vm479_vm1, 0.0, %v1123_v61  ;;  %v1149_v28 = vrot.slane %v1137_v18, 4  ;;  %v1161_v23 = vrot.slane %v1148_v19, 4 }
 0x175   : > { %v1126_v17 = vsel %vm479_vm1, 0.0, %v1125_v25  ;;  %v1192_v29 = vsel %vm479_vm1, %v1125_v25, %v1114_v10  ;;  %v1152_v31 = vsel %vm479_vm1, %v1137_v18, %v1151_v20  ;;  %v1164_v33 = vsel %vm479_vm1, %v1148_v19, %v1163_v21  ;;  %v713_v19 = vpop.permute.xlu0 %712  ;;  %v719_v25 = vpop.permute.xlu1 %718 }
 0x176   : > { %v1122_v34 = vsel %vm479_vm1, 0.0, %v1121_v24  ;;  %v1196_v35 = vperm.slane %v1192_v29, %v2921_v40  ;;  %v1197_v36 = vrot.slane %v1126_v17, 4  ;;  %v1160_v37 = vperm.slane %v1152_v31, %v2932_v58 }
 0x177   : > { %v1172_v38 = vperm.slane %v1164_v33, %v2932_v58  ;;  %v1150_v41 = vsel %vm479_vm1, %v1149_v28, %v1131_v11  ;;  %v1162_v42 = vsel %vm479_vm1, %v1161_v23, %v1142_v4  ;;  %v1181_v43 = vsel %vm479_vm1, %v1121_v24, %v1102_v7 }
 0x178   : > { %v1198_v44 = vsel %vm479_vm1, %v1197_v36, %v1124_v26  ;;  %v1156_v6 = vperm.slane %v1150_v41, %v2932_v58  ;;  %v1168_v45 = vperm.slane %v1162_v42, %v2932_v58  ;;  %v1179_v46 = vrot.slane %v1160_v37, 4 }
 0x179   : > { %v1177_v47 = vrot.slane %v1172_v38, 4  ;;  %v1185_v49 = vperm.slane %v1181_v43, %v2921_v40  ;;  %v1186_v50 = vrot.slane %v1122_v34, 4  ;;  %v1202_v51 = vperm.slane %v1198_v44, %v2921_v40 }
 0x17a   : > { %v1173_v52 = vrot.slane %v1168_v45, 4  ;;  %v1180_v53 = vsel %vm479_vm1, %v1172_v38, %v1179_v46  ;;  %v1175_v54 = vrot.slane %v1156_v6, 4  ;;  %v1217_v48 = vrot.slane %v1196_v35, 4 }
 0x17b   : > { %v1178_v55 = vsel %vm479_vm1, %v1177_v47, %v1160_v37  ;;  %2247 = vmatmul.msk.f32.vlgmr.msrb.gmra.mxu2 %vm699_vm2, %v1180_v53  ;;  %v1187_v56 = vsel %vm479_vm1, %v1186_v50, %v1120_v22  ;;  %v1205_v57 = vrot.slane %v1185_v49, 4  ;;  %v1215_v62 = vrot.slane %v1202_v51, 4  ;;  %v723_v22 = vpop.permute.xlu2 %722 }
 0x17c   : > { %2243 = vmatmul.msk.f32.vlgmr.msrb.gmra.mxu1 %vm699_vm2, %v1178_v55  ;;  %v1174_v59 = vsel %vm479_vm1, %v1173_v52, %v1156_v6  ;;  %v1176_v60 = vsel %vm479_vm1, %v1168_v45, %v1175_v54  ;;  %v1191_v27 = vperm.slane %v1187_v56, %v2921_v40  ;;  %v1218_v63 = vsel %vm479_vm1, %v1202_v51, %v1217_v48 }
 0x17d   : > { %2235 = vmatmul.msk.f32.vlgmr.msra.gmra.mxu3 %vm699_vm2, %v1174_v59  ;;  %2239 = vmatmul.msk.f32.vlgmr.msrb.gmra.mxu0 %vm699_vm2, %v1176_v60  ;;  %v1226_v0 = vperm.slane %v1218_v63, %v2932_v58  ;;  %v1216_v1 = vsel %vm479_vm1, %v1215_v62, %v1196_v35  ;;  %v786_v13 = vrot.slane %v2910_v32, 4  ;;  %v742_v61 = vrot.slane %v711_v2, 4  ;;  %v717_v37 = vpop.permute.xlu0 %716  ;;  %v725_v38 = vpop.permute.xlu1 %724 }
 0x17e   : > { %v1206_v3 = vsel %vm479_vm1, %v1191_v27, %v1205_v57  ;;  %v1203_v4 = vrot.slane %v1191_v27, 4  ;;  %v1222_v9 = vperm.slane %v1216_v1, %v2932_v58  ;;  %v784_v20 = vrot.slane %v719_v25, 4 }
 0x17f   : > { %v1214_v5 = vperm.slane %v1206_v3, %v2932_v58  ;;  %v1231_v7 = vrot.slane %v1226_v0, 4  ;;  %v787_v21 = vsel %vm479_vm1, %v719_v25, %v786_v13  ;;  %v740_v26 = vrot.slane %v723_v22, 4 }
 0x180   : > { %v1204_v8 = vsel %vm479_vm1, %v1203_v4, %v1185_v49  ;;  %v1227_v10 = vrot.slane %v1222_v9, 4  ;;  %v785_v24 = vsel %vm479_vm1, %v784_v20, %v2910_v32  ;;  %v743_v28 = vsel %vm479_vm1, %v723_v22, %v742_v61 }
 0x181   : > { %v1210_v11 = vperm.slane %v1204_v8, %v2932_v58  ;;  %v1233_v12 = vrot.slane %v1214_v5, 4  ;;  %v1232_v14 = vsel %vm479_vm1, %v1231_v7, %v1214_v5  ;;  %v795_v23 = vperm.slane %v787_v21, %v2921_v40 }
 0x182   : > { %v751_v17 = vperm.slane %v743_v28, %v2921_v40  ;;  %v798_v29 = vrot.slane %v713_v19, 4  ;;  %v730_v31 = vrot.slane %v2907_v30, 4  ;;  %v741_v33 = vsel %vm479_vm1, %v740_v26, %v711_v2 }
 0x183   : > { %v1234_v15 = vsel %vm479_vm1, %v1226_v0, %v1233_v12  ;;  %v1229_v39 = vrot.slane %v1210_v11, 4  ;;  %v1228_v16 = vsel %vm479_vm1, %v1227_v10, %v1210_v11  ;;  %v791_v34 = vperm.slane %v785_v24, %v2921_v40 }
 0x184   : > { %2244 = vmatmul.msk.f32.gmra.mxu1 %vm699_vm2, %v1232_v14  ;;  %2248 = vmatmul.msk.f32.gmra.mxu2 %vm699_vm2, %v1234_v15  ;;  %v747_v35 = vperm.slane %v741_v33, %v2921_v40  ;;  %v822_v36 = vrot.slane %v795_v23, 4  ;;  %v764_v32 = vrot.slane %v751_v17, 4  ;;  %v728_v41 = vrot.slane %v717_v37, 4 }
 0x185   : > { %2236 = vmatmul.msk.f32.gmra.mxu3 %vm699_vm2, %v1228_v16  ;;  %v1230_v18 = vsel %vm479_vm1, %v1222_v9, %v1229_v39  ;;  %v731_v42 = vsel %vm479_vm1, %v717_v37, %v730_v31  ;;  %v796_v43 = vrot.slane %v725_v38, 4  ;;  %v799_v44 = vsel %vm479_vm1, %v725_v38, %v798_v29 }
 0x186   : > { %2240 = vmatmul.msk.f32.gmra.mxu0 %vm699_vm2, %v1230_v18  ;;  %v810_v6 = vrot.slane %v791_v34, 4  ;;  %v739_v45 = vperm.slane %v731_v42, %v2921_v40  ;;  %v807_v46 = vperm.slane %v799_v44, %v2921_v40  ;;  %v729_v47 = vsel %vm479_vm1, %v728_v41, %v2907_v30 }
 0x187   : > { %v797_v49 = vsel %vm479_vm1, %v796_v43, %v713_v19  ;;  %v752_v50 = vrot.slane %v747_v35, 4  ;;  %v735_v51 = vperm.slane %v729_v47, %v2921_v40 }
 0x188   : > { %v766_v52 = vrot.slane %v739_v45, 4  ;;  %v803_v53 = vperm.slane %v797_v49, %v2921_v40  ;;  %v820_v54 = vrot.slane %v807_v46, 4  ;;  %v823_v48 = vsel %vm479_vm1, %v807_v46, %v822_v36 }
 0x189   : > { %v765_v55 = vsel %vm479_vm1, %v764_v32, %v739_v45  ;;  %v754_v56 = vrot.slane %v735_v51, 4  ;;  %v831_v27 = vperm.slane %v823_v48, %v2932_v58  ;;  %v753_v63 = vsel %vm479_vm1, %v752_v50, %v735_v51 }
 0x18a   : > { %v808_v57 = vrot.slane %v803_v53, 4  ;;  %v811_v62 = vsel %vm479_vm1, %v803_v53, %v810_v6  ;;  %v821_v59 = vsel %vm479_vm1, %v820_v54, %v795_v23  ;;  %v759_v2 = vperm.slane %v753_v63, %v2932_v58 }
 0x18b   : > { %v819_v30 = vperm.slane %v811_v62, %v2932_v58  ;;  %v827_v60 = vperm.slane %v821_v59, %v2932_v58  ;;  %v755_v1 = vsel %vm479_vm1, %v747_v35, %v754_v56  ;;  %v767_v3 = vsel %vm479_vm1, %v751_v17, %v766_v52 }
 0x18c   : > { %v809_v0 = vsel %vm479_vm1, %v808_v57, %v791_v34  ;;  %v838_v7 = vrot.slane %v831_v27, 4  ;;  %v763_v8 = vperm.slane %v755_v1, %v2932_v58  ;;  %v771_v10 = vperm.slane %v765_v55, %v2932_v58 }
 0x18d   : > { %v815_v4 = vperm.slane %v809_v0, %v2932_v58  ;;  %v834_v9 = vrot.slane %v819_v30, 4  ;;  %v836_v5 = vrot.slane %v827_v60, 4  ;;  %v775_v11 = vperm.slane %v767_v3, %v2932_v58 }
 0x18e   : > { %v776_v12 = vrot.slane %v759_v2, 4  ;;  %v839_v39 = vsel %vm479_vm1, 0.0, %v838_v7  ;;  %v905_v18 = vsel %vm479_vm1, %v838_v7, %v827_v60  ;;  %v778_v28 = vrot.slane %v763_v8, 4 }
 0x18f   : > { %v832_v13 = vrot.slane %v815_v4, 4  ;;  %v835_v14 = vsel %vm479_vm1, 0.0, %v834_v9  ;;  %v837_v15 = vsel %vm479_vm1, 0.0, %v836_v5  ;;  %v894_v16 = vsel %vm479_vm1, %v834_v9, %v815_v4 }
 0x190   : > { %v899_v61 = vrot.slane %v835_v14, 4  ;;  %v910_v19 = vrot.slane %v839_v39, 4  ;;  %v898_v20 = vperm.slane %v894_v16, %v2921_v40  ;;  %v909_v21 = vperm.slane %v905_v18, %v2921_v40 }
 0x191   : > { %v833_v25 = vsel %vm479_vm1, 0.0, %v832_v13  ;;  %v777_v22 = vsel %vm479_vm1, 0.0, %v776_v12  ;;  %v780_v23 = vrot.slane %v771_v10, 4  ;;  %v779_v34 = vsel %vm479_vm1, 0.0, %v778_v28 }
 0x192   : > { %v900_v24 = vsel %vm479_vm1, %v899_v61, %v833_v25  ;;  %v911_v26 = vsel %vm479_vm1, %v910_v19, %v837_v15  ;;  %v918_v31 = vrot.slane %v898_v20, 4  ;;  %v930_v33 = vrot.slane %v909_v21, 4 }
 0x193   : > { %v904_v17 = vperm.slane %v900_v24, %v2921_v40  ;;  %v915_v29 = vperm.slane %v911_v26, %v2921_v40  ;;  %v781_v35 = vsel %vm479_vm1, 0.0, %v780_v23  ;;  %v782_v36 = vrot.slane %v775_v11, 4 }
 0x194   : > { %v840_v37 = vsel %vm479_vm1, %v778_v28, %v759_v2  ;;  %v845_v49 = vrot.slane %v779_v34, 4 }
 0x195   : > { %v916_v38 = vrot.slane %v904_v17, 4  ;;  %v919_v32 = vsel %vm479_vm1, %v904_v17, %v918_v31  ;;  %v928_v41 = vrot.slane %v915_v29, 4  ;;  %v931_v42 = vsel %vm479_vm1, %v915_v29, %v930_v33 }
 0x196   : > { %v927_v43 = vperm.slane %v919_v32, %v2932_v58  ;;  %v939_v44 = vperm.slane %v931_v42, %v2932_v58  ;;  %v783_v6 = vsel %vm479_vm1, 0.0, %v782_v36  ;;  %v844_v45 = vperm.slane %v840_v37, %v2921_v40 }
 0x197   : > { %v917_v46 = vsel %vm479_vm1, %v916_v38, %v898_v20  ;;  %v929_v47 = vsel %vm479_vm1, %v928_v41, %v909_v21  ;;  %v851_v50 = vsel %vm479_vm1, %v782_v36, %v771_v10  ;;  %v846_v48 = vsel %vm479_vm1, %v845_v49, %v777_v22 }
 0x198   : > { %v923_v51 = vperm.slane %v917_v46, %v2932_v58  ;;  %v935_v52 = vperm.slane %v929_v47, %v2932_v58  ;;  %v944_v53 = vrot.slane %v939_v44, 4  ;;  %v946_v54 = vrot.slane %v927_v43, 4 }
 0x199   : > { %v855_v55 = vperm.slane %v851_v50, %v2921_v40  ;;  %v856_v56 = vrot.slane %v783_v6, 4  ;;  %v864_v57 = vrot.slane %v844_v45, 4  ;;  %v850_v27 = vperm.slane %v846_v48, %v2921_v40 }
 0x19a   : > { %v940_v62 = vrot.slane %v935_v52, 4  ;;  %v942_v59 = vrot.slane %v923_v51, 4  ;;  %v945_v30 = vsel %vm479_vm1, %v944_v53, %v927_v43  ;;  %v947_v60 = vsel %vm479_vm1, %v939_v44, %v946_v54 }
 0x19b   : > { %953 = vst.msk [vmem:[#allocation3 + $0x28] sm:$0xff] %vm699_vm2, %v945_v30  ;;  %v857_v63 = vsel %vm479_vm1, %v856_v56, %v781_v35  ;;  %v876_v0 = vrot.slane %v855_v55, 4  ;;  %v862_v4 = vrot.slane %v850_v27, 4  ;;  %v865_v9 = vsel %vm479_vm1, %v850_v27, %v864_v57 }
 0x19c   : > { %v941_v1 = vsel %vm479_vm1, %v940_v62, %v923_v51  ;;  %v943_v2 = vsel %vm479_vm1, %v935_v52, %v942_v59  ;;  %955 = vst.msk [vmem:[#allocation3 + $0x38] sm:$0xff] %vm699_vm2, %v947_v60  ;;  %v861_v3 = vperm.slane %v857_v63, %v2921_v40  ;;  %v873_v5 = vperm.slane %v865_v9, %v2932_v58 }
 0x19d   : > { %949 = vst.msk [vmem:[#allocation3 + $0x8] sm:$0xff] %vm699_vm2, %v941_v1  ;;  %v863_v10 = vsel %vm479_vm1, %v862_v4, %v844_v45 }
 0x19e   : > { %951 = vst.msk [vmem:[#allocation3 + $0x18] sm:$0xff] %vm699_vm2, %v943_v2  ;;  %v874_v7 = vrot.slane %v861_v3, 4  ;;  %v877_v8 = vsel %vm479_vm1, %v861_v3, %v876_v0  ;;  %v869_v12 = vperm.slane %v863_v10, %v2932_v58  ;;  %v892_v14 = vrot.slane %v873_v5, 4 }
 0x19f   : > { %v885_v11 = vperm.slane %v877_v8, %v2932_v58 }
 0x1a0   : > { %v875_v13 = vsel %vm479_vm1, %v874_v7, %v855_v55  ;;  %v888_v16 = vrot.slane %v869_v12, 4 }
 0x1a1   : > { %v881_v15 = vperm.slane %v875_v13, %v2932_v58  ;;  %v890_v39 = vrot.slane %v885_v11, 4  ;;  %v893_v61 = vsel %vm479_vm1, %v885_v11, %v892_v14 }
 0x1a2   : > { %v1248_v18 = vld [vmem:[#allocation3 + $0x28] sm:$0xff]  ;;  %954 = vst.msk [vmem:[#allocation3 + $0x30] sm:$0xff] %vm699_vm2, %v893_v61 }
 0x1a3   : > { %v886_v19 = vrot.slane %v881_v15, 4  ;;  %v891_v25 = vsel %vm479_vm1, %v890_v39, %v873_v5  ;;  %1583 = vmatpush.msra.mxu1 %v1248_v18  ;;  %v1250_v20 = vld [vmem:[#allocation3 + $0x38] sm:$0xff]  ;;  %v889_v21 = vsel %vm479_vm1, %v881_v15, %v888_v16 }
 0x1a4   : > { %952 = vst.msk [vmem:[#allocation3 + $0x20] sm:$0xff] %vm699_vm2, %v891_v25  ;;  %v1244_v22 = vld [vmem:[#allocation3 + $0x8] sm:$0xff]  ;;  %1612 = vmatpush.msra.mxu2 %v1250_v20 }
 0x1a5   : > { %v887_v24 = vsel %vm479_vm1, %v886_v19, %v869_v12  ;;  %950 = vst.msk [vmem:[#allocation3 + $0x10] sm:$0xff] %vm699_vm2, %v889_v21  ;;  %1525 = vmatpush.msrb.mxu3 %v1244_v22  ;;  %v1246_v26 = vld [vmem:[#allocation3 + $0x18] sm:$0xff] }
 0x1a6   : > { %948 = vst.msk [vmem:[#allocation3] sm:$0xff] %vm699_vm2, %v887_v24  ;;  %1554 = vmatpush.msra.mxu0 %v1246_v26 }
 0x1a9   : > { %v1249_v28 = vld [vmem:[#allocation3 + $0x30] sm:$0xff] }
 0x1aa   : > { %1613 = vmatpush.msra.mxu2 %v1249_v28 }
 0x1ab   : > { %v1247_v23 = vld [vmem:[#allocation3 + $0x20] sm:$0xff] }
 0x1ac   : > { %v1245_v17 = vld [vmem:[#allocation3 + $0x10] sm:$0xff]  ;;  %1584 = vmatpush.msra.mxu1 %v1247_v23 }
 0x1ad   : > { %v1243_v29 = vld [vmem:[#allocation3] sm:$0xff]  ;;  %1555 = vmatpush.msra.mxu0 %v1245_v17 }
 0x1ae   : > { %1526 = vmatpush.msrb.mxu3 %v1243_v29 }
 0x1f9   : > { %v1351_v31 = vpop.f32.mrf.mxu1 }
 0x1fa   : > { %v1405_v33 = vsel %vm1392_vm3, %v1351_v31, -inf  ;;  %v1316_v38 = vpop.f32.mrf.mxu0 }
 0x1fb   : > { %1406 = vmax.xlane.f32.xlu2 %v1405_v33  ;;  %v1399_v43 = vsel %vm1392_vm3, %v1316_v38, -inf }
 0x1fe   : > { %v1386_v34 = vpop.f32.mrf.mxu2 }
 0x1ff   : > { %v1411_v35 = vsel %vm1392_vm3, %v1386_v34, -inf }
 0x200   : > { %v1281_v36 = vpop.f32.mrf.mxu3  ;;  %1412 = vmax.xlane.f32.xlu1 %v1411_v35 }
 0x201   : > { %v1393_v37 = vsel %vm1392_vm3, %v1281_v36, -inf  ;;  %v1354_v6 = vpop.f32.mrf.mxu1 }
 0x202   : > { %1394 = vmax.xlane.f32.xlu0 %v1393_v37  ;;  %v1408_v47 = vsel %vm1392_vm3, %v1354_v6, -inf }
 0x203   : > { %v1319_v45 = vpop.f32.mrf.mxu0 }
 0x204   : > { %v1402_v46 = vsel %vm1392_vm3, %v1319_v45, -inf }
 0x207   : > { %v1389_v32 = vpop.f32.mrf.mxu2 }
 0x208   : > { %v1284_v41 = vpop.f32.mrf.mxu3  ;;  %v1414_v42 = vsel %vm1392_vm3, %v1389_v32, -inf }
 0x209   : > { %1415 = vmax.xlane.f32.xlu1 %v1414_v42  ;;  %v1396_v44 = vsel %vm1392_vm3, %v1284_v41, -inf }
 0x20a   : > { %1400 = vmax.xlane.f32.xlu0 %v1399_v43  ;;  %1397 = vmax.xlane.f32.xlu2 %v1396_v44 }
 0x212   : > { %1403 = vmax.xlane.f32.xlu0 %v1402_v46  ;;  %1409 = vmax.xlane.f32.xlu2 %v1408_v47 }
 0x26e   : > { %v3229_v49 = vpop.xlane.xlu2 %1406 }
 0x26f   : > { %v1445_v50 = vsub.f32 %v1351_v31, %v3229_v49  ;;  %v1421_v24 = vsub.f32 -inf, %v3229_v49 }
 0x271   : > { %v1457_v51 = vmul.f32 1.442695, %v1445_v50  ;;  %v1433_v26 = vmul.f32 1.442695, %v1421_v24 }
 0x273   : > { %v3232_v52 = vpop.xlane.xlu1 %1412  ;;  %2376 = vpow2.f32 %v1457_v51 }
 0x274   : > { %v1447_v53 = vsub.f32 %v1386_v34, %v3232_v52  ;;  %v1423_v28 = vsub.f32 -inf, %v3232_v52 }
 0x275   : > { %v3235_v54 = vpop.xlane.xlu0 %1394 }
 0x276   : > { %v1461_v48 = vmul.f32 1.442695, %v1447_v53  ;;  %v1441_v55 = vsub.f32 %v1281_v36, %v3235_v54  ;;  %v1417_v23 = vsub.f32 -inf, %v3235_v54  ;;  %v1437_v17 = vmul.f32 1.442695, %v1423_v28 }
 0x278   : > { %v1449_v56 = vmul.f32 1.442695, %v1441_v55  ;;  %2378 = vpow2.f32 %v1461_v48  ;;  %v1425_v29 = vmul.f32 1.442695, %v1417_v23 }
 0x279   : > { %v2377_v57 = vpop.eup %2376 }
 0x27a   : > { %2380 = vpow2.f32 %v1449_v56  ;;  %2253 = vmatmul.msk.f32.vlgmr.msra.gmra.mxu1 %vm1392_vm3, %v2377_v57  ;;  %v1485_v62 = vsel %vm1392_vm3, %v2377_v57, 0.0 }
 0x27b   : > { %1486 = vadd.xlane.f32.xlu1 %v1485_v62 }
 0x27c   : > { %v1416_v59 = vpop.xlane.xlu1 %1415 }
 0x27d   : > { %v1448_v30 = vsub.f32 %v1389_v32, %v1416_v59  ;;  %v1401_v60 = vpop.xlane.xlu0 %1400  ;;  %v3240_v27 = vpop.xlane.xlu2 %1397  ;;  %v1424_v31 = vsub.f32 -inf, %v1416_v59 }
 0x27e   : > { %v1443_v63 = vsub.f32 %v1316_v38, %v1401_v60  ;;  %v1442_v0 = vsub.f32 %v1284_v41, %v3240_v27  ;;  %v2379_v1 = vpop.eup %2378  ;;  %v1419_v33 = vsub.f32 -inf, %v1401_v60  ;;  %v1418_v35 = vsub.f32 -inf, %v3240_v27 }
 0x27f   : > { %v1463_v2 = vmul.f32 1.442695, %v1448_v30  ;;  %2255 = vmatmul.msk.f32.vlgmr.msra.gmra.mxu2 %vm1392_vm3, %v2379_v1  ;;  %v1491_v9 = vsel %vm1392_vm3, %v2379_v1, 0.0  ;;  %v1439_v36 = vmul.f32 1.442695, %v1424_v31 }
 0x280   : > { %v1453_v3 = vmul.f32 1.442695, %v1443_v63  ;;  %v2381_v4 = vpop.eup %2380  ;;  %v1451_v5 = vmul.f32 1.442695, %v1442_v0  ;;  %1492 = vadd.xlane.f32.xlu0 %v1491_v9  ;;  %v1429_v38 = vmul.f32 1.442695, %v1419_v33 }
 0x281   : > { %2382 = vpow2.f32 %v1463_v2  ;;  %2249 = vmatmul.msk.f32.vlgmr.msrb.gmra.mxu3 %vm1392_vm3, %v2381_v4  ;;  %v1473_v7 = vsel %vm1392_vm3, %v2381_v4, 0.0  ;;  %v1427_v42 = vmul.f32 1.442695, %v1418_v35 }
 0x282   : > { %1474 = vadd.xlane.f32.xlu2 %v1473_v7  ;;  %2384 = vpow2.f32 %v1453_v3 }
 0x283   : > { %2386 = vpow2.f32 %v1451_v5 }
 0x285   : > { %v1404_v8 = vpop.xlane.xlu0 %1403  ;;  %v1410_v10 = vpop.xlane.xlu2 %1409 }
 0x286   : > { %v1444_v11 = vsub.f32 %v1319_v45, %v1404_v8  ;;  %v1446_v12 = vsub.f32 %v1354_v6, %v1410_v10  ;;  %v1420_v37 = vsub.f32 -inf, %v1404_v8  ;;  %v1422_v32 = vsub.f32 -inf, %v1410_v10 }
 0x287   : > { %v2383_v13 = vpop.eup %2382 }
 0x288   : > { %v1455_v14 = vmul.f32 1.442695, %v1444_v11  ;;  %v1459_v15 = vmul.f32 1.442695, %v1446_v12  ;;  %2256 = vmatmul.msk.f32.gmra.mxu2 %vm1392_vm3, %v2383_v13  ;;  %v2385_v39 = vpop.eup %2384  ;;  %v1494_v20 = vsel %vm1392_vm3, %v2383_v13, 0.0 }
 0x289   : > { %2251 = vmatmul.msk.f32.vlgmr.msra.gmra.mxu0 %vm1392_vm3, %v2385_v39  ;;  %v1479_v16 = vsel %vm1392_vm3, %v2385_v39, 0.0  ;;  %v2387_v61 = vpop.eup %2386  ;;  %v1431_v44 = vmul.f32 1.442695, %v1420_v37  ;;  %v1435_v46 = vmul.f32 1.442695, %v1422_v32 }
 0x28a   : > { %2388 = vpow2.f32 %v1455_v14  ;;  %1480 = vadd.xlane.f32.xlu1 %v1479_v16  ;;  %2250 = vmatmul.msk.f32.gmra.mxu3 %vm1392_vm3, %v2387_v61  ;;  %v1476_v18 = vsel %vm1392_vm3, %v2387_v61, 0.0 }
 0x28b   : > { %2390 = vpow2.f32 %v1459_v15  ;;  %1477 = vadd.xlane.f32.xlu0 %v1476_v18 }
 0x28c   : > { %2392 = vpow2.f32 %v1433_v26 }
 0x28d   : > { %2394 = vpow2.f32 %v1437_v17 }
 0x28e   : > { %2396 = vpow2.f32 %v1425_v29 }
 0x28f   : > { %2398 = vpow2.f32 %v1439_v36 }
 0x290   : > { %v2389_v19 = vpop.eup %2388  ;;  %2400 = vpow2.f32 %v1429_v38 }
 0x291   : > { %v2391_v25 = vpop.eup %2390  ;;  %2252 = vmatmul.msk.f32.gmra.mxu0 %vm1392_vm3, %v2389_v19  ;;  %v1482_v22 = vsel %vm1392_vm3, %v2389_v19, 0.0 }
 0x292   : > { %2254 = vmatmul.msk.f32.gmra.mxu1 %vm1392_vm3, %v2391_v25  ;;  %1495 = vadd.xlane.f32.xlu1 %v1494_v20  ;;  %v1488_v21 = vsel %vm1392_vm3, %v2391_v25, 0.0  ;;  %v2393_v34 = vpop.eup %2392 }
 0x293   : > { %1489 = vadd.xlane.f32.xlu2 %v1488_v21  ;;  %v1469_v41 = vmul.f32 0.0, %v2393_v34  ;;  %v2395_v45 = vpop.eup %2394 }
 0x294   : > { %v2397_v47 = vpop.eup %2396  ;;  %v3261_v49 = vmul.f32 0.0, %v2395_v45 }
 0x295   : > { %v3263_v51 = vmul.f32 0.0, %v2397_v47  ;;  %v2399_v52 = vpop.eup %2398 }
 0x296   : > { %v2401_v48 = vpop.eup %2400  ;;  %v3270_v0 = vmul.f32 0.0, %v2399_v52 }
 0x297   : > { %v3272_v3 = vmul.f32 0.0, %v2401_v48 }
 0x29b   : > { %1483 = vadd.xlane.f32.xlu2 %v1482_v22 }
 0x2ee   : > { %v1487_v43 = vpop.xlane.xlu1 %1486 }
 0x2ef   : > { %v1501_v6 = vadd.f32 %v1487_v43, %v1469_v41 }
 0x2f1   : > { %2402 = vrcp.f32 %v1501_v6  ;;  %v1694_v30 = vand.u32 2147483647, %v1501_v6  ;;  %v1696_v63 = vand.u32 2147483648, %v1501_v6  ;;  %vm1690_vm5 = vweird.f32 %v1501_v6 }
 0x2f2   : > { %2404 = vpow2.f32 %v1427_v42 }
 0x2f3   : > { %2406 = vpow2.f32 %v1431_v44  ;;  %v1493_v50 = vpop.xlane.xlu0 %1492  ;;  %vm3276_vm6 = vcmp.eq.f32.partialorder %v1694_v30, 8.507059e+37  ;;  %v1697_v13 = vor.u32 1.1754944e-38, %v1696_v63 }
 0x2f4   : > { %2408 = vpow2.f32 %v1435_v46  ;;  %v1503_v53 = vadd.f32 %v1493_v50, %v3261_v49 }
 0x2f5   : > { %v1475_v54 = vpop.xlane.xlu2 %1474 }
 0x2f6   : > { %v3267_v55 = vadd.f32 %v1475_v54, %v3263_v51  ;;  %2410 = vrcp.f32 %v1503_v53  ;;  %v1722_v15 = vand.u32 2147483647, %v1503_v53  ;;  %v1724_v18 = vand.u32 2147483648, %v1503_v53 }
 0x2f7   : > { %v2403_v56 = vpop.eup %2402  ;;  %v1586_v1 = vpop.f32.mrf.mxu1  ;;  %vm1718_vm8 = vweird.f32 %v1503_v53 }
 0x2f8   : > { %v2405_v57 = vpop.eup %2404  ;;  %v1686_v62 = vmul.f32 %v2403_v56, %v1501_v6  ;;  %2412 = vrcp.f32 %v3267_v55  ;;  %vm1691_vm4 = vweird.f32 %v2403_v56  ;;  %v1625_v16 = vadd.f32 %v1586_v1, %v1469_v41 }
 0x2f9   : > { %v2407_v59 = vpop.eup %2406  ;;  %v3274_v4 = vmul.f32 0.0, %v2405_v57  ;;  %vm1692_vm7 = vmor %vm1690_vm5, %vm1691_vm4  ;;  %v1638_v21 = vand.u32 2147483647, %v3267_v55  ;;  %v1640_v22 = vand.u32 2147483648, %v3267_v55  ;;  %vm1634_vm10 = vweird.f32 %v3267_v55 }
 0x2fa   : > { %v2409_v60 = vpop.eup %2408  ;;  %v1687_v27 = vsub.f32 1.0, %v1686_v62  ;;  %v3282_v8 = vmul.f32 0.0, %v2407_v59  ;;  %vm3299_vm12 = vcmp.eq.f32.partialorder %v1722_v15, 8.507059e+37  ;;  %v1725_v36 = vor.u32 1.1754944e-38, %v1724_v18 }
 0x2fb   : > { %v3280_v7 = vmul.f32 0.0, %v2409_v60  ;;  %vm3304_vm13 = vcmp.eq.f32.partialorder %v1638_v21, 8.507059e+37  ;;  %v1641_v41 = vor.u32 1.1754944e-38, %v1640_v22 }
 0x2fc   : > { %v1688_v2 = vmul.f32 %v2403_v56, %v1687_v27  ;;  %v2411_v9 = vpop.eup %2410 }
 0x2fd   : > { %v1714_v11 = vmul.f32 %v2411_v9, %v1503_v53  ;;  %v1481_v14 = vpop.xlane.xlu1 %1480  ;;  %vm1719_vm9 = vweird.f32 %v2411_v9 }
 0x2fe   : > { %v2413_v10 = vpop.eup %2412  ;;  %v1689_v12 = vadd.f32 %v2403_v56, %v1688_v2  ;;  %v3287_v61 = vadd.f32 %v1481_v14, %v3272_v3  ;;  %v1478_v20 = vpop.xlane.xlu0 %1477  ;;  %vm1720_vm14 = vmor %vm1718_vm8, %vm1719_vm9 }
 0x2ff   : > { %v1630_v39 = vmul.f32 %v2413_v10, %v3267_v55  ;;  %v1715_v19 = vsub.f32 1.0, %v1714_v11  ;;  %v3295_v28 = vadd.f32 %v1478_v20, %v3274_v4  ;;  %vm1635_vm11 = vweird.f32 %v2413_v10 }
 0x300   : > { %v1693_v25 = vsel %vm1692_vm7, %v2403_v56, %v1689_v12  ;;  %2414 = vrcp.f32 %v3287_v61  ;;  %v1666_v37 = vand.u32 2147483647, %v3287_v61  ;;  %v1668_v42 = vand.u32 2147483648, %v3287_v61  ;;  %vm1636_vm15 = vmor %vm1634_vm10, %vm1635_vm11 }
 0x301   : > { %v1631_v24 = vsub.f32 1.0, %v1630_v39  ;;  %v1698_v26 = vsel %vm3276_vm6, %v1697_v13, %v1693_v25  ;;  %v1716_v29 = vmul.f32 %v2411_v9, %v1715_v19  ;;  %2416 = vrcp.f32 %v3295_v28 }
 0x302   : > { %v1745_v23 = vmul.f32 %v1698_v26, %v1625_v16  ;;  %v1615_v17 = vpop.f32.mrf.mxu2  ;;  %vm1662_vm4 = vweird.f32 %v3287_v61  ;;  %v1652_v48 = vand.u32 2147483647, %v3295_v28  ;;  %vm3324_vm5 = vcmp.eq.f32.partialorder %v1666_v37, 8.507059e+37 }
 0x303   : > { %v1632_v31 = vmul.f32 %v2413_v10, %v1631_v24  ;;  %v1717_v34 = vadd.f32 %v2411_v9, %v1716_v29  ;;  %v1627_v6 = vadd.f32 %v1615_v17, %v3261_v49  ;;  %v1669_v30 = vor.u32 1.1754944e-38, %v1668_v42 }
 0x304   : > { %v1528_v33 = vpop.f32.mrf.mxu3  ;;  %v1749_v43 = vrot.slane %v1745_v23, 4  ;;  %vm1648_vm6 = vweird.f32 %v3295_v28  ;;  %vm3333_vm7 = vcmp.eq.f32.partialorder %v1652_v48, 8.507059e+37  ;;  %v1654_v5 = vand.u32 2147483648, %v3295_v28 }
 0x305   : > { %v1633_v38 = vadd.f32 %v2413_v10, %v1632_v31  ;;  %v1621_v44 = vadd.f32 %v1528_v33, %v3263_v51  ;;  %v1721_v45 = vsel %vm1720_vm14, %v2411_v9, %v1717_v34  ;;  %v1496_v46 = vpop.xlane.xlu1 %1495 }
 0x306   : > { %v2415_v47 = vpop.eup %2414  ;;  %v1726_v52 = vsel %vm3299_vm12, %v1725_v36, %v1721_v45  ;;  %v3315_v53 = vadd.f32 %v1496_v46, %v3270_v0  ;;  %v1490_v54 = vpop.xlane.xlu2 %1489  ;;  %v1655_v22 = vor.u32 1.1754944e-38, %v1654_v5 }
 0x307   : > { %v1637_v50 = vsel %vm1636_vm15, %v2413_v10, %v1633_v38  ;;  %v1658_v51 = vmul.f32 %v2415_v47, %v3287_v61  ;;  %v3322_v55 = vadd.f32 %v1490_v54, %v3280_v7  ;;  %v1557_v56 = vpop.f32.mrf.mxu0  ;;  %v2417_v62 = vpop.eup %2416  ;;  %v1747_v63 = vmul.f32 %v1726_v52, %v1627_v6 }
 0x308   : > { %v1642_v49 = vsel %vm3304_vm13, %v1641_v41, %v1637_v50  ;;  %2418 = vrcp.f32 %v3315_v53  ;;  %v1644_v27 = vmul.f32 %v2417_v62, %v3295_v28  ;;  %vm1663_vm8 = vweird.f32 %v2415_v47 }
 0x309   : > { %v1741_v59 = vmul.f32 %v1642_v49, %v1621_v44  ;;  %v1659_v60 = vsub.f32 1.0, %v1658_v51  ;;  %2420 = vrcp.f32 %v3322_v55  ;;  %v1623_v15 = vadd.f32 %v1557_v56, %v3272_v3  ;;  %vm1664_vm10 = vmor %vm1662_vm4, %vm1663_vm8 }
 0x30a   : > { %v1645_v10 = vsub.f32 1.0, %v1644_v27  ;;  %v1736_v39 = vand.u32 2147483647, %v3315_v53  ;;  %v1738_v16 = vand.u32 2147483648, %v3315_v53  ;;  %v1761_v18 = vrot.slane %v1747_v63, 4 }
 0x30b   : > { %v1750_v1 = vsel %vm479_vm1, %v1749_v43, %v1741_v59  ;;  %v1751_v2 = vrot.slane %v1741_v59, 4  ;;  %v1660_v12 = vmul.f32 %v2415_v47, %v1659_v60  ;;  %v1618_v13 = vpop.f32.mrf.mxu2  ;;  %vm1649_vm9 = vweird.f32 %v2417_v62 }
 0x30c   : > { %v3339_v11 = vperm.slane %v1750_v1, %v2921_v40  ;;  %v1646_v25 = vmul.f32 %v2417_v62, %v1645_v10  ;;  %v1628_v24 = vadd.f32 %v1618_v13, %v3270_v0  ;;  %vm1732_vm11 = vweird.f32 %v3315_v53  ;;  %vm1650_vm13 = vmor %vm1648_vm6, %vm1649_vm9 }
 0x30d   : > { %v1752_v14 = vsel %vm479_vm1, %v1745_v23, %v1751_v2  ;;  %v1661_v19 = vadd.f32 %v2415_v47, %v1660_v12  ;;  %v1531_v31 = vpop.f32.mrf.mxu3  ;;  %vm3354_vm12 = vcmp.eq.f32.partialorder %v1736_v39, 8.507059e+37  ;;  %v1739_v35 = vor.u32 1.1754944e-38, %v1738_v16 }
 0x30e   : > { %v2419_v20 = vpop.eup %2418  ;;  %v1760_v21 = vperm.slane %v1752_v14, %v2921_v40  ;;  %v1484_v3 = vpop.xlane.xlu2 %1483  ;;  %v1775_v23 = vrot.slane %v3339_v11, 4  ;;  %v1647_v34 = vadd.f32 %v2417_v62, %v1646_v25  ;;  %v1708_v41 = vand.u32 2147483647, %v3322_v55 }
 0x30f   : > { %v3350_v26 = vpop.eup %2420  ;;  %v1728_v17 = vmul.f32 %v2419_v20, %v3315_v53  ;;  %v1665_v29 = vsel %vm1664_vm10, %v2415_v47, %v1661_v19  ;;  %v3366_v38 = vadd.f32 %v1484_v3, %v3282_v8  ;;  %v1560_v32 = vpop.f32.mrf.mxu0  ;;  %v1622_v43 = vadd.f32 %v1531_v31, %v3274_v4 }
 0x310   : > { %v1700_v61 = vmul.f32 %v3350_v26, %v3322_v55  ;;  %v1670_v0 = vsel %vm3324_vm5, %v1669_v30, %v1665_v29  ;;  %v1787_v42 = vrot.slane %v1760_v21, 4  ;;  %v1651_v44 = vsel %vm1650_vm13, %v2417_v62, %v1647_v34  ;;  %v1589_v6 = vpop.f32.mrf.mxu1 }
 0x311   : > { %v1729_v36 = vsub.f32 1.0, %v1728_v17  ;;  %v1743_v37 = vmul.f32 %v1670_v0, %v1623_v15  ;;  %vm1733_vm14 = vweird.f32 %v2419_v20  ;;  %v1656_v47 = vsel %vm3333_vm7, %v1655_v22, %v1651_v44 }
 0x312   : > { %v1701_v50 = vsub.f32 1.0, %v1700_v61  ;;  %2422 = vrcp.f32 %v3366_v38  ;;  %v3376_v54 = vadd.f32 %v1560_v32, %v3282_v8  ;;  %v3379_v48 = vmul.f32 %v1656_v47, %v1622_v43  ;;  %vm1734_vm4 = vmor %vm1732_vm11, %vm1733_vm14 }
 0x313   : > { %v1762_v45 = vsel %vm479_vm1, %v1761_v18, %v1743_v37  ;;  %v1763_v46 = vrot.slane %v1743_v37, 4  ;;  %v1730_v28 = vmul.f32 %v2419_v20, %v1729_v36  ;;  %v1626_v49 = vadd.f32 %v1589_v6, %v3280_v7 }
 0x314   : > { %v1768_v52 = vperm.slane %v1762_v45, %v2921_v40  ;;  %vm1704_vm15 = vweird.f32 %v3322_v55  ;;  %vm1705_vm5 = vweird.f32 %v3350_v26  ;;  %v1680_v30 = vand.u32 2147483647, %v3366_v38 }
 0x315   : > { %v1764_v4 = vsel %vm479_vm1, %v1747_v63, %v1763_v46  ;;  %v1731_v51 = vadd.f32 %v2419_v20, %v1730_v28  ;;  %v1682_v7 = vand.u32 2147483648, %v3366_v38  ;;  %v1807_v5 = vrot.slane %v3379_v48, 4  ;;  %vm1706_vm9 = vmor %vm1704_vm15, %vm1705_vm5 }
 0x316   : > { %v1772_v56 = vperm.slane %v1764_v4, %v2921_v40  ;;  %v1773_v57 = vrot.slane %v1768_v52, 4  ;;  %v1776_v62 = vsel %vm479_vm1, %v1768_v52, %v1775_v23  ;;  %vm1676_vm6 = vweird.f32 %v3366_v38 }
 0x317   : > { %v1784_v8 = vperm.slane %v1776_v62, %v2932_v58  ;;  %v1735_v59 = vsel %vm1734_vm4, %v2419_v20, %v1731_v51  ;;  %v1710_v14 = vand.u32 2147483648, %v3322_v55  ;;  %vm1709_vm8 = vcmp.eq.f32.partialorder %v1708_v41, 8.507059e+37 }
 0x318   : > { %v1774_v60 = vsel %vm479_vm1, %v1773_v57, %v3339_v11  ;;  %v1785_v27 = vrot.slane %v1772_v56, 4  ;;  %v1788_v63 = vsel %vm479_vm1, %v1772_v56, %v1787_v42  ;;  %v1740_v1 = vsel %vm3354_vm12, %v1739_v35, %v1735_v59  ;;  %v2423_v10 = vpop.eup %2422 }
 0x319   : > { %v1780_v53 = vperm.slane %v1774_v60, %v2932_v58  ;;  %v1796_v2 = vperm.slane %v1788_v63, %v2932_v58  ;;  %v1799_v9 = vrot.slane %v1784_v8, 4  ;;  %v3401_v13 = vmul.f32 %v1740_v1, %v1628_v24 }
 0x31a   : > { %v1786_v12 = vsel %vm479_vm1, %v1785_v27, %v1760_v21  ;;  %v1702_v11 = vmul.f32 %v3350_v26, %v1701_v50  ;;  %v1672_v25 = vmul.f32 %v2423_v10, %v3366_v38  ;;  %vm1677_vm7 = vweird.f32 %v2423_v10 }
 0x31b   : > { %v1792_v15 = vperm.slane %v1786_v12, %v2932_v58  ;;  %v1797_v39 = vrot.slane %v1780_v53, 4  ;;  %v1800_v16 = vsel %vm479_vm1, 0.0, %v1799_v9  ;;  %v1803_v18 = vrot.slane %v1796_v2, 4  ;;  %vm1678_vm11 = vmor %vm1676_vm6, %vm1677_vm7 }
 0x31c   : > { %v1866_v19 = vrot.slane %v1800_v16, 4  ;;  %v1703_v20 = vadd.f32 %v3350_v26, %v1702_v11  ;;  %v1711_v21 = vor.u32 1.1754944e-38, %v1710_v14  ;;  %v1673_v3 = vsub.f32 1.0, %v1672_v25 }
 0x31d   : > { %v1798_v22 = vsel %vm479_vm1, 0.0, %v1797_v39  ;;  %v1801_v24 = vrot.slane %v1792_v15, 4  ;;  %v1804_v23 = vsel %vm479_vm1, 0.0, %v1803_v18  ;;  %v1861_v17 = vsel %vm479_vm1, %v1799_v9, %v1780_v53 }
 0x31e   : > { %v1867_v29 = vsel %vm479_vm1, %v1866_v19, %v1798_v22  ;;  %v1707_v31 = vsel %vm1706_vm9, %v3350_v26, %v1703_v20  ;;  %v1865_v61 = vperm.slane %v1861_v17, %v2921_v40  ;;  %v1674_v34 = vmul.f32 %v2423_v10, %v1673_v3 }
 0x31f   : > { %v1802_v33 = vsel %vm479_vm1, 0.0, %v1801_v24  ;;  %v1871_v0 = vperm.slane %v1867_v29, %v2921_v40  ;;  %v1712_v35 = vsel %vm1709_vm8, %v1711_v21, %v1707_v31  ;;  %v1872_v36 = vsel %vm479_vm1, %v1803_v18, %v1792_v15 }
 0x320   : > { %v1877_v55 = vrot.slane %v1804_v23, 4  ;;  %v1746_v37 = vmul.f32 %v1712_v35, %v1626_v49  ;;  %v1876_v32 = vperm.slane %v1872_v36, %v2921_v40  ;;  %v1885_v41 = vrot.slane %v1865_v61, 4 }
 0x321   : > { %v1883_v42 = vrot.slane %v1871_v0, 4  ;;  %v1675_v43 = vadd.f32 %v2423_v10, %v1674_v34  ;;  %vm1681_vm10 = vcmp.eq.f32.partialorder %v1680_v30, 8.507059e+37  ;;  %v1683_v44 = vor.u32 1.1754944e-38, %v1682_v7 }
 0x322   : > { %v1878_v26 = vsel %vm479_vm1, %v1877_v55, %v1802_v33  ;;  %v1805_v6 = vrot.slane %v1746_v37, 4  ;;  %v1808_v45 = vsel %vm479_vm1, %v1746_v37, %v1807_v5  ;;  %v1886_v47 = vsel %vm479_vm1, %v1871_v0, %v1885_v41 }
 0x323   : > { %v1882_v46 = vperm.slane %v1878_v26, %v2921_v40  ;;  %v1817_v28 = vrot.slane %v3401_v13, 4  ;;  %v1679_v50 = vsel %vm1678_vm11, %v2423_v10, %v1675_v43  ;;  %v1894_v52 = vperm.slane %v1886_v47, %v2932_v58 }
 0x324   : > { %v1897_v4 = vrot.slane %v1876_v32, 4  ;;  %v1684_v51 = vsel %vm1681_vm10, %v1683_v44, %v1679_v50  ;;  %v1806_v49 = vsel %vm479_vm1, %v1805_v6, %v3379_v48  ;;  %v1884_v38 = vsel %vm479_vm1, %v1883_v42, %v1865_v61 }
 0x325   : > { %v1895_v56 = vrot.slane %v1882_v46, 4  ;;  %v1744_v57 = vmul.f32 %v1684_v51, %v3376_v54  ;;  %v1812_v62 = vperm.slane %v1806_v49, %v2921_v40  ;;  %v1816_v8 = vperm.slane %v1808_v45, %v2921_v40 }
 0x326   : > { %v1898_v59 = vsel %vm479_vm1, %v1882_v46, %v1897_v4  ;;  %v1913_v7 = vrot.slane %v1894_v52, 4  ;;  %v1890_v60 = vperm.slane %v1884_v38, %v2932_v58  ;;  %vm1997_vm12 = vcmask 195584  }
 0x327   : > { %v1906_v30 = vperm.slane %v1898_v59, %v2932_v58  ;;  %v1896_v27 = vsel %vm479_vm1, %v1895_v56, %v1876_v32  ;;  %v1818_v48 = vsel %vm479_vm1, %v1817_v28, %v1744_v57  ;;  %v1819_v63 = vrot.slane %v1744_v57, 4 }
 0x328   : > { %v1831_v1 = vrot.slane %v1812_v62, 4  ;;  %v1902_v53 = vperm.slane %v1896_v27, %v2932_v58  ;;  %v1824_v54 = vperm.slane %v1818_v48, %v2921_v40  ;;  %v1909_v5 = vrot.slane %v1890_v60, 4  ;;  %v2004_v48 = vld [vmem:[#allocation10 + $0x78] sm:$0xff] }
 0x329   : > { %v1914_v2 = vsel %vm479_vm1, %v1906_v30, %v1913_v7  ;;  %v1911_v9 = vrot.slane %v1906_v30, 4  ;;  %v1820_v10 = vsel %vm479_vm1, %v3401_v13, %v1819_v63  ;;  %v1843_v12 = vrot.slane %v1816_v8, 4  ;;  %v2003_v63 = vld [vmem:[#allocation10 + $0x70] sm:$0xff]  ;;  %2025 = vmatpush.msra.mxu3 %v2004_v48 }
 0x32a   : > { %1987 = vrot.lane.b32.xlu2 %v1914_v2, %s2675_s29  ;;  %v1907_v11 = vrot.slane %v1902_v53, 4  ;;  %v1828_v14 = vperm.slane %v1820_v10, %v2921_v40  ;;  %v1829_v15 = vrot.slane %v1824_v54, 4  ;;  %v1832_v39 = vsel %vm479_vm1, %v1824_v54, %v1831_v1  ;;  %v2001_v1 = vld [vmem:[#allocation10 + $0x60] sm:$0xff] }
 0x32b   : > { %v1912_v16 = vsel %vm479_vm1, %v1911_v9, %v1894_v52  ;;  %v1840_v18 = vperm.slane %v1832_v39, %v2932_v58  ;;  %v1910_v19 = vsel %vm479_vm1, %v1902_v53, %v1909_v5  ;;  %2026 = vmatpush.msra.mxu3 %v2003_v63 }
 0x32c   : > { %1979 = vrot.lane.b32.xlu1 %v1912_v16, %s2676_s13  ;;  %v3457_v13 = vsel %vm479_vm1, %v1907_v11, %v1890_v60  ;;  %v1841_v25 = vrot.slane %v1828_v14, 4  ;;  %v1830_v20 = vsel %vm479_vm1, %v1829_v15, %v1812_v62  ;;  %v1844_v21 = vsel %vm479_vm1, %v1828_v14, %v1843_v12  ;;  %1971 = vrot.lane.b32.xlu0 %v1910_v19, %s2677_s8 }
 0x32d   : > { %v1836_v22 = vperm.slane %v1830_v20, %v2932_v58  ;;  %v1852_v24 = vperm.slane %v1844_v21, %v2932_v58  ;;  %v1855_v3 = vrot.slane %v1840_v18, 4  ;;  %v2375_v18 = vld [vmem:[#allocation12 + $0x3] ss:$0 sm:$0xff] }
 0x32e   : > { %v1842_v23 = vsel %vm479_vm1, %v1841_v25, %v1816_v8 }
 0x32f   : > { %v1848_v17 = vperm.slane %v1842_v23, %v2932_v58  ;;  %v1859_v29 = vrot.slane %v1852_v24, 4  ;;  %v1853_v31 = vrot.slane %v1836_v22, 4  ;;  %v1856_v33 = vsel %vm479_vm1, 0.0, %v1855_v3 }
 0x330   : > { %v1915_v61 = vsel %vm479_vm1, %v1855_v3, %v1836_v22  ;;  %v1920_v0 = vrot.slane %v1856_v33, 4 }
 0x331   : > { %v1857_v34 = vrot.slane %v1848_v17, 4  ;;  %v1860_v35 = vsel %vm479_vm1, 0.0, %v1859_v29  ;;  %v1854_v36 = vsel %vm479_vm1, 0.0, %v1853_v31  ;;  %v1919_v55 = vperm.slane %v1915_v61, %v2921_v40 }
 0x332   : > { %v1931_v37 = vrot.slane %v1860_v35, 4  ;;  %v1921_v32 = vsel %vm479_vm1, %v1920_v0, %v1854_v36  ;;  %v1926_v41 = vsel %vm479_vm1, %v1859_v29, %v1848_v17 }
 0x333   : > { %v1858_v42 = vsel %vm479_vm1, 0.0, %v1857_v34  ;;  %v1925_v43 = vperm.slane %v1921_v32, %v2921_v40  ;;  %v1930_v44 = vperm.slane %v1926_v41, %v2921_v40  ;;  %v1939_v26 = vrot.slane %v1919_v55, 4 }
 0x334   : > { %v1932_v6 = vsel %vm479_vm1, %v1931_v37, %v1858_v42 }
 0x335   : > { %v1936_v45 = vperm.slane %v1932_v6, %v2921_v40  ;;  %v1951_v46 = vrot.slane %v1930_v44, 4  ;;  %v1937_v47 = vrot.slane %v1925_v43, 4  ;;  %v1940_v28 = vsel %vm479_vm1, %v1925_v43, %v1939_v26 }
 0x336   : > { %v1948_v56 = vperm.slane %v1940_v28, %v2932_v58 }
 0x337   : > { %v1952_v50 = vsel %vm479_vm1, %v1936_v45, %v1951_v46  ;;  %v1938_v52 = vsel %vm479_vm1, %v1937_v47, %v1919_v55  ;;  %v1949_v4 = vrot.slane %v1936_v45, 4 }
 0x338   : > { %v1960_v51 = vperm.slane %v1952_v50, %v2932_v58  ;;  %v1944_v49 = vperm.slane %v1938_v52, %v2932_v58  ;;  %v1967_v60 = vrot.slane %v1948_v56, 4 }
 0x339   : > { %v1950_v38 = vsel %vm479_vm1, %v1949_v4, %v1930_v44 }
 0x33a   : > { %v1965_v57 = vrot.slane %v1960_v51, 4  ;;  %v1956_v40 = vperm.slane %v1950_v38, %v2932_v58  ;;  %v1963_v62 = vrot.slane %v1944_v49, 4  ;;  %v1968_v27 = vsel %vm479_vm1, %v1960_v51, %v1967_v60  ;;  %v2002_v58 = vld [vmem:[#allocation10 + $0x68] sm:$0xff] }
 0x33b   : > { %2027 = vmatpush.msra.mxu3 %v2002_v58 }
 0x33c   : > { %v1966_v8 = vsel %vm479_vm1, %v1965_v57, %v1948_v56  ;;  %v1961_v59 = vrot.slane %v1956_v40, 4  ;;  %v1964_v30 = vsel %vm479_vm1, %v1956_v40, %v1963_v62 }
 0x33d   : > { %1981 = vrot.lane.b32.xlu1 %v1966_v8, %s2676_s13  ;;  %1973 = vrot.lane.b32.xlu0 %v1964_v30, %s2677_s8 }
 0x33e   : > { %v1962_v7 = vsel %vm479_vm1, %v1961_v59, %v1944_v49  ;;  %2028 = vmatpush.msra.mxu3 %v2001_v1 }
 0x345   : > { %1989 = vrot.lane.b32.xlu0 %v1968_v27, %s2675_s29 }
 0x384   : > { %v1988_v9 = vpop.permute.xlu2 %1987 }
 0x39e   : > { %v1980_v53 = vpop.permute.xlu1 %1979  ;;  %v1972_v54 = vpop.permute.xlu0 %1971 }
 0x39f   : > { %v1993_v2 = vsel %vm699_vm2, %v3457_v13, %v1972_v54 }
 0x3a0   : > { %v1995_v5 = vsel %vm1392_vm3, %v1993_v2, %v1980_v53 }
 0x3a1   : > { %v1998_v10 = vsel %vm1997_vm12, %v1995_v5, %v1988_v9 }
 0x3a2   : > { %2257 = vmatmul.msk.f32.vlgmr.msra.gmra.mxu3 %vm392_vm0, %v1998_v10 }
 0x3af   : > { %v1974_v12 = vpop.permute.xlu0 %1973  ;;  %v1982_v11 = vpop.permute.xlu1 %1981 }
 0x3b0   : > { %v1994_v14 = vsel %vm699_vm2, %v1962_v7, %v1974_v12 }
 0x3b1   : > { %v1996_v39 = vsel %vm1392_vm3, %v1994_v14, %v1982_v11 }
 0x3b7   : > { %v1990_v15 = vpop.permute.xlu0 %1989 }
 0x3b8   : > { %v1999_v16 = vsel %vm1997_vm12, %v1996_v39, %v1990_v15 }
 0x3b9   : > { %2258 = vmatmul.msk.f32.gmra.mxu3 %vm392_vm0, %v1999_v16 }
 0x425   : > { %v2030_v19 = vpop.f32.mrf.mxu3 }
 0x426   : > { %v2031_v13 = vadd.f32 %v2375_v18, %v2030_v19 }
 0x428   : > { %2036 = vst.msk [vmem:[%s374_s11] sm:$0xff] %vm392_vm0, %v2031_v13 }
 0x43c   : > { %v2033_v25 = vpop.f32.mrf.mxu3 }
 0x43d   : > { %v2034_v20 = vadd.f32 %v2375_v18, %v2033_v25 }
 0x43f   : > { %2037 = vst.msk [vmem:[%s374_s11 + $0x8] sm:$0xff] %vm392_vm0, %v2034_v20 }
 0x440   : > { %2601 = shalt.err (!%p2598_p0)
}
 0x441   : > { %s2678_s1 = smov 128  }
 0x442   : > { %2282 = dma.vmem_to_hbm [thread:$0]  (%p2789_p5), %s2054_s10, 256, %s2056_s9, %s2039_s23, %s2678_s1, %s2678_s1, %s2677_s8  }
 0x443 PF: > { %s3590_s6 = sld [smem:[#allocation18_spill]]  ;;  %p2302_p3 = pnand %p2210_p11, %p2754_p6 }
 0x444   : > { %s3592_s17 = sld [smem:[#allocation21_spill]] }
 0x445   : > { %p2303_p7 = pneg %p2302_p3 }
 0x449   : > { %s2070_s24 = sand.u32 1, %s3590_s6  }
 0x44a   : > { %s2071_s26 = scalar_lea.sflag [#allocation6], %s2070_s24 }
 0x44b   : > { %2639 = dma.done.wait (%p2303_p7), %s2071_s26, 256  }
 0x44c   : > { %2641 = vsyncadd (%p2303_p7), %s2071_s26, 4294967040  ;;  %s25_s23 = sadd.s32 1, %s3592_s17   ;;  %s3593_s25 = sld [smem:[#allocation19_spill]] }
 0x44d   : > { %p22_p9 = scmp.ge.s32.totalorder %s25_s23, 4   ;;  %s3594_s20 = sld [smem:[#allocation24_spill]] }
 0x44e   : > { %s3595_s21 = sld [smem:[#allocation20_spill]]  ;;  %s3597_s18 = smov %s2648_s19 }
 0x44f   : > { %s3596_s22 = sld [smem:[#allocation23_spill]]  ;;  %24 = sbr.rel (!%p22_p9) target bundleno = 12 (0xc), region = 124 }
 0x452   : > { %s3598_s19 = smov %s3593_s25 }
 0x454   :  { %2077 = vsyncpa [#allocation5], 1 }
 0x455   :  { %2079 = vsyncpa [#allocation5 + $0x1], 1 }
 0x456   :  { %2080 = vsyncpa [#allocation8], 1 }
 0x457   :  { %2082 = vsyncpa [#allocation8 + $0x1], 1 }
 0x458   :  { %2083 = vsyncpa [#allocation11], 1 }
 0x459   :  { %2084 = vsyncpa [#allocation6], 1 }
 0x45a   :  { %2086 = vsyncpa [#allocation6 + $0x1], 1 }

// kernel: tpu_custom_call.1
= control target key start
LH: loop header
LB: loop body
LE: loop exit
PB: predicated region body
PF: predicated region fallthrough
CT: control target
= control target key end

     0   :  { %s3542_s0 = inlined_call_operand.hbm [shape: f32[2,16,32], index: 0, kind: input, shape index: {}]   ;;  %s3543_s1 = inlined_call_operand.hbm [shape: f32[2,16,32], index: 1, kind: input, shape index: {}]   ;;  %s3544_s2 = inlined_call_operand.hbm [shape: f32[2,16,32], index: 2, kind: input, shape index: {}]   ;;  %s3545_s3 = inlined_call_operand.hbm [shape: f32[4,32,32], index: 3, kind: input, shape index: {}]   ;;  %s3546_s4 = inlined_call_operand.hbm [shape: f32[4,32], index: 4, kind: input, shape index: {}]   ;;  %s3547_s5 = inlined_call_operand.hbm [shape: f32[2,16,32], index: 5, kind: output, shape index: {}]  }
   0x1   :  { %3559 = sst [smem:[#allocation25_spill]] %s3543_s1 }
   0x2   :  { %3560 = sst [smem:[#allocation26_spill]] %s3545_s3 }
   0x3   :  { %10 = vsyncpa [#allocation5], 0 }
   0x4   :  { %12 = vsyncpa [#allocation5 + $0x1], 0 }
   0x5   :  { %13 = vsyncpa [#allocation8], 0 }
   0x6   :  { %15 = vsyncpa [#allocation8 + $0x1], 0 }
   0x7   :  { %16 = vsyncpa [#allocation11], 0 }
   0x8   :  { %17 = vsyncpa [#allocation6], 0 }
   0x9   :  { %19 = vsyncpa [#allocation6 + $0x1], 0  ;;  %s2709_s18 = smov 0   ;;  %s2711_s19 = smov 0  }
   0xa   :  { %s2713_s20 = smov 0   ;;  %s2715_s21 = smov 0  }
   0xb   :  { %s2717_s22 = smov 0   ;;  %s2719_s23 = smov 0  }
   0xc LB: > { %3561 = sst [smem:[#allocation18_spill]] %s2644_s18  ;;  %s2740_s24 = sadd.s32 4294967295, %s2664_s23   ;;  %s2664_s23 = sphi %s2719_s23, %s25_s23   ;;  %s2660_s22 = sphi %s2717_s22, %s3596_s22   ;;  %s2656_s21 = sphi %s2715_s21, %s3595_s21   ;;  %s2652_s20 = sphi %s2713_s20, %s3594_s20   ;;  %s2648_s19 = sphi %s2711_s19, %s3598_s19   ;;  %s2644_s18 = sphi %s2709_s18, %s3597_s18  }
   0xd   : > { %3562 = sst [smem:[#allocation19_spill]] %s2652_s20  ;;  %s2206_s25 = sadd.s32 4294967294, %s2664_s23  }
   0xe   : > { %3563 = sst [smem:[#allocation20_spill]] %s2660_s22  ;;  %p59_p0 = scmp.ne.s32.totalorder %s2648_s19, %s2644_s18 }
   0xf   : > { %3564 = sst [smem:[#allocation21_spill]] %s2664_s23  ;;  %p60_p1 = scmp.eq.s32.totalorder %s2740_s24, 0 }
  0x10   : > { %p179_p2 = scmp.eq.s32.totalorder %s2740_s24, 1  ;;  %p185_p3 = scmp.eq.s32.totalorder %s2206_s25, 1 }
  0x11   : > { %p2749_p4 = por %p60_p1, %p59_p0  ;;  %p2207_p5 = scmp.ge.s32.totalorder %s2664_s23, 1 }
  0x12   : > { %p2754_p6 = por %p185_p3, %p59_p0  ;;  %p192_p7 = scmp.lt.s32.totalorder %s2664_s23, 3 }
  0x13   : > { %s3568_s3 = sld [smem:[#allocation26_spill]]  ;;  %s2666_s7 = smov [#allocation10]  }
  0x14   : > { %s3566_s27 = scalar_select %p2754_p6, 1, 0 }
  0x15   : > { %p2762_p8 = pnand %p2207_p5, %p192_p7  ;;  %s205_s8 = sshll.u32 %s2666_s7, 4  ;;  %s206_s8 = int_to_ptr.vmem [resolvable:$true] %s205_s8 }
  0x16   : > { %3567 = sst [smem:[#allocation22_spill]] %s3566_s27  ;;  %p2210_p11 = scmp.ge.s32.totalorder %s2664_s23, 2 }
  0x17   : > { %p2284_p9 = pneg %p2762_p8  ;;  %s3548_s10 = smov 128  }
  0x18   : > { %s3550_s11 = smov 8   ;;  %s37_s12 = sadd.s32 1, %s2660_s22 }
  0x19   : > { %s203_s30 = sshll.u32 %s3568_s3, 4  ;;  %p2770_p10 = pnand %p2284_p9, %p60_p1  ;;  %s204_s30 = int_to_ptr.hbm [resolvable:$true] %s203_s30 }
  0x1a   : > { %p39_p12 = scmp.ge.s32.totalorder %s37_s12, 2  ;;  %s46_s13 = sadd.s32 1, %s2652_s20 }
  0x1b   : > { %2287 = dma.hbm_to_vmem [thread:$0]  (!%p2770_p10), %s204_s30, 2048, %s206_s8, [#allocation11], %s3548_s10, %s3548_s10, %s3550_s11  }
  0x1c   : > { %p53_p13 = scmp.ne.s32.totalorder %s2652_s20, %s2648_s19  ;;  %p54_p0 = scmp.eq.s32.totalorder %s2664_s23, 0 }
  0x1d   : > { %s3600_s12 = smov (%p39_p12, %s37_s12), 0  ;;  %p2307_p7 = scmp.lt.s32.totalorder %s2664_s23, 2 }
  0x1e   : > { %3571 = sst [smem:[#allocation23_spill]] %s3600_s12  ;;  %p55_p3 = por %p54_p0, %p53_p13 }
  0x1f   : > { %p2789_p5 = por %p179_p2, %p53_p13  ;;  %s41_s15 = ssub.s32 %s2660_s22, %s3600_s12 }
  0x20   : > { %p44_p9 = scmp.eq.s32.totalorder %s41_s15, 0  ;;  %s231_s16 = sand.u32 1, %s2652_s20  }
  0x21   : > { %s2797_s17 = sshll.u32 %s231_s16, 4  ;;  %s2800_s25 = sshll.u32 %s2660_s22, 4 }
  0x22   : > { %s2803_s28 = scalar_select %p44_p9, %s2652_s20, %s46_s13  }
  0x23   : > { %p2805_p12 = pnand %p2307_p7, %p55_p3  ;;  %s255_s30 = sand.u32 1, %s2664_s23  }
  0x24   : > { %3573 = sst [smem:[#allocation24_spill]] %s2803_s28  ;;  %s259_s11 = scalar_lea.vmem [#allocation7], %s2797_s17 }
  0x25   : > { %s3575_s1 = sld [smem:[#allocation25_spill]]  ;;  %s267_s3 = sshll.u32 %s259_s11, 4  ;;  %s268_s3 = int_to_ptr.vmem [resolvable:$true] %s267_s3 }
  0x26   : > { %s256_s13 = scalar_lea.sflag [#allocation8], %s255_s30  ;;  %s3576_s12 = smov 8  }
  0x27   : > { %s3577_s22 = smov 128   ;;  %s218_s23 = sshll.u32 %s3546_s4, 4  ;;  %s219_s23 = int_to_ptr.hbm [resolvable:$true] %s218_s23 }
  0x28   : > { %s2669_s7 = smov [#allocation12]   ;;  %s235_s27 = scalar_lea.vmem [#allocation4], %s2797_s17 }
  0x29   : > { %s220_s8 = sshll.u32 %s2669_s7, 4  ;;  %s245_s18 = sshll.u32 %s235_s27, 4  ;;  %s221_s8 = int_to_ptr.vmem [resolvable:$true] %s220_s8  ;;  %s246_s18 = int_to_ptr.vmem [resolvable:$true] %s245_s18 }
  0x2a   : > { %2290 = dma.hbm_to_vmem [thread:$0]  (!%p2770_p10), %s219_s23, 64, %s221_s8, [#allocation11]  }
  0x2b   : > { %s264_s15 = scalar_lea.hbm %s3575_s1, %s2800_s25  ;;  %s286_s9 = scalar_lea.hbm %s3544_s2, %s2800_s25 }
  0x2c   : > { %s265_s10 = sshll.u32 %s264_s15, 4  ;;  %s242_s15 = scalar_lea.hbm %s3542_s0, %s2800_s25  ;;  %s266_s10 = int_to_ptr.hbm [resolvable:$true] %s265_s10 }
  0x2d   : > { %2297 = dma.hbm_to_vmem [thread:$0]  (!%p2805_p12), %s266_s10, 256, %s268_s3, %s256_s13, %s3577_s22, %s3577_s22, %s3576_s12  }
  0x2e   : > { %s243_s1 = sshll.u32 %s242_s15, 4  ;;  %s232_s3 = scalar_lea.sflag [#allocation5], %s231_s16  ;;  %s244_s1 = int_to_ptr.hbm [resolvable:$true] %s243_s1 }
  0x2f   : > { %2294 = dma.hbm_to_vmem [thread:$0]  (!%p2805_p12), %s244_s1, 256, %s246_s18, %s232_s3, %s3577_s22, %s3577_s22, %s3576_s12  }
  0x30   : > { %s287_s23 = sshll.u32 %s286_s9, 4  ;;  %s281_s28 = scalar_lea.vmem [#allocation9], %s2797_s17  ;;  %s288_s23 = int_to_ptr.hbm [resolvable:$true] %s287_s23 }
  0x31   : > { %s289_s7 = sshll.u32 %s281_s28, 4  ;;  %301 = sbr.rel (%p2762_p8) target bundleno = 1091 (0x443), region = 40  ;;  %s290_s7 = int_to_ptr.vmem [resolvable:$true] %s289_s7 }
  0x32   : > { %2300 = dma.hbm_to_vmem [thread:$0]  (!%p2805_p12), %s288_s23, 256, %s290_s7, %s256_s13, %s3577_s22, %s3577_s22, %s3576_s12  }
  0x33   : > { %s2848_s1 = sand.u32 (!%p2762_p8), 1, %s2648_s19  }
  0x34   : > { %s2851_s18 = sshll.u32 (!%p2762_p8), %s2848_s1, 4  ;;  %s304_s27 = scalar_lea.sflag (!%p2762_p8), [#allocation5], %s2848_s1 }
  0x35   : > { %s307_s16 = scalar_lea.vmem (!%p2762_p8), [#allocation4], %s2851_s18 }
  0x36   : > { %2627 = dma.done.wait (%p2749_p4), %s304_s27, 256  }
  0x37   : > { %2629 = vsyncadd (%p2749_p4), %s304_s27, 4294967040  ;;  %s313_s22 = sand.u32 1, %s2740_s24   ;;  %s317_s12 = scalar_lea.vmem [#allocation7], %s2851_s18 }
  0x38   : > { %s314_s6 = scalar_lea.sflag [#allocation8], %s313_s22 }
  0x39   : > { %2631 = dma.done.wait (%p2749_p4), %s314_s6, 512  }
  0x3a   : > { %2633 = vsyncadd (%p2749_p4), %s314_s6, 4294966784  ;;  %s327_s17 = scalar_lea.vmem [#allocation9], %s2851_s18 }
  0x3b   : > { %2635 = dma.done.wait (%p60_p1), [#allocation11], 2112  }
  0x3c   : > { %2637 = vsyncadd (%p60_p1), [#allocation11], 4294965184  ;;  %v389_v0 = vld [vmem:[#allocation10 + $0x38] sm:$0xff]  ;;  %v388_v1 = vld [vmem:[#allocation10 + $0x30] sm:$0xff]  ;;  %vm392_vm0 = vcmask 261120   ;;  %s2670_s24 = smov 112  }
  0x3d   : > { %411 = vmatpush.msra.mxu0 %v389_v0  ;;  %v387_v2 = vld [vmem:[#allocation10 + $0x28] sm:$0xff]  ;;  %v961_v3 = vld [vmem:[#allocation10 + $0x18] sm:$0xff]  ;;  %v960_v4 = vld [vmem:[#allocation10 + $0x10] sm:$0xff]  ;;  %s2671_s26 = smov 104   ;;  %s2672_s25 = smov 120   ;;  %vm479_vm1 = vcmask 1047556  }
  0x3e   : > { %983 = vmatpush.msra.mxu2 %v961_v3  ;;  %v386_v5 = vld [vmem:[#allocation10 + $0x20] sm:$0xff]  ;;  %v959_v6 = vld [vmem:[#allocation10 + $0x8] sm:$0xff]  ;;  %v426_v7 = vld [vmem:[#allocation10 + $0x58] sm:$0xff]  ;;  %v2673_v35 = vmov 1983009808   ;;  %vm699_vm2 = vcmask 64512  }
  0x3f   : > { %412 = vmatpush.msra.mxu0 %v388_v1  ;;  %v381_v8 = vld [vmem:[%s317_s12] sm:$0xff]  ;;  %447 = vmatpush.msra.mxu1 %v426_v7  ;;  %v424_v12 = vld [vmem:[#allocation10 + $0x48] sm:$0xff]  ;;  %v484_v36 = vunpack.c.l.s4 %v2673_v35  ;;  %v2674_v50 = vmov 1934713408   ;;  %vm1392_vm3 = vcmask 130048   ;;  %s2675_s29 = smov 24  }
  0x40   : > { %984 = vmatpush.msra.mxu2 %v960_v4  ;;  %v958_v9 = vld [vmem:[#allocation10] sm:$0xff]  ;;  %v425_v10 = vld [vmem:[#allocation10 + $0x50] sm:$0xff]  ;;  %v382_v15 = vld [vmem:[%s317_s12 + $0x8] sm:$0xff]  ;;  %v508_v51 = vunpack.c.l.s4 %v2674_v50  ;;  %s2676_s13 = smov 16   ;;  %s2677_s8 = smov 8  }
  0x41   : > { %413 = vmatpush.msra.mxu0 %v387_v2  ;;  %v956_v11 = vld [vmem:[%s307_s16] sm:$0xff]  ;;  %448 = vmatpush.msra.mxu1 %v425_v10  ;;  %v957_v16 = vld [vmem:[%s307_s16 + $0x8] sm:$0xff]  ;;  %v2921_v40 = vunpack.c.0.s8 %v484_v36  ;;  %s374_s11 = scalar_lea.vmem [#allocation13], %s2851_s18  ;;  %s2267_s30 = sshll.u32 %s2656_s21, 4 }
  0x42   : > { %985 = vmatpush.msra.mxu2 %v959_v6  ;;  %v423_v13 = vld [vmem:[#allocation10 + $0x40] sm:$0xff]  ;;  %v384_v17 = vld [vmem:[%s327_s17 + $0x8] sm:$0xff]  ;;  %v2932_v58 = vunpack.c.0.s8 %v508_v51  ;;  %s2052_s20 = scalar_lea.hbm %s3547_s5, %s2267_s30  ;;  %s2053_s10 = sshll.u32 %s374_s11, 4  ;;  %s2054_s10 = int_to_ptr.vmem [resolvable:$true] %s2053_s10 }
  0x43   : > { %414 = vmatpush.msra.mxu0 %v386_v5  ;;  %449 = vmatpush.msra.mxu1 %v424_v12  ;;  %v383_v14 = vld [vmem:[%s327_s17] sm:$0xff]  ;;  %s2055_s9 = sshll.u32 %s2052_s20, 4  ;;  %s2039_s23 = scalar_lea.sflag [#allocation6], %s2848_s1  ;;  %s2056_s9 = int_to_ptr.hbm [resolvable:$true] %s2055_s9 }
  0x44   : > { %2227 = vmatmul.msk.f32.vlgmr.msra.gmra.mxu0 %vm392_vm0, %v381_v8  ;;  %986 = vmatpush.msra.mxu2 %v958_v9  ;;  %v2372_v18 = vld [vmem:[#allocation12 + $0x1] ss:$0 sm:$0xff]  ;;  %v2373_v24 = vld [vmem:[#allocation12] ss:$0 sm:$0xff]  ;;  %v2374_v28 = vld [vmem:[#allocation12 + $0x2] ss:$0 sm:$0xff] }
  0x45   : > { %2231 = vmatmul.msk.f32.vlgmr.msra.gmra.mxu2 %vm392_vm0, %v956_v11  ;;  %450 = vmatpush.msra.mxu1 %v423_v13  ;;  %s2588_s28 = sshra.s32 %s2056_s9, 4  ;;  %s2594_s27 = scalar_lea.hbm %s3547_s5, 32  ;;  %s2589_s28 = int_to_ptr.hbm [resolvable:$true] %s2588_s28 }
  0x46   : > { %2229 = vmatmul.msk.f32.vlgmr.msra.gmra.mxu1 %vm392_vm0, %v383_v14  ;;  %s2590_s7 = scalar_lea.hbm %s2589_s28, 16  ;;  %p2595_p8 = scmp.lt.s32.totalorder %s2589_s28, %s3547_s5 }
  0x47   : > { %p2591_p1 = scmp.ne.s32.totalorder %s2589_s28, %s2590_s7  ;;  %p2596_p10 = scmp.lt.s32.totalorder %s2594_s27, %s2590_s7 }
  0x49   : > { %p2592_p2 = pnand %p2591_p1, %p2789_p5  ;;  %p2597_p13 = por %p2596_p10, %p2595_p8 }
  0x4b   : > { %p2593_p4 = pneg %p2592_p2 }
  0x4c   : > { %2228 = vmatmul.msk.f32.gmra.mxu0 %vm392_vm0, %v382_v15 }
  0x4d   : > { %2232 = vmatmul.msk.f32.gmra.mxu2 %vm392_vm0, %v957_v16  ;;  %p2598_p0 = pnand %p2597_p13, %p2593_p4 }
  0x4e   : > { %2230 = vmatmul.msk.f32.gmra.mxu1 %vm392_vm0, %v384_v17 }
  0xc1   : > { %v416_v19 = vpop.f32.mrf.mxu0 }
  0xc2   : > { %v417_v20 = vadd.f32 %v2372_v18, %v416_v19 }
  0xc3   : > { %v452_v29 = vpop.f32.mrf.mxu1 }
  0xc4   : > { %466 = vrot.lane.b32.xlu2 %v417_v20, %s2670_s24  ;;  %v2907_v30 = vadd.f32 %v2374_v28, %v452_v29  ;;  %v481_v38 = vrot.slane %v417_v20, 4 }
  0xc8   : > { %v988_v23 = vpop.f32.mrf.mxu2 }
  0xc9   : > { %v419_v21 = vpop.f32.mrf.mxu0  ;;  %v2893_v25 = vadd.f32 %v2373_v24, %v988_v23 }
  0xca   : > { %v2889_v22 = vadd.f32 %v2372_v18, %v419_v21 }
  0xcb   : > { %v455_v31 = vpop.f32.mrf.mxu1  ;;  %v1017_v61 = vrot.slane %v2893_v25, 4 }
  0xcc   : > { %474 = vrot.lane.b32.xlu1 %v2889_v22, %s2671_s26  ;;  %462 = vrot.lane.b32.xlu0 %v2889_v22, %s2672_s25  ;;  %v2910_v32 = vadd.f32 %v2374_v28, %v455_v31  ;;  %v537_v56 = vrot.slane %v2889_v22, 4 }
  0xcd   : > { %472 = vrot.lane.b32.xlu2 %v417_v20, %s2671_s26 }
  0xd0   : > { %v991_v26 = vpop.f32.mrf.mxu2 }
  0xd1   : > { %v2898_v27 = vadd.f32 %v2373_v24, %v991_v26 }
  0xd3   : > { %v1073_v62 = vrot.slane %v2898_v27, 4 }
  0xd4   : > { %468 = vrot.lane.b32.xlu0 %v2889_v22, %s2670_s24  ;;  %460 = vrot.lane.b32.xlu1 %v417_v20, %s2672_s25 }
  0xd5   : > { %1008 = vrot.lane.b32.xlu2 %v2893_v25, %s2671_s26 }
  0xdc   : > { %996 = vrot.lane.b32.xlu0 %v2893_v25, %s2672_s25  ;;  %1002 = vrot.lane.b32.xlu1 %v2893_v25, %s2670_s24 }
  0xdd   : > { %1010 = vrot.lane.b32.xlu2 %v2898_v27, %s2671_s26 }
  0xe4   : > { %998 = vrot.lane.b32.xlu0 %v2898_v27, %s2672_s25  ;;  %1004 = vrot.lane.b32.xlu1 %v2898_v27, %s2670_s24 }
  0xe5   : > { %710 = vrot.lane.b32.xlu2 %v2907_v30, %s2672_s25 }
  0xec   : > { %712 = vrot.lane.b32.xlu0 %v2910_v32, %s2672_s25  ;;  %718 = vrot.lane.b32.xlu1 %v2910_v32, %s2670_s24 }
  0xed   : > { %722 = vrot.lane.b32.xlu2 %v2907_v30, %s2671_s26 }
  0xf4   : > { %716 = vrot.lane.b32.xlu0 %v2907_v30, %s2670_s24  ;;  %724 = vrot.lane.b32.xlu1 %v2910_v32, %s2671_s26 }
 0x11e   : > { %v467_v33 = vpop.permute.xlu2 %466 }
 0x11f   : > { %v478_v37 = vrot.slane %v467_v33, 4  ;;  %v482_v43 = vsel %vm479_vm1, %v467_v33, %v481_v38 }
 0x120   : > { %v490_v48 = vperm.slane %v482_v43, %v2921_v40 }
 0x121   : > { %v480_v46 = vsel %vm479_vm1, %v478_v37, %v417_v20 }
 0x122   : > { %v486_v52 = vperm.slane %v480_v46, %v2921_v40  ;;  %v517_v57 = vrot.slane %v490_v48, 4 }
 0x124   : > { %v505_v3 = vrot.slane %v486_v52, 4 }
 0x127   : > { %v473_v34 = vpop.permute.xlu2 %472 }
 0x128   : > { %v491_v54 = vrot.slane %v473_v34, 4 }
 0x12f   : > { %v2919_v39 = vpop.permute.xlu2 %1008 }
 0x130   : > { %v1027_v9 = vrot.slane %v2919_v39, 4 }
 0x137   : > { %v2939_v6 = vpop.permute.xlu2 %1010 }
 0x138   : > { %v1083_v17 = vrot.slane %v2939_v6, 4 }
 0x13e   : > { %v475_v41 = vpop.permute.xlu1 %474  ;;  %v463_v42 = vpop.permute.xlu0 %462 }
 0x13f   : > { %v547_v44 = vrot.slane %v475_v41, 4  ;;  %v549_v45 = vrot.slane %v463_v42, 4 }
 0x141   : > { %v550_v47 = vsel %vm479_vm1, %v475_v41, %v549_v45  ;;  %v548_v49 = vsel %vm479_vm1, %v547_v44, %v463_v42 }
 0x142   : > { %v558_v53 = vperm.slane %v550_v47, %v2921_v40  ;;  %v554_v55 = vperm.slane %v548_v49, %v2921_v40 }
 0x144   : > { %v571_v4 = vrot.slane %v558_v53, 4  ;;  %v559_v8 = vrot.slane %v554_v55, 4 }
 0x146   : > { %v469_v59 = vpop.permute.xlu0 %468  ;;  %v461_v60 = vpop.permute.xlu1 %460 }
 0x147   : > { %v535_v63 = vrot.slane %v469_v59, 4  ;;  %v538_v0 = vsel %vm479_vm1, %v469_v59, %v537_v56  ;;  %v492_v1 = vsel %vm479_vm1, %v491_v54, %v461_v60  ;;  %v493_v2 = vrot.slane %v461_v60, 4 }
 0x148   : > { %v546_v5 = vperm.slane %v538_v0, %v2921_v40  ;;  %v498_v7 = vperm.slane %v492_v1, %v2921_v40 }
 0x149   : > { %v536_v10 = vsel %vm479_vm1, %v535_v63, %v2889_v22  ;;  %v494_v11 = vsel %vm479_vm1, %v473_v34, %v493_v2 }
 0x14a   : > { %v542_v12 = vperm.slane %v536_v10, %v2921_v40  ;;  %v572_v13 = vsel %vm479_vm1, %v571_v4, %v546_v5  ;;  %v573_v14 = vrot.slane %v546_v5, 4  ;;  %v502_v15 = vperm.slane %v494_v11, %v2921_v40 }
 0x14b   : > { %v578_v16 = vperm.slane %v572_v13, %v2932_v58  ;;  %v503_v18 = vrot.slane %v498_v7, 4  ;;  %v506_v19 = vsel %vm479_vm1, %v498_v7, %v505_v3 }
 0x14c   : > { %v560_v20 = vsel %vm479_vm1, %v559_v8, %v542_v12  ;;  %v561_v21 = vrot.slane %v542_v12, 4  ;;  %v574_v22 = vsel %vm479_vm1, %v558_v53, %v573_v14  ;;  %v514_v23 = vperm.slane %v506_v19, %v2932_v58 }
 0x14d   : > { %v566_v24 = vperm.slane %v560_v20, %v2932_v58  ;;  %v582_v26 = vperm.slane %v574_v22, %v2932_v58  ;;  %v587_v28 = vrot.slane %v578_v16, 4  ;;  %v504_v29 = vsel %vm479_vm1, %v503_v18, %v486_v52 }
 0x14e   : > { %v562_v31 = vsel %vm479_vm1, %v554_v55, %v561_v21  ;;  %v510_v33 = vperm.slane %v504_v29, %v2932_v58  ;;  %v515_v34 = vrot.slane %v502_v15, 4  ;;  %v518_v35 = vsel %vm479_vm1, %v502_v15, %v517_v57  ;;  %v997_v20 = vpop.permute.xlu0 %996 }
 0x14f   : > { %v570_v36 = vperm.slane %v562_v31, %v2932_v58  ;;  %v583_v37 = vrot.slane %v566_v24, 4  ;;  %v588_v38 = vsel %vm479_vm1, 0.0, %v587_v28  ;;  %v589_v41 = vrot.slane %v582_v26, 4 }
 0x150   : > { %v516_v42 = vsel %vm479_vm1, %v515_v34, %v490_v48  ;;  %v526_v43 = vperm.slane %v518_v35, %v2932_v58  ;;  %v527_v44 = vrot.slane %v510_v33, 4  ;;  %v529_v45 = vrot.slane %v514_v23, 4 }
 0x151   : > { %v584_v46 = vsel %vm479_vm1, 0.0, %v583_v37  ;;  %v585_v47 = vrot.slane %v570_v36, 4  ;;  %v590_v49 = vsel %vm479_vm1, 0.0, %v589_v41  ;;  %v656_v50 = vsel %vm479_vm1, %v589_v41, %v578_v16 }
 0x152   : > { %v660_v51 = vperm.slane %v656_v50, %v2921_v40  ;;  %v661_v52 = vrot.slane %v590_v49, 4  ;;  %v522_v53 = vperm.slane %v516_v42, %v2932_v58  ;;  %v528_v54 = vsel %vm479_vm1, 0.0, %v527_v44 }
 0x153   : > { %v586_v48 = vsel %vm479_vm1, 0.0, %v585_v47  ;;  %v645_v55 = vsel %vm479_vm1, %v585_v47, %v566_v24  ;;  %v530_v56 = vsel %vm479_vm1, 0.0, %v529_v45  ;;  %v533_v57 = vrot.slane %v526_v43, 4  ;;  %v1003_v43 = vpop.permute.xlu1 %1002 }
 0x154   : > { %v649_v59 = vperm.slane %v645_v55, %v2921_v40  ;;  %v650_v60 = vrot.slane %v586_v48, 4  ;;  %v662_v63 = vsel %vm479_vm1, %v661_v52, %v588_v38  ;;  %v681_v0 = vrot.slane %v660_v51, 4 }
 0x155   : > { %v666_v1 = vperm.slane %v662_v63, %v2921_v40  ;;  %v531_v2 = vrot.slane %v522_v53, 4  ;;  %v534_v3 = vsel %vm479_vm1, 0.0, %v533_v57  ;;  %v591_v4 = vsel %vm479_vm1, %v529_v45, %v510_v33 }
 0x156   : > { %v651_v5 = vsel %vm479_vm1, %v650_v60, %v584_v46  ;;  %v669_v7 = vrot.slane %v649_v59, 4  ;;  %v595_v8 = vperm.slane %v591_v4, %v2921_v40  ;;  %v596_v10 = vrot.slane %v530_v56, 4 }
 0x157   : > { %v655_v11 = vperm.slane %v651_v5, %v2921_v40  ;;  %v679_v12 = vrot.slane %v666_v1, 4  ;;  %v682_v13 = vsel %vm479_vm1, %v666_v1, %v681_v0  ;;  %v532_v14 = vsel %vm479_vm1, 0.0, %v531_v2 }
 0x158   : > { %v690_v15 = vperm.slane %v682_v13, %v2932_v58  ;;  %v597_v16 = vsel %vm479_vm1, %v596_v10, %v528_v54  ;;  %v602_v18 = vsel %vm479_vm1, %v533_v57, %v522_v53  ;;  %v607_v19 = vrot.slane %v534_v3, 4 }
 0x159   : > { %v667_v21 = vrot.slane %v655_v11, 4  ;;  %v670_v22 = vsel %vm479_vm1, %v655_v11, %v669_v7  ;;  %v680_v23 = vsel %vm479_vm1, %v679_v12, %v660_v51  ;;  %v601_v24 = vperm.slane %v597_v16, %v2921_v40  ;;  %v999_v7 = vpop.permute.xlu0 %998 }
 0x15a   : > { %v678_v26 = vperm.slane %v670_v22, %v2932_v58  ;;  %v686_v28 = vperm.slane %v680_v23, %v2932_v58  ;;  %v695_v29 = vrot.slane %v690_v15, 4  ;;  %v606_v31 = vperm.slane %v602_v18, %v2921_v40 }
 0x15b   : > { %v668_v33 = vsel %vm479_vm1, %v667_v21, %v649_v59  ;;  %v608_v34 = vsel %vm479_vm1, %v607_v19, %v532_v14  ;;  %v613_v35 = vrot.slane %v601_v24, 4  ;;  %v615_v36 = vrot.slane %v595_v8, 4 }
 0x15c   : > { %v674_v37 = vperm.slane %v668_v33, %v2932_v58  ;;  %v691_v38 = vrot.slane %v686_v28, 4  ;;  %v696_v41 = vsel %vm479_vm1, %v695_v29, %v678_v26  ;;  %v697_v42 = vrot.slane %v678_v26, 4 }
 0x15d   : > { %705 = vst.msk [vmem:[#allocation2 + $0x28] sm:$0xff] %vm699_vm2, %v696_v41  ;;  %v612_v44 = vperm.slane %v608_v34, %v2921_v40  ;;  %v614_v45 = vsel %vm479_vm1, %v613_v35, %v595_v8  ;;  %v616_v46 = vsel %vm479_vm1, %v601_v24, %v615_v36  ;;  %v627_v47 = vrot.slane %v606_v31, 4  ;;  %v1005_v24 = vpop.permute.xlu1 %1004 }
 0x15e   : > { %v692_v49 = vsel %vm479_vm1, %v691_v38, %v674_v37  ;;  %v693_v50 = vrot.slane %v674_v37, 4  ;;  %v698_v51 = vsel %vm479_vm1, %v690_v15, %v697_v42  ;;  %v620_v52 = vperm.slane %v614_v45, %v2932_v58 }
 0x15f   : > { %701 = vst.msk [vmem:[#allocation2 + $0x8] sm:$0xff] %vm699_vm2, %v692_v49  ;;  %v624_v53 = vperm.slane %v616_v46, %v2932_v58  ;;  %v625_v54 = vrot.slane %v612_v44, 4  ;;  %v628_v48 = vsel %vm479_vm1, %v612_v44, %v627_v47  ;;  %v1028_v55 = vsel %vm479_vm1, %v1027_v9, %v997_v20 }
 0x160   : > { %v694_v56 = vsel %vm479_vm1, %v686_v28, %v693_v50  ;;  %707 = vst.msk [vmem:[#allocation2 + $0x38] sm:$0xff] %vm699_vm2, %v698_v51  ;;  %v636_v57 = vperm.slane %v628_v48, %v2932_v58  ;;  %v639_v59 = vrot.slane %v620_v52, 4  ;;  %v1029_v60 = vrot.slane %v997_v20, 4 }
 0x161   : > { %703 = vst.msk [vmem:[#allocation2 + $0x18] sm:$0xff] %vm699_vm2, %v694_v56  ;;  %v626_v63 = vsel %vm479_vm1, %v625_v54, %v606_v31  ;;  %v643_v0 = vrot.slane %v624_v53, 4  ;;  %v1034_v1 = vperm.slane %v1028_v55, %v2921_v40  ;;  %v1014_v2 = vrot.slane %v1003_v43, 4 }
 0x162   : > { %v632_v3 = vperm.slane %v626_v63, %v2932_v58  ;;  %v641_v4 = vrot.slane %v636_v57, 4  ;;  %v1030_v9 = vsel %vm479_vm1, %v2919_v39, %v1029_v60  ;;  %v1018_v5 = vsel %vm479_vm1, %v1003_v43, %v1017_v61 }
 0x163   : > { %v644_v8 = vsel %vm479_vm1, %v636_v57, %v643_v0  ;;  %v1038_v10 = vperm.slane %v1030_v9, %v2921_v40  ;;  %v1039_v11 = vrot.slane %v1034_v1, 4  ;;  %v1016_v12 = vsel %vm479_vm1, %v1014_v2, %v2893_v25 }
 0x164   : > { %v637_v13 = vrot.slane %v632_v3, 4  ;;  %v640_v14 = vsel %vm479_vm1, %v632_v3, %v639_v59  ;;  %v642_v15 = vsel %vm479_vm1, %v641_v4, %v624_v53  ;;  %706 = vst.msk [vmem:[#allocation2 + $0x30] sm:$0xff] %vm699_vm2, %v644_v8  ;;  %v1022_v39 = vperm.slane %v1016_v12, %v2921_v40  ;;  %v1240_v16 = vld [vmem:[#allocation2 + $0x28] sm:$0xff] }
 0x165   : > { %702 = vst.msk [vmem:[#allocation2 + $0x10] sm:$0xff] %vm699_vm2, %v640_v14  ;;  %v1051_v61 = vrot.slane %v1038_v10, 4  ;;  %v1026_v18 = vperm.slane %v1018_v5, %v2921_v40  ;;  %v1084_v19 = vsel %vm479_vm1, %v1083_v17, %v999_v7  ;;  %v1085_v25 = vrot.slane %v999_v7, 4  ;;  %2241 = vmatpush.xpose.msk.msrb.mxu1 %vm699_vm2, %v1240_v16 }
 0x166   : > { %v638_v20 = vsel %vm479_vm1, %v637_v13, %v620_v52  ;;  %704 = vst.msk [vmem:[#allocation2 + $0x20] sm:$0xff] %vm699_vm2, %v642_v15  ;;  %v1040_v21 = vsel %vm479_vm1, %v1039_v11, %v1022_v39  ;;  %v1041_v22 = vrot.slane %v1022_v39, 4  ;;  %v1090_v23 = vperm.slane %v1084_v19, %v2921_v40  ;;  %v1236_v26 = vld [vmem:[#allocation2 + $0x8] sm:$0xff] }
 0x167   : > { %700 = vst.msk [vmem:[#allocation2] sm:$0xff] %vm699_vm2, %v638_v20  ;;  %v1046_v28 = vperm.slane %v1040_v21, %v2932_v58  ;;  %v1052_v17 = vsel %vm479_vm1, %v1051_v61, %v1026_v18  ;;  %v1053_v29 = vrot.slane %v1026_v18, 4  ;;  %v1086_v31 = vsel %vm479_vm1, %v2939_v6, %v1085_v25  ;;  %2233 = vmatpush.xpose.msk.msra.mxu3 %vm699_vm2, %v1236_v26  ;;  %v1242_v33 = vld [vmem:[#allocation2 + $0x38] sm:$0xff] }
 0x168   : > { %v1042_v34 = vsel %vm479_vm1, %v1034_v1, %v1041_v22  ;;  %v1058_v35 = vperm.slane %v1052_v17, %v2932_v58  ;;  %v1094_v36 = vperm.slane %v1086_v31, %v2921_v40  ;;  %v1095_v37 = vrot.slane %v1090_v23, 4  ;;  %2245 = vmatpush.xpose.msk.msrb.mxu2 %vm699_vm2, %v1242_v33  ;;  %v1238_v38 = vld [vmem:[#allocation2 + $0x18] sm:$0xff] }
 0x169   : > { %v1050_v41 = vperm.slane %v1042_v34, %v2932_v58  ;;  %v1054_v42 = vsel %vm479_vm1, %v1038_v10, %v1053_v29  ;;  %v1063_v43 = vrot.slane %v1046_v28, 4  ;;  %v1071_v44 = vrot.slane %v1005_v24, 4  ;;  %2237 = vmatpush.xpose.msk.msrb.mxu0 %vm699_vm2, %v1238_v38 }
 0x16a   : > { %v1062_v6 = vperm.slane %v1054_v42, %v2932_v58  ;;  %v1067_v45 = vrot.slane %v1058_v35, 4  ;;  %v1107_v46 = vrot.slane %v1094_v36, 4  ;;  %v1074_v47 = vsel %vm479_vm1, %v1005_v24, %v1073_v62 }
 0x16b   : > { %v1065_v49 = vrot.slane %v1050_v41, 4  ;;  %v1072_v50 = vsel %vm479_vm1, %v1071_v44, %v2898_v27  ;;  %v1082_v51 = vperm.slane %v1074_v47, %v2921_v40  ;;  %v1241_v52 = vld [vmem:[#allocation2 + $0x30] sm:$0xff]  ;;  %v1064_v55 = vsel %vm479_vm1, 0.0, %v1063_v43 }
 0x16c   : > { %v1068_v53 = vsel %vm479_vm1, 0.0, %v1067_v45  ;;  %v1069_v54 = vrot.slane %v1062_v6, 4  ;;  %v1078_v48 = vperm.slane %v1072_v50, %v2921_v40  ;;  %2246 = vmatpush.xpose.msk.msrb.mxu2 %vm699_vm2, %v1241_v52  ;;  %v1237_v56 = vld [vmem:[#allocation2 + $0x10] sm:$0xff] }
 0x16d   : > { %v1066_v57 = vsel %vm479_vm1, 0.0, %v1065_v49  ;;  %v1108_v62 = vsel %vm479_vm1, %v1107_v46, %v1082_v51  ;;  %v1109_v59 = vrot.slane %v1082_v51, 4  ;;  %v1239_v60 = vld [vmem:[#allocation2 + $0x20] sm:$0xff]  ;;  %v1127_v27 = vsel %vm479_vm1, %v1065_v49, %v1046_v28  ;;  %2238 = vmatpush.xpose.msk.msrb.mxu0 %vm699_vm2, %v1237_v56 }
 0x16e   : > { %v1070_v63 = vsel %vm479_vm1, 0.0, %v1069_v54  ;;  %v1132_v0 = vrot.slane %v1066_v57, 4  ;;  %v1138_v1 = vsel %vm479_vm1, %v1069_v54, %v1058_v35  ;;  %v1096_v2 = vsel %vm479_vm1, %v1095_v37, %v1078_v48  ;;  %2242 = vmatpush.xpose.msk.msrb.mxu1 %vm699_vm2, %v1239_v60  ;;  %v1235_v3 = vld [vmem:[#allocation2] sm:$0xff] }
 0x16f   : > { %v1142_v4 = vperm.slane %v1138_v1, %v2921_v40  ;;  %v1143_v9 = vrot.slane %v1070_v63, 4  ;;  %v1097_v5 = vrot.slane %v1078_v48, 4  ;;  %v1102_v7 = vperm.slane %v1096_v2, %v2932_v58  ;;  %2234 = vmatpush.xpose.msk.msra.mxu3 %vm699_vm2, %v1235_v3  ;;  %v711_v2 = vpop.permute.xlu2 %710 }
 0x170   : > { %v1110_v8 = vsel %vm479_vm1, %v1094_v36, %v1109_v59  ;;  %v1114_v10 = vperm.slane %v1108_v62, %v2932_v58  ;;  %v1131_v11 = vperm.slane %v1127_v27, %v2921_v40  ;;  %v1133_v12 = vsel %vm479_vm1, %v1132_v0, %v1064_v55 }
 0x171   : > { %v1144_v13 = vsel %vm479_vm1, %v1143_v9, %v1068_v53  ;;  %v1098_v14 = vsel %vm479_vm1, %v1090_v23, %v1097_v5  ;;  %v1118_v15 = vperm.slane %v1110_v8, %v2932_v58  ;;  %v1119_v39 = vrot.slane %v1102_v7, 4 }
 0x172   : > { %v1106_v16 = vperm.slane %v1098_v14, %v2932_v58  ;;  %v1123_v61 = vrot.slane %v1114_v10, 4  ;;  %v1137_v18 = vperm.slane %v1133_v12, %v2921_v40  ;;  %v1148_v19 = vperm.slane %v1144_v13, %v2921_v40 }
 0x173   : > { %v1125_v25 = vrot.slane %v1118_v15, 4  ;;  %v1151_v20 = vrot.slane %v1131_v11, 4  ;;  %v1163_v21 = vrot.slane %v1142_v4, 4  ;;  %v1120_v22 = vsel %vm479_vm1, 0.0, %v1119_v39 }
 0x174   : > { %v1121_v24 = vrot.slane %v1106_v16, 4  ;;  %v1124_v26 = vsel %vm479_vm1, 0.0, %v1123_v61  ;;  %v1149_v28 = vrot.slane %v1137_v18, 4  ;;  %v1161_v23 = vrot.slane %v1148_v19, 4 }
 0x175   : > { %v1126_v17 = vsel %vm479_vm1, 0.0, %v1125_v25  ;;  %v1192_v29 = vsel %vm479_vm1, %v1125_v25, %v1114_v10  ;;  %v1152_v31 = vsel %vm479_vm1, %v1137_v18, %v1151_v20  ;;  %v1164_v33 = vsel %vm479_vm1, %v1148_v19, %v1163_v21  ;;  %v713_v19 = vpop.permute.xlu0 %712  ;;  %v719_v25 = vpop.permute.xlu1 %718 }
 0x176   : > { %v1122_v34 = vsel %vm479_vm1, 0.0, %v1121_v24  ;;  %v1196_v35 = vperm.slane %v1192_v29, %v2921_v40  ;;  %v1197_v36 = vrot.slane %v1126_v17, 4  ;;  %v1160_v37 = vperm.slane %v1152_v31, %v2932_v58 }
 0x177   : > { %v1172_v38 = vperm.slane %v1164_v33, %v2932_v58  ;;  %v1150_v41 = vsel %vm479_vm1, %v1149_v28, %v1131_v11  ;;  %v1162_v42 = vsel %vm479_vm1, %v1161_v23, %v1142_v4  ;;  %v1181_v43 = vsel %vm479_vm1, %v1121_v24, %v1102_v7 }
 0x178   : > { %v1198_v44 = vsel %vm479_vm1, %v1197_v36, %v1124_v26  ;;  %v1156_v6 = vperm.slane %v1150_v41, %v2932_v58  ;;  %v1168_v45 = vperm.slane %v1162_v42, %v2932_v58  ;;  %v1179_v46 = vrot.slane %v1160_v37, 4 }
 0x179   : > { %v1177_v47 = vrot.slane %v1172_v38, 4  ;;  %v1185_v49 = vperm.slane %v1181_v43, %v2921_v40  ;;  %v1186_v50 = vrot.slane %v1122_v34, 4  ;;  %v1202_v51 = vperm.slane %v1198_v44, %v2921_v40 }
 0x17a   : > { %v1173_v52 = vrot.slane %v1168_v45, 4  ;;  %v1180_v53 = vsel %vm479_vm1, %v1172_v38, %v1179_v46  ;;  %v1175_v54 = vrot.slane %v1156_v6, 4  ;;  %v1217_v48 = vrot.slane %v1196_v35, 4 }
 0x17b   : > { %v1178_v55 = vsel %vm479_vm1, %v1177_v47, %v1160_v37  ;;  %2247 = vmatmul.msk.f32.vlgmr.msrb.gmra.mxu2 %vm699_vm2, %v1180_v53  ;;  %v1187_v56 = vsel %vm479_vm1, %v1186_v50, %v1120_v22  ;;  %v1205_v57 = vrot.slane %v1185_v49, 4  ;;  %v1215_v62 = vrot.slane %v1202_v51, 4  ;;  %v723_v22 = vpop.permute.xlu2 %722 }
 0x17c   : > { %2243 = vmatmul.msk.f32.vlgmr.msrb.gmra.mxu1 %vm699_vm2, %v1178_v55  ;;  %v1174_v59 = vsel %vm479_vm1, %v1173_v52, %v1156_v6  ;;  %v1176_v60 = vsel %vm479_vm1, %v1168_v45, %v1175_v54  ;;  %v1191_v27 = vperm.slane %v1187_v56, %v2921_v40  ;;  %v1218_v63 = vsel %vm479_vm1, %v1202_v51, %v1217_v48 }
 0x17d   : > { %2235 = vmatmul.msk.f32.vlgmr.msra.gmra.mxu3 %vm699_vm2, %v1174_v59  ;;  %2239 = vmatmul.msk.f32.vlgmr.msrb.gmra.mxu0 %vm699_vm2, %v1176_v60  ;;  %v1226_v0 = vperm.slane %v1218_v63, %v2932_v58  ;;  %v1216_v1 = vsel %vm479_vm1, %v1215_v62, %v1196_v35  ;;  %v786_v13 = vrot.slane %v2910_v32, 4  ;;  %v742_v61 = vrot.slane %v711_v2, 4  ;;  %v717_v37 = vpop.permute.xlu0 %716  ;;  %v725_v38 = vpop.permute.xlu1 %724 }
 0x17e   : > { %v1206_v3 = vsel %vm479_vm1, %v1191_v27, %v1205_v57  ;;  %v1203_v4 = vrot.slane %v1191_v27, 4  ;;  %v1222_v9 = vperm.slane %v1216_v1, %v2932_v58  ;;  %v784_v20 = vrot.slane %v719_v25, 4 }
 0x17f   : > { %v1214_v5 = vperm.slane %v1206_v3, %v2932_v58  ;;  %v1231_v7 = vrot.slane %v1226_v0, 4  ;;  %v787_v21 = vsel %vm479_vm1, %v719_v25, %v786_v13  ;;  %v740_v26 = vrot.slane %v723_v22, 4 }
 0x180   : > { %v1204_v8 = vsel %vm479_vm1, %v1203_v4, %v1185_v49  ;;  %v1227_v10 = vrot.slane %v1222_v9, 4  ;;  %v785_v24 = vsel %vm479_vm1, %v784_v20, %v2910_v32  ;;  %v743_v28 = vsel %vm479_vm1, %v723_v22, %v742_v61 }
 0x181   : > { %v1210_v11 = vperm.slane %v1204_v8, %v2932_v58  ;;  %v1233_v12 = vrot.slane %v1214_v5, 4  ;;  %v1232_v14 = vsel %vm479_vm1, %v1231_v7, %v1214_v5  ;;  %v795_v23 = vperm.slane %v787_v21, %v2921_v40 }
 0x182   : > { %v751_v17 = vperm.slane %v743_v28, %v2921_v40  ;;  %v798_v29 = vrot.slane %v713_v19, 4  ;;  %v730_v31 = vrot.slane %v2907_v30, 4  ;;  %v741_v33 = vsel %vm479_vm1, %v740_v26, %v711_v2 }
 0x183   : > { %v1234_v15 = vsel %vm479_vm1, %v1226_v0, %v1233_v12  ;;  %v1229_v39 = vrot.slane %v1210_v11, 4  ;;  %v1228_v16 = vsel %vm479_vm1, %v1227_v10, %v1210_v11  ;;  %v791_v34 = vperm.slane %v785_v24, %v2921_v40 }
 0x184   : > { %2244 = vmatmul.msk.f32.gmra.mxu1 %vm699_vm2, %v1232_v14  ;;  %2248 = vmatmul.msk.f32.gmra.mxu2 %vm699_vm2, %v1234_v15  ;;  %v747_v35 = vperm.slane %v741_v33, %v2921_v40  ;;  %v822_v36 = vrot.slane %v795_v23, 4  ;;  %v764_v32 = vrot.slane %v751_v17, 4  ;;  %v728_v41 = vrot.slane %v717_v37, 4 }
 0x185   : > { %2236 = vmatmul.msk.f32.gmra.mxu3 %vm699_vm2, %v1228_v16  ;;  %v1230_v18 = vsel %vm479_vm1, %v1222_v9, %v1229_v39  ;;  %v731_v42 = vsel %vm479_vm1, %v717_v37, %v730_v31  ;;  %v796_v43 = vrot.slane %v725_v38, 4  ;;  %v799_v44 = vsel %vm479_vm1, %v725_v38, %v798_v29 }
 0x186   : > { %2240 = vmatmul.msk.f32.gmra.mxu0 %vm699_vm2, %v1230_v18  ;;  %v810_v6 = vrot.slane %v791_v34, 4  ;;  %v739_v45 = vperm.slane %v731_v42, %v2921_v40  ;;  %v807_v46 = vperm.slane %v799_v44, %v2921_v40  ;;  %v729_v47 = vsel %vm479_vm1, %v728_v41, %v2907_v30 }
 0x187   : > { %v797_v49 = vsel %vm479_vm1, %v796_v43, %v713_v19  ;;  %v752_v50 = vrot.slane %v747_v35, 4  ;;  %v735_v51 = vperm.slane %v729_v47, %v2921_v40 }
 0x188   : > { %v766_v52 = vrot.slane %v739_v45, 4  ;;  %v803_v53 = vperm.slane %v797_v49, %v2921_v40  ;;  %v820_v54 = vrot.slane %v807_v46, 4  ;;  %v823_v48 = vsel %vm479_vm1, %v807_v46, %v822_v36 }
 0x189   : > { %v765_v55 = vsel %vm479_vm1, %v764_v32, %v739_v45  ;;  %v754_v56 = vrot.slane %v735_v51, 4  ;;  %v831_v27 = vperm.slane %v823_v48, %v2932_v58  ;;  %v753_v63 = vsel %vm479_vm1, %v752_v50, %v735_v51 }
 0x18a   : > { %v808_v57 = vrot.slane %v803_v53, 4  ;;  %v811_v62 = vsel %vm479_vm1, %v803_v53, %v810_v6  ;;  %v821_v59 = vsel %vm479_vm1, %v820_v54, %v795_v23  ;;  %v759_v2 = vperm.slane %v753_v63, %v2932_v58 }
 0x18b   : > { %v819_v30 = vperm.slane %v811_v62, %v2932_v58  ;;  %v827_v60 = vperm.slane %v821_v59, %v2932_v58  ;;  %v755_v1 = vsel %vm479_vm1, %v747_v35, %v754_v56  ;;  %v767_v3 = vsel %vm479_vm1, %v751_v17, %v766_v52 }
 0x18c   : > { %v809_v0 = vsel %vm479_vm1, %v808_v57, %v791_v34  ;;  %v838_v7 = vrot.slane %v831_v27, 4  ;;  %v763_v8 = vperm.slane %v755_v1, %v2932_v58  ;;  %v771_v10 = vperm.slane %v765_v55, %v2932_v58 }
 0x18d   : > { %v815_v4 = vperm.slane %v809_v0, %v2932_v58  ;;  %v834_v9 = vrot.slane %v819_v30, 4  ;;  %v836_v5 = vrot.slane %v827_v60, 4  ;;  %v775_v11 = vperm.slane %v767_v3, %v2932_v58 }
 0x18e   : > { %v776_v12 = vrot.slane %v759_v2, 4  ;;  %v839_v39 = vsel %vm479_vm1, 0.0, %v838_v7  ;;  %v905_v18 = vsel %vm479_vm1, %v838_v7, %v827_v60  ;;  %v778_v28 = vrot.slane %v763_v8, 4 }
 0x18f   : > { %v832_v13 = vrot.slane %v815_v4, 4  ;;  %v835_v14 = vsel %vm479_vm1, 0.0, %v834_v9  ;;  %v837_v15 = vsel %vm479_vm1, 0.0, %v836_v5  ;;  %v894_v16 = vsel %vm479_vm1, %v834_v9, %v815_v4 }
 0x190   : > { %v899_v61 = vrot.slane %v835_v14, 4  ;;  %v910_v19 = vrot.slane %v839_v39, 4  ;;  %v898_v20 = vperm.slane %v894_v16, %v2921_v40  ;;  %v909_v21 = vperm.slane %v905_v18, %v2921_v40 }
 0x191   : > { %v833_v25 = vsel %vm479_vm1, 0.0, %v832_v13  ;;  %v777_v22 = vsel %vm479_vm1, 0.0, %v776_v12  ;;  %v780_v23 = vrot.slane %v771_v10, 4  ;;  %v779_v34 = vsel %vm479_vm1, 0.0, %v778_v28 }
 0x192   : > { %v900_v24 = vsel %vm479_vm1, %v899_v61, %v833_v25  ;;  %v911_v26 = vsel %vm479_vm1, %v910_v19, %v837_v15  ;;  %v918_v31 = vrot.slane %v898_v20, 4  ;;  %v930_v33 = vrot.slane %v909_v21, 4 }
 0x193   : > { %v904_v17 = vperm.slane %v900_v24, %v2921_v40  ;;  %v915_v29 = vperm.slane %v911_v26, %v2921_v40  ;;  %v781_v35 = vsel %vm479_vm1, 0.0, %v780_v23  ;;  %v782_v36 = vrot.slane %v775_v11, 4 }
 0x194   : > { %v840_v37 = vsel %vm479_vm1, %v778_v28, %v759_v2  ;;  %v845_v49 = vrot.slane %v779_v34, 4 }
 0x195   : > { %v916_v38 = vrot.slane %v904_v17, 4  ;;  %v919_v32 = vsel %vm479_vm1, %v904_v17, %v918_v31  ;;  %v928_v41 = vrot.slane %v915_v29, 4  ;;  %v931_v42 = vsel %vm479_vm1, %v915_v29, %v930_v33 }
 0x196   : > { %v927_v43 = vperm.slane %v919_v32, %v2932_v58  ;;  %v939_v44 = vperm.slane %v931_v42, %v2932_v58  ;;  %v783_v6 = vsel %vm479_vm1, 0.0, %v782_v36  ;;  %v844_v45 = vperm.slane %v840_v37, %v2921_v40 }
 0x197   : > { %v917_v46 = vsel %vm479_vm1, %v916_v38, %v898_v20  ;;  %v929_v47 = vsel %vm479_vm1, %v928_v41, %v909_v21  ;;  %v851_v50 = vsel %vm479_vm1, %v782_v36, %v771_v10  ;;  %v846_v48 = vsel %vm479_vm1, %v845_v49, %v777_v22 }
 0x198   : > { %v923_v51 = vperm.slane %v917_v46, %v2932_v58  ;;  %v935_v52 = vperm.slane %v929_v47, %v2932_v58  ;;  %v944_v53 = vrot.slane %v939_v44, 4  ;;  %v946_v54 = vrot.slane %v927_v43, 4 }
 0x199   : > { %v855_v55 = vperm.slane %v851_v50, %v2921_v40  ;;  %v856_v56 = vrot.slane %v783_v6, 4  ;;  %v864_v57 = vrot.slane %v844_v45, 4  ;;  %v850_v27 = vperm.slane %v846_v48, %v2921_v40 }
 0x19a   : > { %v940_v62 = vrot.slane %v935_v52, 4  ;;  %v942_v59 = vrot.slane %v923_v51, 4  ;;  %v945_v30 = vsel %vm479_vm1, %v944_v53, %v927_v43  ;;  %v947_v60 = vsel %vm479_vm1, %v939_v44, %v946_v54 }
 0x19b   : > { %953 = vst.msk [vmem:[#allocation3 + $0x28] sm:$0xff] %vm699_vm2, %v945_v30  ;;  %v857_v63 = vsel %vm479_vm1, %v856_v56, %v781_v35  ;;  %v876_v0 = vrot.slane %v855_v55, 4  ;;  %v862_v4 = vrot.slane %v850_v27, 4  ;;  %v865_v9 = vsel %vm479_vm1, %v850_v27, %v864_v57 }
 0x19c   : > { %v941_v1 = vsel %vm479_vm1, %v940_v62, %v923_v51  ;;  %v943_v2 = vsel %vm479_vm1, %v935_v52, %v942_v59  ;;  %955 = vst.msk [vmem:[#allocation3 + $0x38] sm:$0xff] %vm699_vm2, %v947_v60  ;;  %v861_v3 = vperm.slane %v857_v63, %v2921_v40  ;;  %v873_v5 = vperm.slane %v865_v9, %v2932_v58 }
 0x19d   : > { %949 = vst.msk [vmem:[#allocation3 + $0x8] sm:$0xff] %vm699_vm2, %v941_v1  ;;  %v863_v10 = vsel %vm479_vm1, %v862_v4, %v844_v45 }
 0x19e   : > { %951 = vst.msk [vmem:[#allocation3 + $0x18] sm:$0xff] %vm699_vm2, %v943_v2  ;;  %v874_v7 = vrot.slane %v861_v3, 4  ;;  %v877_v8 = vsel %vm479_vm1, %v861_v3, %v876_v0  ;;  %v869_v12 = vperm.slane %v863_v10, %v2932_v58  ;;  %v892_v14 = vrot.slane %v873_v5, 4 }
 0x19f   : > { %v885_v11 = vperm.slane %v877_v8, %v2932_v58 }
 0x1a0   : > { %v875_v13 = vsel %vm479_vm1, %v874_v7, %v855_v55  ;;  %v888_v16 = vrot.slane %v869_v12, 4 }
 0x1a1   : > { %v881_v15 = vperm.slane %v875_v13, %v2932_v58  ;;  %v890_v39 = vrot.slane %v885_v11, 4  ;;  %v893_v61 = vsel %vm479_vm1, %v885_v11, %v892_v14 }
 0x1a2   : > { %v1248_v18 = vld [vmem:[#allocation3 + $0x28] sm:$0xff]  ;;  %954 = vst.msk [vmem:[#allocation3 + $0x30] sm:$0xff] %vm699_vm2, %v893_v61 }
 0x1a3   : > { %v886_v19 = vrot.slane %v881_v15, 4  ;;  %v891_v25 = vsel %vm479_vm1, %v890_v39, %v873_v5  ;;  %1583 = vmatpush.msra.mxu1 %v1248_v18  ;;  %v1250_v20 = vld [vmem:[#allocation3 + $0x38] sm:$0xff]  ;;  %v889_v21 = vsel %vm479_vm1, %v881_v15, %v888_v16 }
 0x1a4   : > { %952 = vst.msk [vmem:[#allocation3 + $0x20] sm:$0xff] %vm699_vm2, %v891_v25  ;;  %v1244_v22 = vld [vmem:[#allocation3 + $0x8] sm:$0xff]  ;;  %1612 = vmatpush.msra.mxu2 %v1250_v20 }
 0x1a5   : > { %v887_v24 = vsel %vm479_vm1, %v886_v19, %v869_v12  ;;  %950 = vst.msk [vmem:[#allocation3 + $0x10] sm:$0xff] %vm699_vm2, %v889_v21  ;;  %1525 = vmatpush.msrb.mxu3 %v1244_v22  ;;  %v1246_v26 = vld [vmem:[#allocation3 + $0x18] sm:$0xff] }
 0x1a6   : > { %948 = vst.msk [vmem:[#allocation3] sm:$0xff] %vm699_vm2, %v887_v24  ;;  %1554 = vmatpush.msra.mxu0 %v1246_v26 }
 0x1a9   : > { %v1249_v28 = vld [vmem:[#allocation3 + $0x30] sm:$0xff] }
 0x1aa   : > { %1613 = vmatpush.msra.mxu2 %v1249_v28 }
 0x1ab   : > { %v1247_v23 = vld [vmem:[#allocation3 + $0x20] sm:$0xff] }
 0x1ac   : > { %v1245_v17 = vld [vmem:[#allocation3 + $0x10] sm:$0xff]  ;;  %1584 = vmatpush.msra.mxu1 %v1247_v23 }
 0x1ad   : > { %v1243_v29 = vld [vmem:[#allocation3] sm:$0xff]  ;;  %1555 = vmatpush.msra.mxu0 %v1245_v17 }
 0x1ae   : > { %1526 = vmatpush.msrb.mxu3 %v1243_v29 }
 0x1f9   : > { %v1351_v31 = vpop.f32.mrf.mxu1 }
 0x1fa   : > { %v1405_v33 = vsel %vm1392_vm3, %v1351_v31, -inf  ;;  %v1316_v38 = vpop.f32.mrf.mxu0 }
 0x1fb   : > { %1406 = vmax.xlane.f32.xlu2 %v1405_v33  ;;  %v1399_v43 = vsel %vm1392_vm3, %v1316_v38, -inf }
 0x1fe   : > { %v1386_v34 = vpop.f32.mrf.mxu2 }
 0x1ff   : > { %v1411_v35 = vsel %vm1392_vm3, %v1386_v34, -inf }
 0x200   : > { %v1281_v36 = vpop.f32.mrf.mxu3  ;;  %1412 = vmax.xlane.f32.xlu1 %v1411_v35 }
 0x201   : > { %v1393_v37 = vsel %vm1392_vm3, %v1281_v36, -inf  ;;  %v1354_v6 = vpop.f32.mrf.mxu1 }
 0x202   : > { %1394 = vmax.xlane.f32.xlu0 %v1393_v37  ;;  %v1408_v47 = vsel %vm1392_vm3, %v1354_v6, -inf }
 0x203   : > { %v1319_v45 = vpop.f32.mrf.mxu0 }
 0x204   : > { %v1402_v46 = vsel %vm1392_vm3, %v1319_v45, -inf }
 0x207   : > { %v1389_v32 = vpop.f32.mrf.mxu2 }
 0x208   : > { %v1284_v41 = vpop.f32.mrf.mxu3  ;;  %v1414_v42 = vsel %vm1392_vm3, %v1389_v32, -inf }
 0x209   : > { %1415 = vmax.xlane.f32.xlu1 %v1414_v42  ;;  %v1396_v44 = vsel %vm1392_vm3, %v1284_v41, -inf }
 0x20a   : > { %1400 = vmax.xlane.f32.xlu0 %v1399_v43  ;;  %1397 = vmax.xlane.f32.xlu2 %v1396_v44 }
 0x212   : > { %1403 = vmax.xlane.f32.xlu0 %v1402_v46  ;;  %1409 = vmax.xlane.f32.xlu2 %v1408_v47 }
 0x26e   : > { %v3229_v49 = vpop.xlane.xlu2 %1406 }
 0x26f   : > { %v1445_v50 = vsub.f32 %v1351_v31, %v3229_v49  ;;  %v1421_v24 = vsub.f32 -inf, %v3229_v49 }
 0x271   : > { %v1457_v51 = vmul.f32 1.442695, %v1445_v50  ;;  %v1433_v26 = vmul.f32 1.442695, %v1421_v24 }
 0x273   : > { %v3232_v52 = vpop.xlane.xlu1 %1412  ;;  %2376 = vpow2.f32 %v1457_v51 }
 0x274   : > { %v1447_v53 = vsub.f32 %v1386_v34, %v3232_v52  ;;  %v1423_v28 = vsub.f32 -inf, %v3232_v52 }
 0x275   : > { %v3235_v54 = vpop.xlane.xlu0 %1394 }
 0x276   : > { %v1461_v48 = vmul.f32 1.442695, %v1447_v53  ;;  %v1441_v55 = vsub.f32 %v1281_v36, %v3235_v54  ;;  %v1417_v23 = vsub.f32 -inf, %v3235_v54  ;;  %v1437_v17 = vmul.f32 1.442695, %v1423_v28 }
 0x278   : > { %v1449_v56 = vmul.f32 1.442695, %v1441_v55  ;;  %2378 = vpow2.f32 %v1461_v48  ;;  %v1425_v29 = vmul.f32 1.442695, %v1417_v23 }
 0x279   : > { %v2377_v57 = vpop.eup %2376 }
 0x27a   : > { %2380 = vpow2.f32 %v1449_v56  ;;  %2253 = vmatmul.msk.f32.vlgmr.msra.gmra.mxu1 %vm1392_vm3, %v2377_v57  ;;  %v1485_v62 = vsel %vm1392_vm3, %v2377_v57, 0.0 }
 0x27b   : > { %1486 = vadd.xlane.f32.xlu1 %v1485_v62 }
 0x27c   : > { %v1416_v59 = vpop.xlane.xlu1 %1415 }
 0x27d   : > { %v1448_v30 = vsub.f32 %v1389_v32, %v1416_v59  ;;  %v1401_v60 = vpop.xlane.xlu0 %1400  ;;  %v3240_v27 = vpop.xlane.xlu2 %1397  ;;  %v1424_v31 = vsub.f32 -inf, %v1416_v59 }
 0x27e   : > { %v1443_v63 = vsub.f32 %v1316_v38, %v1401_v60  ;;  %v1442_v0 = vsub.f32 %v1284_v41, %v3240_v27  ;;  %v2379_v1 = vpop.eup %2378  ;;  %v1419_v33 = vsub.f32 -inf, %v1401_v60  ;;  %v1418_v35 = vsub.f32 -inf, %v3240_v27 }
 0x27f   : > { %v1463_v2 = vmul.f32 1.442695, %v1448_v30  ;;  %2255 = vmatmul.msk.f32.vlgmr.msra.gmra.mxu2 %vm1392_vm3, %v2379_v1  ;;  %v1491_v9 = vsel %vm1392_vm3, %v2379_v1, 0.0  ;;  %v1439_v36 = vmul.f32 1.442695, %v1424_v31 }
 0x280   : > { %v1453_v3 = vmul.f32 1.442695, %v1443_v63  ;;  %v2381_v4 = vpop.eup %2380  ;;  %v1451_v5 = vmul.f32 1.442695, %v1442_v0  ;;  %1492 = vadd.xlane.f32.xlu0 %v1491_v9  ;;  %v1429_v38 = vmul.f32 1.442695, %v1419_v33 }
 0x281   : > { %2382 = vpow2.f32 %v1463_v2  ;;  %2249 = vmatmul.msk.f32.vlgmr.msrb.gmra.mxu3 %vm1392_vm3, %v2381_v4  ;;  %v1473_v7 = vsel %vm1392_vm3, %v2381_v4, 0.0  ;;  %v1427_v42 = vmul.f32 1.442695, %v1418_v35 }
 0x282   : > { %1474 = vadd.xlane.f32.xlu2 %v1473_v7  ;;  %2384 = vpow2.f32 %v1453_v3 }
 0x283   : > { %2386 = vpow2.f32 %v1451_v5 }
 0x285   : > { %v1404_v8 = vpop.xlane.xlu0 %1403  ;;  %v1410_v10 = vpop.xlane.xlu2 %1409 }
 0x286   : > { %v1444_v11 = vsub.f32 %v1319_v45, %v1404_v8  ;;  %v1446_v12 = vsub.f32 %v1354_v6, %v1410_v10  ;;  %v1420_v37 = vsub.f32 -inf, %v1404_v8  ;;  %v1422_v32 = vsub.f32 -inf, %v1410_v10 }
 0x287   : > { %v2383_v13 = vpop.eup %2382 }
 0x288   : > { %v1455_v14 = vmul.f32 1.442695, %v1444_v11  ;;  %v1459_v15 = vmul.f32 1.442695, %v1446_v12  ;;  %2256 = vmatmul.msk.f32.gmra.mxu2 %vm1392_vm3, %v2383_v13  ;;  %v2385_v39 = vpop.eup %2384  ;;  %v1494_v20 = vsel %vm1392_vm3, %v2383_v13, 0.0 }
 0x289   : > { %2251 = vmatmul.msk.f32.vlgmr.msra.gmra.mxu0 %vm1392_vm3, %v2385_v39  ;;  %v1479_v16 = vsel %vm1392_vm3, %v2385_v39, 0.0  ;;  %v2387_v61 = vpop.eup %2386  ;;  %v1431_v44 = vmul.f32 1.442695, %v1420_v37  ;;  %v1435_v46 = vmul.f32 1.442695, %v1422_v32 }
 0x28a   : > { %2388 = vpow2.f32 %v1455_v14  ;;  %1480 = vadd.xlane.f32.xlu1 %v1479_v16  ;;  %2250 = vmatmul.msk.f32.gmra.mxu3 %vm1392_vm3, %v2387_v61  ;;  %v1476_v18 = vsel %vm1392_vm3, %v2387_v61, 0.0 }
 0x28b   : > { %2390 = vpow2.f32 %v1459_v15  ;;  %1477 = vadd.xlane.f32.xlu0 %v1476_v18 }
 0x28c   : > { %2392 = vpow2.f32 %v1433_v26 }
 0x28d   : > { %2394 = vpow2.f32 %v1437_v17 }
 0x28e   : > { %2396 = vpow2.f32 %v1425_v29 }
 0x28f   : > { %2398 = vpow2.f32 %v1439_v36 }
 0x290   : > { %v2389_v19 = vpop.eup %2388  ;;  %2400 = vpow2.f32 %v1429_v38 }
 0x291   : > { %v2391_v25 = vpop.eup %2390  ;;  %2252 = vmatmul.msk.f32.gmra.mxu0 %vm1392_vm3, %v2389_v19  ;;  %v1482_v22 = vsel %vm1392_vm3, %v2389_v19, 0.0 }
 0x292   : > { %2254 = vmatmul.msk.f32.gmra.mxu1 %vm1392_vm3, %v2391_v25  ;;  %1495 = vadd.xlane.f32.xlu1 %v1494_v20  ;;  %v1488_v21 = vsel %vm1392_vm3, %v2391_v25, 0.0  ;;  %v2393_v34 = vpop.eup %2392 }
 0x293   : > { %1489 = vadd.xlane.f32.xlu2 %v1488_v21  ;;  %v1469_v41 = vmul.f32 0.0, %v2393_v34  ;;  %v2395_v45 = vpop.eup %2394 }
 0x294   : > { %v2397_v47 = vpop.eup %2396  ;;  %v3261_v49 = vmul.f32 0.0, %v2395_v45 }
 0x295   : > { %v3263_v51 = vmul.f32 0.0, %v2397_v47  ;;  %v2399_v52 = vpop.eup %2398 }
 0x296   : > { %v2401_v48 = vpop.eup %2400  ;;  %v3270_v0 = vmul.f32 0.0, %v2399_v52 }
 0x297   : > { %v3272_v3 = vmul.f32 0.0, %v2401_v48 }
 0x29b   : > { %1483 = vadd.xlane.f32.xlu2 %v1482_v22 }
 0x2ee   : > { %v1487_v43 = vpop.xlane.xlu1 %1486 }
 0x2ef   : > { %v1501_v6 = vadd.f32 %v1487_v43, %v1469_v41 }
 0x2f1   : > { %2402 = vrcp.f32 %v1501_v6  ;;  %v1694_v30 = vand.u32 2147483647, %v1501_v6  ;;  %v1696_v63 = vand.u32 2147483648, %v1501_v6  ;;  %vm1690_vm5 = vweird.f32 %v1501_v6 }
 0x2f2   : > { %2404 = vpow2.f32 %v1427_v42 }
 0x2f3   : > { %2406 = vpow2.f32 %v1431_v44  ;;  %v1493_v50 = vpop.xlane.xlu0 %1492  ;;  %vm3276_vm6 = vcmp.eq.f32.partialorder %v1694_v30, 8.507059e+37  ;;  %v1697_v13 = vor.u32 1.1754944e-38, %v1696_v63 }
 0x2f4   : > { %2408 = vpow2.f32 %v1435_v46  ;;  %v1503_v53 = vadd.f32 %v1493_v50, %v3261_v49 }
 0x2f5   : > { %v1475_v54 = vpop.xlane.xlu2 %1474 }
 0x2f6   : > { %v3267_v55 = vadd.f32 %v1475_v54, %v3263_v51  ;;  %2410 = vrcp.f32 %v1503_v53  ;;  %v1722_v15 = vand.u32 2147483647, %v1503_v53  ;;  %v1724_v18 = vand.u32 2147483648, %v1503_v53 }
 0x2f7   : > { %v2403_v56 = vpop.eup %2402  ;;  %v1586_v1 = vpop.f32.mrf.mxu1  ;;  %vm1718_vm8 = vweird.f32 %v1503_v53 }
 0x2f8   : > { %v2405_v57 = vpop.eup %2404  ;;  %v1686_v62 = vmul.f32 %v2403_v56, %v1501_v6  ;;  %2412 = vrcp.f32 %v3267_v55  ;;  %vm1691_vm4 = vweird.f32 %v2403_v56  ;;  %v1625_v16 = vadd.f32 %v1586_v1, %v1469_v41 }
 0x2f9   : > { %v2407_v59 = vpop.eup %2406  ;;  %v3274_v4 = vmul.f32 0.0, %v2405_v57  ;;  %vm1692_vm7 = vmor %vm1690_vm5, %vm1691_vm4  ;;  %v1638_v21 = vand.u32 2147483647, %v3267_v55  ;;  %v1640_v22 = vand.u32 2147483648, %v3267_v55  ;;  %vm1634_vm10 = vweird.f32 %v3267_v55 }
 0x2fa   : > { %v2409_v60 = vpop.eup %2408  ;;  %v1687_v27 = vsub.f32 1.0, %v1686_v62  ;;  %v3282_v8 = vmul.f32 0.0, %v2407_v59  ;;  %vm3299_vm12 = vcmp.eq.f32.partialorder %v1722_v15, 8.507059e+37  ;;  %v1725_v36 = vor.u32 1.1754944e-38, %v1724_v18 }
 0x2fb   : > { %v3280_v7 = vmul.f32 0.0, %v2409_v60  ;;  %vm3304_vm13 = vcmp.eq.f32.partialorder %v1638_v21, 8.507059e+37  ;;  %v1641_v41 = vor.u32 1.1754944e-38, %v1640_v22 }
 0x2fc   : > { %v1688_v2 = vmul.f32 %v2403_v56, %v1687_v27  ;;  %v2411_v9 = vpop.eup %2410 }
 0x2fd   : > { %v1714_v11 = vmul.f32 %v2411_v9, %v1503_v53  ;;  %v1481_v14 = vpop.xlane.xlu1 %1480  ;;  %vm1719_vm9 = vweird.f32 %v2411_v9 }
 0x2fe   : > { %v2413_v10 = vpop.eup %2412  ;;  %v1689_v12 = vadd.f32 %v2403_v56, %v1688_v2  ;;  %v3287_v61 = vadd.f32 %v1481_v14, %v3272_v3  ;;  %v1478_v20 = vpop.xlane.xlu0 %1477  ;;  %vm1720_vm14 = vmor %vm1718_vm8, %vm1719_vm9 }
 0x2ff   : > { %v1630_v39 = vmul.f32 %v2413_v10, %v3267_v55  ;;  %v1715_v19 = vsub.f32 1.0, %v1714_v11  ;;  %v3295_v28 = vadd.f32 %v1478_v20, %v3274_v4  ;;  %vm1635_vm11 = vweird.f32 %v2413_v10 }
 0x300   : > { %v1693_v25 = vsel %vm1692_vm7, %v2403_v56, %v1689_v12  ;;  %2414 = vrcp.f32 %v3287_v61  ;;  %v1666_v37 = vand.u32 2147483647, %v3287_v61  ;;  %v1668_v42 = vand.u32 2147483648, %v3287_v61  ;;  %vm1636_vm15 = vmor %vm1634_vm10, %vm1635_vm11 }
 0x301   : > { %v1631_v24 = vsub.f32 1.0, %v1630_v39  ;;  %v1698_v26 = vsel %vm3276_vm6, %v1697_v13, %v1693_v25  ;;  %v1716_v29 = vmul.f32 %v2411_v9, %v1715_v19  ;;  %2416 = vrcp.f32 %v3295_v28 }
 0x302   : > { %v1745_v23 = vmul.f32 %v1698_v26, %v1625_v16  ;;  %v1615_v17 = vpop.f32.mrf.mxu2  ;;  %vm1662_vm4 = vweird.f32 %v3287_v61  ;;  %v1652_v48 = vand.u32 2147483647, %v3295_v28  ;;  %vm3324_vm5 = vcmp.eq.f32.partialorder %v1666_v37, 8.507059e+37 }
 0x303   : > { %v1632_v31 = vmul.f32 %v2413_v10, %v1631_v24  ;;  %v1717_v34 = vadd.f32 %v2411_v9, %v1716_v29  ;;  %v1627_v6 = vadd.f32 %v1615_v17, %v3261_v49  ;;  %v1669_v30 = vor.u32 1.1754944e-38, %v1668_v42 }
 0x304   : > { %v1528_v33 = vpop.f32.mrf.mxu3  ;;  %v1749_v43 = vrot.slane %v1745_v23, 4  ;;  %vm1648_vm6 = vweird.f32 %v3295_v28  ;;  %vm3333_vm7 = vcmp.eq.f32.partialorder %v1652_v48, 8.507059e+37  ;;  %v1654_v5 = vand.u32 2147483648, %v3295_v28 }
 0x305   : > { %v1633_v38 = vadd.f32 %v2413_v10, %v1632_v31  ;;  %v1621_v44 = vadd.f32 %v1528_v33, %v3263_v51  ;;  %v1721_v45 = vsel %vm1720_vm14, %v2411_v9, %v1717_v34  ;;  %v1496_v46 = vpop.xlane.xlu1 %1495 }
 0x306   : > { %v2415_v47 = vpop.eup %2414  ;;  %v1726_v52 = vsel %vm3299_vm12, %v1725_v36, %v1721_v45  ;;  %v3315_v53 = vadd.f32 %v1496_v46, %v3270_v0  ;;  %v1490_v54 = vpop.xlane.xlu2 %1489  ;;  %v1655_v22 = vor.u32 1.1754944e-38, %v1654_v5 }
 0x307   : > { %v1637_v50 = vsel %vm1636_vm15, %v2413_v10, %v1633_v38  ;;  %v1658_v51 = vmul.f32 %v2415_v47, %v3287_v61  ;;  %v3322_v55 = vadd.f32 %v1490_v54, %v3280_v7  ;;  %v1557_v56 = vpop.f32.mrf.mxu0  ;;  %v2417_v62 = vpop.eup %2416  ;;  %v1747_v63 = vmul.f32 %v1726_v52, %v1627_v6 }
 0x308   : > { %v1642_v49 = vsel %vm3304_vm13, %v1641_v41, %v1637_v50  ;;  %2418 = vrcp.f32 %v3315_v53  ;;  %v1644_v27 = vmul.f32 %v2417_v62, %v3295_v28  ;;  %vm1663_vm8 = vweird.f32 %v2415_v47 }
 0x309   : > { %v1741_v59 = vmul.f32 %v1642_v49, %v1621_v44  ;;  %v1659_v60 = vsub.f32 1.0, %v1658_v51  ;;  %2420 = vrcp.f32 %v3322_v55  ;;  %v1623_v15 = vadd.f32 %v1557_v56, %v3272_v3  ;;  %vm1664_vm10 = vmor %vm1662_vm4, %vm1663_vm8 }
 0x30a   : > { %v1645_v10 = vsub.f32 1.0, %v1644_v27  ;;  %v1736_v39 = vand.u32 2147483647, %v3315_v53  ;;  %v1738_v16 = vand.u32 2147483648, %v3315_v53  ;;  %v1761_v18 = vrot.slane %v1747_v63, 4 }
 0x30b   : > { %v1750_v1 = vsel %vm479_vm1, %v1749_v43, %v1741_v59  ;;  %v1751_v2 = vrot.slane %v1741_v59, 4  ;;  %v1660_v12 = vmul.f32 %v2415_v47, %v1659_v60  ;;  %v1618_v13 = vpop.f32.mrf.mxu2  ;;  %vm1649_vm9 = vweird.f32 %v2417_v62 }
 0x30c   : > { %v3339_v11 = vperm.slane %v1750_v1, %v2921_v40  ;;  %v1646_v25 = vmul.f32 %v2417_v62, %v1645_v10  ;;  %v1628_v24 = vadd.f32 %v1618_v13, %v3270_v0  ;;  %vm1732_vm11 = vweird.f32 %v3315_v53  ;;  %vm1650_vm13 = vmor %vm1648_vm6, %vm1649_vm9 }
 0x30d   : > { %v1752_v14 = vsel %vm479_vm1, %v1745_v23, %v1751_v2  ;;  %v1661_v19 = vadd.f32 %v2415_v47, %v1660_v12  ;;  %v1531_v31 = vpop.f32.mrf.mxu3  ;;  %vm3354_vm12 = vcmp.eq.f32.partialorder %v1736_v39, 8.507059e+37  ;;  %v1739_v35 = vor.u32 1.1754944e-38, %v1738_v16 }
 0x30e   : > { %v2419_v20 = vpop.eup %2418  ;;  %v1760_v21 = vperm.slane %v1752_v14, %v2921_v40  ;;  %v1484_v3 = vpop.xlane.xlu2 %1483  ;;  %v1775_v23 = vrot.slane %v3339_v11, 4  ;;  %v1647_v34 = vadd.f32 %v2417_v62, %v1646_v25  ;;  %v1708_v41 = vand.u32 2147483647, %v3322_v55 }
 0x30f   : > { %v3350_v26 = vpop.eup %2420  ;;  %v1728_v17 = vmul.f32 %v2419_v20, %v3315_v53  ;;  %v1665_v29 = vsel %vm1664_vm10, %v2415_v47, %v1661_v19  ;;  %v3366_v38 = vadd.f32 %v1484_v3, %v3282_v8  ;;  %v1560_v32 = vpop.f32.mrf.mxu0  ;;  %v1622_v43 = vadd.f32 %v1531_v31, %v3274_v4 }
 0x310   : > { %v1700_v61 = vmul.f32 %v3350_v26, %v3322_v55  ;;  %v1670_v0 = vsel %vm3324_vm5, %v1669_v30, %v1665_v29  ;;  %v1787_v42 = vrot.slane %v1760_v21, 4  ;;  %v1651_v44 = vsel %vm1650_vm13, %v2417_v62, %v1647_v34  ;;  %v1589_v6 = vpop.f32.mrf.mxu1 }
 0x311   : > { %v1729_v36 = vsub.f32 1.0, %v1728_v17  ;;  %v1743_v37 = vmul.f32 %v1670_v0, %v1623_v15  ;;  %vm1733_vm14 = vweird.f32 %v2419_v20  ;;  %v1656_v47 = vsel %vm3333_vm7, %v1655_v22, %v1651_v44 }
 0x312   : > { %v1701_v50 = vsub.f32 1.0, %v1700_v61  ;;  %2422 = vrcp.f32 %v3366_v38  ;;  %v3376_v54 = vadd.f32 %v1560_v32, %v3282_v8  ;;  %v3379_v48 = vmul.f32 %v1656_v47, %v1622_v43  ;;  %vm1734_vm4 = vmor %vm1732_vm11, %vm1733_vm14 }
 0x313   : > { %v1762_v45 = vsel %vm479_vm1, %v1761_v18, %v1743_v37  ;;  %v1763_v46 = vrot.slane %v1743_v37, 4  ;;  %v1730_v28 = vmul.f32 %v2419_v20, %v1729_v36  ;;  %v1626_v49 = vadd.f32 %v1589_v6, %v3280_v7 }
 0x314   : > { %v1768_v52 = vperm.slane %v1762_v45, %v2921_v40  ;;  %vm1704_vm15 = vweird.f32 %v3322_v55  ;;  %vm1705_vm5 = vweird.f32 %v3350_v26  ;;  %v1680_v30 = vand.u32 2147483647, %v3366_v38 }
 0x315   : > { %v1764_v4 = vsel %vm479_vm1, %v1747_v63, %v1763_v46  ;;  %v1731_v51 = vadd.f32 %v2419_v20, %v1730_v28  ;;  %v1682_v7 = vand.u32 2147483648, %v3366_v38  ;;  %v1807_v5 = vrot.slane %v3379_v48, 4  ;;  %vm1706_vm9 = vmor %vm1704_vm15, %vm1705_vm5 }
 0x316   : > { %v1772_v56 = vperm.slane %v1764_v4, %v2921_v40  ;;  %v1773_v57 = vrot.slane %v1768_v52, 4  ;;  %v1776_v62 = vsel %vm479_vm1, %v1768_v52, %v1775_v23  ;;  %vm1676_vm6 = vweird.f32 %v3366_v38 }
 0x317   : > { %v1784_v8 = vperm.slane %v1776_v62, %v2932_v58  ;;  %v1735_v59 = vsel %vm1734_vm4, %v2419_v20, %v1731_v51  ;;  %v1710_v14 = vand.u32 2147483648, %v3322_v55  ;;  %vm1709_vm8 = vcmp.eq.f32.partialorder %v1708_v41, 8.507059e+37 }
 0x318   : > { %v1774_v60 = vsel %vm479_vm1, %v1773_v57, %v3339_v11  ;;  %v1785_v27 = vrot.slane %v1772_v56, 4  ;;  %v1788_v63 = vsel %vm479_vm1, %v1772_v56, %v1787_v42  ;;  %v1740_v1 = vsel %vm3354_vm12, %v1739_v35, %v1735_v59  ;;  %v2423_v10 = vpop.eup %2422 }
 0x319   : > { %v1780_v53 = vperm.slane %v1774_v60, %v2932_v58  ;;  %v1796_v2 = vperm.slane %v1788_v63, %v2932_v58  ;;  %v1799_v9 = vrot.slane %v1784_v8, 4  ;;  %v3401_v13 = vmul.f32 %v1740_v1, %v1628_v24 }
 0x31a   : > { %v1786_v12 = vsel %vm479_vm1, %v1785_v27, %v1760_v21  ;;  %v1702_v11 = vmul.f32 %v3350_v26, %v1701_v50  ;;  %v1672_v25 = vmul.f32 %v2423_v10, %v3366_v38  ;;  %vm1677_vm7 = vweird.f32 %v2423_v10 }
 0x31b   : > { %v1792_v15 = vperm.slane %v1786_v12, %v2932_v58  ;;  %v1797_v39 = vrot.slane %v1780_v53, 4  ;;  %v1800_v16 = vsel %vm479_vm1, 0.0, %v1799_v9  ;;  %v1803_v18 = vrot.slane %v1796_v2, 4  ;;  %vm1678_vm11 = vmor %vm1676_vm6, %vm1677_vm7 }
 0x31c   : > { %v1866_v19 = vrot.slane %v1800_v16, 4  ;;  %v1703_v20 = vadd.f32 %v3350_v26, %v1702_v11  ;;  %v1711_v21 = vor.u32 1.1754944e-38, %v1710_v14  ;;  %v1673_v3 = vsub.f32 1.0, %v1672_v25 }
 0x31d   : > { %v1798_v22 = vsel %vm479_vm1, 0.0, %v1797_v39  ;;  %v1801_v24 = vrot.slane %v1792_v15, 4  ;;  %v1804_v23 = vsel %vm479_vm1, 0.0, %v1803_v18  ;;  %v1861_v17 = vsel %vm479_vm1, %v1799_v9, %v1780_v53 }
 0x31e   : > { %v1867_v29 = vsel %vm479_vm1, %v1866_v19, %v1798_v22  ;;  %v1707_v31 = vsel %vm1706_vm9, %v3350_v26, %v1703_v20  ;;  %v1865_v61 = vperm.slane %v1861_v17, %v2921_v40  ;;  %v1674_v34 = vmul.f32 %v2423_v10, %v1673_v3 }
 0x31f   : > { %v1802_v33 = vsel %vm479_vm1, 0.0, %v1801_v24  ;;  %v1871_v0 = vperm.slane %v1867_v29, %v2921_v40  ;;  %v1712_v35 = vsel %vm1709_vm8, %v1711_v21, %v1707_v31  ;;  %v1872_v36 = vsel %vm479_vm1, %v1803_v18, %v1792_v15 }
 0x320   : > { %v1877_v55 = vrot.slane %v1804_v23, 4  ;;  %v1746_v37 = vmul.f32 %v1712_v35, %v1626_v49  ;;  %v1876_v32 = vperm.slane %v1872_v36, %v2921_v40  ;;  %v1885_v41 = vrot.slane %v1865_v61, 4 }
 0x321   : > { %v1883_v42 = vrot.slane %v1871_v0, 4  ;;  %v1675_v43 = vadd.f32 %v2423_v10, %v1674_v34  ;;  %vm1681_vm10 = vcmp.eq.f32.partialorder %v1680_v30, 8.507059e+37  ;;  %v1683_v44 = vor.u32 1.1754944e-38, %v1682_v7 }
 0x322   : > { %v1878_v26 = vsel %vm479_vm1, %v1877_v55, %v1802_v33  ;;  %v1805_v6 = vrot.slane %v1746_v37, 4  ;;  %v1808_v45 = vsel %vm479_vm1, %v1746_v37, %v1807_v5  ;;  %v1886_v47 = vsel %vm479_vm1, %v1871_v0, %v1885_v41 }
 0x323   : > { %v1882_v46 = vperm.slane %v1878_v26, %v2921_v40  ;;  %v1817_v28 = vrot.slane %v3401_v13, 4  ;;  %v1679_v50 = vsel %vm1678_vm11, %v2423_v10, %v1675_v43  ;;  %v1894_v52 = vperm.slane %v1886_v47, %v2932_v58 }
 0x324   : > { %v1897_v4 = vrot.slane %v1876_v32, 4  ;;  %v1684_v51 = vsel %vm1681_vm10, %v1683_v44, %v1679_v50  ;;  %v1806_v49 = vsel %vm479_vm1, %v1805_v6, %v3379_v48  ;;  %v1884_v38 = vsel %vm479_vm1, %v1883_v42, %v1865_v61 }
 0x325   : > { %v1895_v56 = vrot.slane %v1882_v46, 4  ;;  %v1744_v57 = vmul.f32 %v1684_v51, %v3376_v54  ;;  %v1812_v62 = vperm.slane %v1806_v49, %v2921_v40  ;;  %v1816_v8 = vperm.slane %v1808_v45, %v2921_v40 }
 0x326   : > { %v1898_v59 = vsel %vm479_vm1, %v1882_v46, %v1897_v4  ;;  %v1913_v7 = vrot.slane %v1894_v52, 4  ;;  %v1890_v60 = vperm.slane %v1884_v38, %v2932_v58  ;;  %vm1997_vm12 = vcmask 195584  }
 0x327   : > { %v1906_v30 = vperm.slane %v1898_v59, %v2932_v58  ;;  %v1896_v27 = vsel %vm479_vm1, %v1895_v56, %v1876_v32  ;;  %v1818_v48 = vsel %vm479_vm1, %v1817_v28, %v1744_v57  ;;  %v1819_v63 = vrot.slane %v1744_v57, 4 }
 0x328   : > { %v1831_v1 = vrot.slane %v1812_v62, 4  ;;  %v1902_v53 = vperm.slane %v1896_v27, %v2932_v58  ;;  %v1824_v54 = vperm.slane %v1818_v48, %v2921_v40  ;;  %v1909_v5 = vrot.slane %v1890_v60, 4  ;;  %v2004_v48 = vld [vmem:[#allocation10 + $0x78] sm:$0xff] }
 0x329   : > { %v1914_v2 = vsel %vm479_vm1, %v1906_v30, %v1913_v7  ;;  %v1911_v9 = vrot.slane %v1906_v30, 4  ;;  %v1820_v10 = vsel %vm479_vm1, %v3401_v13, %v1819_v63  ;;  %v1843_v12 = vrot.slane %v1816_v8, 4  ;;  %v2003_v63 = vld [vmem:[#allocation10 + $0x70] sm:$0xff]  ;;  %2025 = vmatpush.msra.mxu3 %v2004_v48 }
 0x32a   : > { %1987 = vrot.lane.b32.xlu2 %v1914_v2, %s2675_s29  ;;  %v1907_v11 = vrot.slane %v1902_v53, 4  ;;  %v1828_v14 = vperm.slane %v1820_v10, %v2921_v40  ;;  %v1829_v15 = vrot.slane %v1824_v54, 4  ;;  %v1832_v39 = vsel %vm479_vm1, %v1824_v54, %v1831_v1  ;;  %v2001_v1 = vld [vmem:[#allocation10 + $0x60] sm:$0xff] }
 0x32b   : > { %v1912_v16 = vsel %vm479_vm1, %v1911_v9, %v1894_v52  ;;  %v1840_v18 = vperm.slane %v1832_v39, %v2932_v58  ;;  %v1910_v19 = vsel %vm479_vm1, %v1902_v53, %v1909_v5  ;;  %2026 = vmatpush.msra.mxu3 %v2003_v63 }
 0x32c   : > { %1979 = vrot.lane.b32.xlu1 %v1912_v16, %s2676_s13  ;;  %v3457_v13 = vsel %vm479_vm1, %v1907_v11, %v1890_v60  ;;  %v1841_v25 = vrot.slane %v1828_v14, 4  ;;  %v1830_v20 = vsel %vm479_vm1, %v1829_v15, %v1812_v62  ;;  %v1844_v21 = vsel %vm479_vm1, %v1828_v14, %v1843_v12  ;;  %1971 = vrot.lane.b32.xlu0 %v1910_v19, %s2677_s8 }
 0x32d   : > { %v1836_v22 = vperm.slane %v1830_v20, %v2932_v58  ;;  %v1852_v24 = vperm.slane %v1844_v21, %v2932_v58  ;;  %v1855_v3 = vrot.slane %v1840_v18, 4  ;;  %v2375_v18 = vld [vmem:[#allocation12 + $0x3] ss:$0 sm:$0xff] }
 0x32e   : > { %v1842_v23 = vsel %vm479_vm1, %v1841_v25, %v1816_v8 }
 0x32f   : > { %v1848_v17 = vperm.slane %v1842_v23, %v2932_v58  ;;  %v1859_v29 = vrot.slane %v1852_v24, 4  ;;  %v1853_v31 = vrot.slane %v1836_v22, 4  ;;  %v1856_v33 = vsel %vm479_vm1, 0.0, %v1855_v3 }
 0x330   : > { %v1915_v61 = vsel %vm479_vm1, %v1855_v3, %v1836_v22  ;;  %v1920_v0 = vrot.slane %v1856_v33, 4 }
 0x331   : > { %v1857_v34 = vrot.slane %v1848_v17, 4  ;;  %v1860_v35 = vsel %vm479_vm1, 0.0, %v1859_v29  ;;  %v1854_v36 = vsel %vm479_vm1, 0.0, %v1853_v31  ;;  %v1919_v55 = vperm.slane %v1915_v61, %v2921_v40 }
 0x332   : > { %v1931_v37 = vrot.slane %v1860_v35, 4  ;;  %v1921_v32 = vsel %vm479_vm1, %v1920_v0, %v1854_v36  ;;  %v1926_v41 = vsel %vm479_vm1, %v1859_v29, %v1848_v17 }
 0x333   : > { %v1858_v42 = vsel %vm479_vm1, 0.0, %v1857_v34  ;;  %v1925_v43 = vperm.slane %v1921_v32, %v2921_v40  ;;  %v1930_v44 = vperm.slane %v1926_v41, %v2921_v40  ;;  %v1939_v26 = vrot.slane %v1919_v55, 4 }
 0x334   : > { %v1932_v6 = vsel %vm479_vm1, %v1931_v37, %v1858_v42 }
 0x335   : > { %v1936_v45 = vperm.slane %v1932_v6, %v2921_v40  ;;  %v1951_v46 = vrot.slane %v1930_v44, 4  ;;  %v1937_v47 = vrot.slane %v1925_v43, 4  ;;  %v1940_v28 = vsel %vm479_vm1, %v1925_v43, %v1939_v26 }
 0x336   : > { %v1948_v56 = vperm.slane %v1940_v28, %v2932_v58 }
 0x337   : > { %v1952_v50 = vsel %vm479_vm1, %v1936_v45, %v1951_v46  ;;  %v1938_v52 = vsel %vm479_vm1, %v1937_v47, %v1919_v55  ;;  %v1949_v4 = vrot.slane %v1936_v45, 4 }
 0x338   : > { %v1960_v51 = vperm.slane %v1952_v50, %v2932_v58  ;;  %v1944_v49 = vperm.slane %v1938_v52, %v2932_v58  ;;  %v1967_v60 = vrot.slane %v1948_v56, 4 }
 0x339   : > { %v1950_v38 = vsel %vm479_vm1, %v1949_v4, %v1930_v44 }
 0x33a   : > { %v1965_v57 = vrot.slane %v1960_v51, 4  ;;  %v1956_v40 = vperm.slane %v1950_v38, %v2932_v58  ;;  %v1963_v62 = vrot.slane %v1944_v49, 4  ;;  %v1968_v27 = vsel %vm479_vm1, %v1960_v51, %v1967_v60  ;;  %v2002_v58 = vld [vmem:[#allocation10 + $0x68] sm:$0xff] }
 0x33b   : > { %2027 = vmatpush.msra.mxu3 %v2002_v58 }
 0x33c   : > { %v1966_v8 = vsel %vm479_vm1, %v1965_v57, %v1948_v56  ;;  %v1961_v59 = vrot.slane %v1956_v40, 4  ;;  %v1964_v30 = vsel %vm479_vm1, %v1956_v40, %v1963_v62 }
 0x33d   : > { %1981 = vrot.lane.b32.xlu1 %v1966_v8, %s2676_s13  ;;  %1973 = vrot.lane.b32.xlu0 %v1964_v30, %s2677_s8 }
 0x33e   : > { %v1962_v7 = vsel %vm479_vm1, %v1961_v59, %v1944_v49  ;;  %2028 = vmatpush.msra.mxu3 %v2001_v1 }
 0x345   : > { %1989 = vrot.lane.b32.xlu0 %v1968_v27, %s2675_s29 }
 0x384   : > { %v1988_v9 = vpop.permute.xlu2 %1987 }
 0x39e   : > { %v1980_v53 = vpop.permute.xlu1 %1979  ;;  %v1972_v54 = vpop.permute.xlu0 %1971 }
 0x39f   : > { %v1993_v2 = vsel %vm699_vm2, %v3457_v13, %v1972_v54 }
 0x3a0   : > { %v1995_v5 = vsel %vm1392_vm3, %v1993_v2, %v1980_v53 }
 0x3a1   : > { %v1998_v10 = vsel %vm1997_vm12, %v1995_v5, %v1988_v9 }
 0x3a2   : > { %2257 = vmatmul.msk.f32.vlgmr.msra.gmra.mxu3 %vm392_vm0, %v1998_v10 }
 0x3af   : > { %v1974_v12 = vpop.permute.xlu0 %1973  ;;  %v1982_v11 = vpop.permute.xlu1 %1981 }
 0x3b0   : > { %v1994_v14 = vsel %vm699_vm2, %v1962_v7, %v1974_v12 }
 0x3b1   : > { %v1996_v39 = vsel %vm1392_vm3, %v1994_v14, %v1982_v11 }
 0x3b7   : > { %v1990_v15 = vpop.permute.xlu0 %1989 }
 0x3b8   : > { %v1999_v16 = vsel %vm1997_vm12, %v1996_v39, %v1990_v15 }
 0x3b9   : > { %2258 = vmatmul.msk.f32.gmra.mxu3 %vm392_vm0, %v1999_v16 }
 0x425   : > { %v2030_v19 = vpop.f32.mrf.mxu3 }
 0x426   : > { %v2031_v13 = vadd.f32 %v2375_v18, %v2030_v19 }
 0x428   : > { %2036 = vst.msk [vmem:[%s374_s11] sm:$0xff] %vm392_vm0, %v2031_v13 }
 0x43c   : > { %v2033_v25 = vpop.f32.mrf.mxu3 }
 0x43d   : > { %v2034_v20 = vadd.f32 %v2375_v18, %v2033_v25 }
 0x43f   : > { %2037 = vst.msk [vmem:[%s374_s11 + $0x8] sm:$0xff] %vm392_vm0, %v2034_v20 }
 0x440   : > { %2601 = shalt.err (!%p2598_p0)
}
 0x441   : > { %s2678_s1 = smov 128  }
 0x442   : > { %2282 = dma.vmem_to_hbm [thread:$0]  (%p2789_p5), %s2054_s10, 256, %s2056_s9, %s2039_s23, %s2678_s1, %s2678_s1, %s2677_s8  }
 0x443 PF: > { %s3590_s6 = sld [smem:[#allocation18_spill]]  ;;  %p2302_p3 = pnand %p2210_p11, %p2754_p6 }
 0x444   : > { %s3592_s17 = sld [smem:[#allocation21_spill]] }
 0x445   : > { %p2303_p7 = pneg %p2302_p3 }
 0x449   : > { %s2070_s24 = sand.u32 1, %s3590_s6  }
 0x44a   : > { %s2071_s26 = scalar_lea.sflag [#allocation6], %s2070_s24 }
 0x44b   : > { %2639 = dma.done.wait (%p2303_p7), %s2071_s26, 256  }
 0x44c   : > { %2641 = vsyncadd (%p2303_p7), %s2071_s26, 4294967040  ;;  %s25_s23 = sadd.s32 1, %s3592_s17   ;;  %s3593_s25 = sld [smem:[#allocation19_spill]] }
 0x44d   : > { %p22_p9 = scmp.ge.s32.totalorder %s25_s23, 4   ;;  %s3594_s20 = sld [smem:[#allocation24_spill]] }
 0x44e   : > { %s3595_s21 = sld [smem:[#allocation20_spill]]  ;;  %s3597_s18 = smov %s2648_s19 }
 0x44f   : > { %s3596_s22 = sld [smem:[#allocation23_spill]]  ;;  %24 = sbr.rel (!%p22_p9) target bundleno = 12 (0xc), region = 124 }
 0x452   : > { %s3598_s19 = smov %s3593_s25 }
 0x454   :  { %2077 = vsyncpa [#allocation5], 1 }
 0x455   :  { %2079 = vsyncpa [#allocation5 + $0x1], 1 }
 0x456   :  { %2080 = vsyncpa [#allocation8], 1 }
 0x457   :  { %2082 = vsyncpa [#allocation8 + $0x1], 1 }
 0x458   :  { %2083 = vsyncpa [#allocation11], 1 }
 0x459   :  { %2084 = vsyncpa [#allocation6], 1 }
 0x45a   :  { %2086 = vsyncpa [#allocation6 + $0x1], 1 }

</bundles_post_ra>
